<compile_context>
chip_gen: v7x
topology: tpu7x:2x2x1
jax: 0.10.0
libtpu: 0.0.40
codegen_flags: <defaults>
</compile_context>

<pallas_src>
import functools

import jax
import jax.numpy as jnp
import numpy as np
from jax.experimental import pallas as pl
from jax.experimental.pallas import tpu as pltpu

IN_FEATURES = 2439
IN_PAD = 2560          # 2439 -> multiple of 128 (clean K tiling for layer 1)
C1, C2, C3 = 512, 256, 128
OUT_DIM = 50
OUT_PAD = 128          # lane-dense output store (avoids masked vst on width 50)
BN_EPS = 1e-5
NEG_BIG = -1e30        # mask value for padded class columns before softmax


def classifier_kernel(x_ref,
                      w1_ref, t1_ref,
                      w2_ref, t2_ref,
                      w3_ref, t3_ref,
                      w4_ref, t4_ref,
                      out_ref):
    """x:(TB,2560) bf16; w_i: bf16 with BN scale folded in; t_i: f32 bias+BN shift."""
    f32, bf16 = jnp.float32, jnp.bfloat16

    x = x_ref[...]                                                     # bf16
    # block1: Conv1d(2439->512, k3 s3 p1) + BN + ReLU   (center tap only, L==1)
    h = jnp.dot(x, w1_ref[...], preferred_element_type=f32) + t1_ref[...]
    h = jnp.maximum(h, 0.0)
    # block1: Conv1d(512->256) + BN + Dropout(id) + ReLU; MaxPool1d(3,3,1) on L==1 is identity
    h = jnp.dot(h.astype(bf16), w2_ref[...], preferred_element_type=f32) + t2_ref[...]
    h = jnp.maximum(h, 0.0)
    # block2: Conv1d(256->128) + BN + Dropout(id) + ReLU
    h = jnp.dot(h.astype(bf16), w3_ref[...], preferred_element_type=f32) + t3_ref[...]
    h = jnp.maximum(h, 0.0)
    # Flatten (no-op for L==1) + Linear(128->50, N-padded to 128) + BN + ReLU
    z = jnp.dot(h.astype(bf16), w4_ref[...], preferred_element_type=f32) + t4_ref[...]
    z = jnp.maximum(z, 0.0)

    # nn.Softmax() over the class dim; mask the 50->128 padding so it cannot
    # contribute to the normalization.
    col = jax.lax.broadcasted_iota(jnp.int32, z.shape, 1)
    z = jnp.where(col < OUT_DIM, z, NEG_BIG)
    z = z - jnp.max(z, axis=-1, keepdims=True)
    e = jnp.exp(z)
    denom = jnp.sum(e, axis=-1, keepdims=True)
    out_ref[...] = e * pl.reciprocal(denom, approx=True)   # divide on the EUP slot


# --------------------------------------------------------------------------- #
# Parameter construction / folding (plain JAX glue outside the kernel)
# --------------------------------------------------------------------------- #
def init_params(key):
    ks = jax.random.split(key, 16)
    p = {}

    def conv(kw, kb, cout, cin):
        fan_in = cin * 3
        bound = 1.0 / np.sqrt(fan_in)
        w = jax.random.uniform(kw, (cout, cin, 3), jnp.float32, -bound, bound)
        b = jax.random.uniform(kb, (cout,), jnp.float32, -bound, bound)
        return w, b

    def bn(kg, kb, c):
        gamma = jax.random.uniform(kg, (c,), jnp.float32, 0.5, 1.5)
        beta = 0.1 * jax.random.normal(kb, (c,), jnp.float32)
        mean = 0.1 * jax.random.normal(jax.random.fold_in(kg, 7), (c,), jnp.float32)
        var = jax.random.uniform(jax.random.fold_in(kb, 7), (c,), jnp.float32, 0.5, 1.5)
        return gamma, beta, mean, var

    p["w1"], p["b1"] = conv(ks[0], ks[1], C1, IN_FEATURES)
    p["bn1"] = bn(ks[2], ks[3], C1)
    p["w2"], p["b2"] = conv(ks[4], ks[5], C2, C1)
    p["bn2"] = bn(ks[6], ks[7], C2)
    p["w3"], p["b3"] = conv(ks[8], ks[9], C3, C2)
    p["bn3"] = bn(ks[10], ks[11], C3)
    bound = 1.0 / np.sqrt(C3)
    p["w4"] = jax.random.uniform(ks[12], (OUT_DIM, C3), jnp.float32, -bound, bound)
    p["b4"] = jax.random.uniform(ks[13], (OUT_DIM,), jnp.float32, -bound, bound)
    p["bn4"] = bn(ks[14], ks[15], OUT_DIM)
    return p


def _bn_fold(w_t, b, bn):
    """Fold eval-mode BatchNorm + bias into a (cin,cout) bf16 weight / f32 shift."""
    gamma, beta, mean, var = bn
    scale = gamma / jnp.sqrt(var + BN_EPS)             # (cout,)
    shift = beta - mean * scale
    w_f = (w_t * scale[None, :]).astype(jnp.bfloat16)  # BN scale folded into W
    t_f = (b * scale + shift).reshape(1, -1).astype(jnp.float32)
    return w_f, t_f


def prep_kernel_args(p):
    """Center-tap conv slices, BN+bias folding, K/N padding."""
    w1, t1 = _bn_fold(p["w1"][:, :, 1].T, p["b1"], p["bn1"])   # (2439,512)
    w1 = jnp.pad(w1, ((0, IN_PAD - IN_FEATURES), (0, 0)))      # zero rows: K pad
    w2, t2 = _bn_fold(p["w2"][:, :, 1].T, p["b2"], p["bn2"])   # (512,256)
    w3, t3 = _bn_fold(p["w3"][:, :, 1].T, p["b3"], p["bn3"])   # (256,128)
    w4, t4 = _bn_fold(p["w4"].T, p["b4"], p["bn4"])            # (128,50)
    w4 = jnp.pad(w4, ((0, 0), (0, OUT_PAD - OUT_DIM)))         # zero cols: N pad
    t4 = jnp.pad(t4, ((0, 0), (0, OUT_PAD - OUT_DIM)))
    return (w1, t1, w2, t2, w3, t3, w4, t4)


# --------------------------------------------------------------------------- #
# Wrapper
# --------------------------------------------------------------------------- #
def _round_up(n, m):
    return ((n + m - 1) // m) * m


def _vmem_limit_bytes():
    """~75% of physical VMEM: ~48 MiB on v7x, ~96-100 MiB on v5e/v6e."""
    try:
        cap = int(pltpu.get_tpu_info().vmem_capacity_bytes)
    except Exception:
        cap = 64 << 20            # conservative fallback, safe on every generation
    return max(32 << 20, min((cap * 3) // 4, 100 << 20))


@functools.partial(jax.jit, static_argnames=("batch_tile",))
def classifier_forward(x, params, *, batch_tile=256):
    # Accept (B, 2439) or (B1, B2, 2439) like the PyTorch module.
    orig_shape = x.shape
    if x.ndim == 3:
        x = x.reshape(orig_shape[0] * orig_shape[1], orig_shape[2])
    if x.shape[-1] != IN_FEATURES:
        # Guards the L==1 assumption (center-tap conv / MaxPool identity).
        raise ValueError(f"expected trailing dim {IN_FEATURES}, got {x.shape}")
    B = x.shape[0]

    # Batch tile: fills the MXU M dim, multiple of 16 for bf16 sublane packing,
    # never larger than the padded batch.  For large B, grid >= 2 so the
    # "parallel" axis can shard across v7x's two TensorCores.
    tb = min(batch_tile, _round_up(B, 16))
    B_pad = _round_up(B, tb)
    grid = (B_pad // tb,)

    x = jnp.pad(x, ((0, B_pad - B), (0, IN_PAD - IN_FEATURES))).astype(jnp.bfloat16)
    args = prep_kernel_args(params)

    const_spec = lambda a: pl.BlockSpec(a.shape, lambda i: (0, 0))
    in_specs = [pl.BlockSpec((tb, IN_PAD), lambda i: (i, 0))]
    in_specs += [const_spec(a) for a in args]

    flops = 2 * B_pad * (IN_PAD * C1 + C1 * C2 + C2 * C3 + C3 * OUT_PAD)
    bytes_accessed = (x.size * x.dtype.itemsize
                      + sum(int(a.size) * a.dtype.itemsize for a in args)
                      + B_pad * OUT_PAD * 4)
    cost = pl.CostEstimate(flops=flops,
                           transcendentals=B_pad * (OUT_PAD + 1),
                           bytes_accessed=bytes_accessed)

    out = pl.pallas_call(
        classifier_kernel,
        out_shape=jax.ShapeDtypeStruct((B_pad, OUT_PAD), jnp.float32),
        grid_spec=pltpu.PrefetchScalarGridSpec(
            num_scalar_prefetch=0,
            grid=grid,
            in_specs=in_specs,
            out_specs=pl.BlockSpec((tb, OUT_PAD), lambda i: (i, 0)),
        ),
        compiler_params=pltpu.CompilerParams(
            dimension_semantics=("parallel",),
            vmem_limit_bytes=_vmem_limit_bytes(),
        ),
        cost_estimate=cost,
    )(x, *args)

    out = out[:B, :OUT_DIM]      # drop batch padding and lane padding
    if len(orig_shape) == 3:
        out = out.reshape(orig_shape[0], orig_shape[1], OUT_DIM)
    return out


def reference_forward(x, params):
    """Pure-JAX reference with the same bf16 weight/activation quantization."""
    w1, t1, w2, t2, w3, t3, w4, t4 = prep_kernel_args(params)
    q = lambda a: a.astype(jnp.bfloat16).astype(jnp.float32)
    xp = jnp.pad(x, ((0, 0), (0, IN_PAD - IN_FEATURES)))
    h = jnp.maximum(q(xp) @ q(w1) + t1, 0.0)
    h = jnp.maximum(q(h) @ q(w2) + t2, 0.0)      # MaxPool1d on L==1 is identity
    h = jnp.maximum(q(h) @ q(w3) + t3, 0.0)
    z = jnp.maximum(q(h) @ q(w4) + t4, 0.0)[:, :OUT_DIM]
    return jax.nn.softmax(z, axis=-1)


if __name__ == "__main__":
    key = jax.random.PRNGKey(0)
    k_params, k_x = jax.random.split(key)
    params = init_params(k_params)

    # Drebin features are binary indicators; small deterministic batch.
    B = 32
    x = (jax.random.uniform(k_x, (B, IN_FEATURES)) < 0.1).astype(jnp.float32)

    out = classifier_forward(x, params)
    out = jax.block_until_ready(out)
    assert out.shape == (B, OUT_DIM)

    ref = reference_forward(x, params)
    np.testing.assert_allclose(np.asarray(out), np.asarray(ref),
                               atol=2e-3, rtol=2e-2)
    # rows of softmax sum to 1 (approx reciprocal -> small slack)
    np.testing.assert_allclose(np.asarray(out).sum(-1), np.ones(B), atol=5e-3)

    print("KERNEL_OK")
</pallas_src>

<mosaic_0001>
module attributes {stable_mosaic.version = 11 : i64} {
  func.func @classifier_kernel(%arg0: i32, %arg1: memref<32x2560xbf16, #tpu.memory_space<vmem>>, %arg2: memref<2560x512xbf16, #tpu.memory_space<vmem>>, %arg3: memref<1x512xf32, #tpu.memory_space<vmem>>, %arg4: memref<512x256xbf16, #tpu.memory_space<vmem>>, %arg5: memref<1x256xf32, #tpu.memory_space<vmem>>, %arg6: memref<256x128xbf16, #tpu.memory_space<vmem>>, %arg7: memref<1x128xf32, #tpu.memory_space<vmem>>, %arg8: memref<128x128xbf16, #tpu.memory_space<vmem>>, %arg9: memref<1x128xf32, #tpu.memory_space<vmem>>, %arg10: memref<32x128xf32, #tpu.memory_space<vmem>>) attributes {dimension_semantics = [#tpu.dimension_semantics<parallel>], iteration_bounds = array<i64: 1>, scalar_prefetch = 0 : i64, scratch_operands = 0 : i64, tpu.core_type = #tpu.core_type<tc>, window_params = [{transform_indices = @transform_0, window_bounds = array<i64: 32, 2560>}, {pipeline_mode = #tpu.pipeline_mode<synchronous>, transform_indices = @transform_1, window_bounds = array<i64: 2560, 512>}, {pipeline_mode = #tpu.pipeline_mode<synchronous>, transform_indices = @transform_2, window_bounds = array<i64: 1, 512>}, {pipeline_mode = #tpu.pipeline_mode<synchronous>, transform_indices = @transform_3, window_bounds = array<i64: 512, 256>}, {pipeline_mode = #tpu.pipeline_mode<synchronous>, transform_indices = @transform_4, window_bounds = array<i64: 1, 256>}, {pipeline_mode = #tpu.pipeline_mode<synchronous>, transform_indices = @transform_5, window_bounds = array<i64: 256, 128>}, {pipeline_mode = #tpu.pipeline_mode<synchronous>, transform_indices = @transform_6, window_bounds = array<i64: 1, 128>}, {pipeline_mode = #tpu.pipeline_mode<synchronous>, transform_indices = @transform_7, window_bounds = array<i64: 128, 128>}, {pipeline_mode = #tpu.pipeline_mode<synchronous>, transform_indices = @transform_8, window_bounds = array<i64: 1, 128>}, {transform_indices = @transform_9, window_bounds = array<i64: 32, 128>}]} {
    %c0 = arith.constant 0 : index
    %c0_0 = arith.constant 0 : index
    %0 = vector.load %arg1[%c0, %c0_0] : memref<32x2560xbf16, #tpu.memory_space<vmem>>, vector<32x2560xbf16>
    %c0_1 = arith.constant 0 : index
    %c0_2 = arith.constant 0 : index
    %1 = vector.load %arg2[%c0_1, %c0_2] : memref<2560x512xbf16, #tpu.memory_space<vmem>>, vector<2560x512xbf16>
    %cst = arith.constant dense<0.000000e+00> : vector<32x512xf32>
    %2 = tpu.matmul %0, %1, %cst {dimension_numbers = #tpu.dot_dimension_numbers<[1], [0], [0], [1], [0, 0, 1, 1], [], []>} : vector<32x2560xbf16>, vector<2560x512xbf16>, vector<32x512xf32> -> vector<32x512xf32>
    %c0_3 = arith.constant 0 : index
    %c0_4 = arith.constant 0 : index
    %3 = vector.load %arg3[%c0_3, %c0_4] : memref<1x512xf32, #tpu.memory_space<vmem>>, vector<1x512xf32>
    %4 = vector.broadcast %3 : vector<1x512xf32> to vector<32x512xf32>
    %5 = arith.addf %2, %4 : vector<32x512xf32>
    %cst_5 = arith.constant 0.000000e+00 : f32
    %6 = vector.broadcast %cst_5 : f32 to vector<32x512xf32>
    %7 = arith.maximumf %5, %6 : vector<32x512xf32>
    %8 = arith.truncf %7 : vector<32x512xf32> to vector<32x512xbf16>
    %c0_6 = arith.constant 0 : index
    %c0_7 = arith.constant 0 : index
    %9 = vector.load %arg4[%c0_6, %c0_7] : memref<512x256xbf16, #tpu.memory_space<vmem>>, vector<512x256xbf16>
    %cst_8 = arith.constant dense<0.000000e+00> : vector<32x256xf32>
    %10 = tpu.matmul %8, %9, %cst_8 {dimension_numbers = #tpu.dot_dimension_numbers<[1], [0], [0], [1], [0, 0, 1, 1], [], []>} : vector<32x512xbf16>, vector<512x256xbf16>, vector<32x256xf32> -> vector<32x256xf32>
    %c0_9 = arith.constant 0 : index
    %c0_10 = arith.constant 0 : index
    %11 = vector.load %arg5[%c0_9, %c0_10] : memref<1x256xf32, #tpu.memory_space<vmem>>, vector<1x256xf32>
    %12 = vector.broadcast %11 : vector<1x256xf32> to vector<32x256xf32>
    %13 = arith.addf %10, %12 : vector<32x256xf32>
    %cst_11 = arith.constant 0.000000e+00 : f32
    %14 = vector.broadcast %cst_11 : f32 to vector<32x256xf32>
    %15 = arith.maximumf %13, %14 : vector<32x256xf32>
    %16 = arith.truncf %15 : vector<32x256xf32> to vector<32x256xbf16>
    %c0_12 = arith.constant 0 : index
    %c0_13 = arith.constant 0 : index
    %17 = vector.load %arg6[%c0_12, %c0_13] : memref<256x128xbf16, #tpu.memory_space<vmem>>, vector<256x128xbf16>
    %cst_14 = arith.constant dense<0.000000e+00> : vector<32x128xf32>
    %18 = tpu.matmul %16, %17, %cst_14 {dimension_numbers = #tpu.dot_dimension_numbers<[1], [0], [0], [1], [0, 0, 1, 1], [], []>} : vector<32x256xbf16>, vector<256x128xbf16>, vector<32x128xf32> -> vector<32x128xf32>
    %c0_15 = arith.constant 0 : index
    %c0_16 = arith.constant 0 : index
    %19 = vector.load %arg7[%c0_15, %c0_16] : memref<1x128xf32, #tpu.memory_space<vmem>>, vector<1x128xf32>
    %20 = vector.broadcast %19 : vector<1x128xf32> to vector<32x128xf32>
    %21 = arith.addf %18, %20 : vector<32x128xf32>
    %cst_17 = arith.constant 0.000000e+00 : f32
    %22 = vector.broadcast %cst_17 : f32 to vector<32x128xf32>
    %23 = arith.maximumf %21, %22 : vector<32x128xf32>
    %24 = arith.truncf %23 : vector<32x128xf32> to vector<32x128xbf16>
    %c0_18 = arith.constant 0 : index
    %c0_19 = arith.constant 0 : index
    %25 = vector.load %arg8[%c0_18, %c0_19] : memref<128x128xbf16, #tpu.memory_space<vmem>>, vector<128x128xbf16>
    %cst_20 = arith.constant dense<0.000000e+00> : vector<32x128xf32>
    %26 = tpu.matmul %24, %25, %cst_20 {dimension_numbers = #tpu.dot_dimension_numbers<[1], [0], [0], [1], [0, 0, 1, 1], [], []>} : vector<32x128xbf16>, vector<128x128xbf16>, vector<32x128xf32> -> vector<32x128xf32>
    %c0_21 = arith.constant 0 : index
    %c0_22 = arith.constant 0 : index
    %27 = vector.load %arg9[%c0_21, %c0_22] : memref<1x128xf32, #tpu.memory_space<vmem>>, vector<1x128xf32>
    %28 = vector.broadcast %27 : vector<1x128xf32> to vector<32x128xf32>
    %29 = arith.addf %26, %28 : vector<32x128xf32>
    %cst_23 = arith.constant 0.000000e+00 : f32
    %30 = vector.broadcast %cst_23 : f32 to vector<32x128xf32>
    %31 = arith.maximumf %29, %30 : vector<32x128xf32>
    %32 = tpu.iota {dimensions = array<i32: 1>} : vector<32x128xi32>
    %c50_i32 = arith.constant 50 : i32
    %33 = vector.broadcast %c50_i32 : i32 to vector<32x128xi32>
    %34 = arith.cmpi slt, %32, %33 : vector<32x128xi32>
    %cst_24 = arith.constant -1.000000e+30 : f32
    %35 = vector.broadcast %cst_24 : f32 to vector<32x128xf32>
    %36 = arith.select %34, %31, %35 : vector<32x128xi1>, vector<32x128xf32>
    %cst_25 = arith.constant dense<0xFF800000> : vector<32xf32>
    %37 = vector.multi_reduction <maximumf>, %36, %cst_25 [1] : vector<32x128xf32> to vector<32xf32>
    %38 = vector.shape_cast %37 : vector<32xf32> to vector<32x1xf32>
    %39 = vector.broadcast %38 : vector<32x1xf32> to vector<32x128xf32>
    %40 = arith.subf %36, %39 : vector<32x128xf32>
    %41 = math.exp %40 : vector<32x128xf32>
    %cst_26 = arith.constant dense<0.000000e+00> : vector<32xf32>
    %42 = vector.multi_reduction <add>, %41, %cst_26 [1] : vector<32x128xf32> to vector<32xf32>
    %43 = vector.shape_cast %42 : vector<32xf32> to vector<32x1xf32>
    %44 = tpu.reciprocal %43 {approx = true} : vector<32x1xf32> -> vector<32x1xf32>
    %45 = vector.broadcast %44 : vector<32x1xf32> to vector<32x128xf32>
    %46 = arith.mulf %41, %45 : vector<32x128xf32>
    %c0_27 = arith.constant 0 : index
    %c0_28 = arith.constant 0 : index
    %47 = vector.load %arg10[%c0_27, %c0_28] : memref<32x128xf32, #tpu.memory_space<vmem>>, vector<32x128xf32>
    tpu.vector_store %arg10[%c0_27, %c0_28], %46 {strides = array<i32>} : memref<32x128xf32, #tpu.memory_space<vmem>>, vector<32x128xf32>,
    return
  }
  func.func @transform_0(%arg0: i32) -> (i32, i32) {
    %c0_i32 = arith.constant 0 : i32
    %c0_i32_0 = arith.constant 0 : i32
    return %arg0, %c0_i32 : i32, i32
  }
  func.func @transform_1(%arg0: i32) -> (i32, i32) {
    %c0_i32 = arith.constant 0 : i32
    %c0_i32_0 = arith.constant 0 : i32
    %c0_i32_1 = arith.constant 0 : i32
    return %c0_i32, %c0_i32_0 : i32, i32
  }
  func.func @transform_2(%arg0: i32) -> (i32, i32) {
    %c0_i32 = arith.constant 0 : i32
    %c0_i32_0 = arith.constant 0 : i32
    %c0_i32_1 = arith.constant 0 : i32
    return %c0_i32, %c0_i32_0 : i32, i32
  }
  func.func @transform_3(%arg0: i32) -> (i32, i32) {
    %c0_i32 = arith.constant 0 : i32
    %c0_i32_0 = arith.constant 0 : i32
    %c0_i32_1 = arith.constant 0 : i32
    return %c0_i32, %c0_i32_0 : i32, i32
  }
  func.func @transform_4(%arg0: i32) -> (i32, i32) {
    %c0_i32 = arith.constant 0 : i32
    %c0_i32_0 = arith.constant 0 : i32
    %c0_i32_1 = arith.constant 0 : i32
    return %c0_i32, %c0_i32_0 : i32, i32
  }
  func.func @transform_5(%arg0: i32) -> (i32, i32) {
    %c0_i32 = arith.constant 0 : i32
    %c0_i32_0 = arith.constant 0 : i32
    %c0_i32_1 = arith.constant 0 : i32
    return %c0_i32, %c0_i32_0 : i32, i32
  }
  func.func @transform_6(%arg0: i32) -> (i32, i32) {
    %c0_i32 = arith.constant 0 : i32
    %c0_i32_0 = arith.constant 0 : i32
    %c0_i32_1 = arith.constant 0 : i32
    return %c0_i32, %c0_i32_0 : i32, i32
  }
  func.func @transform_7(%arg0: i32) -> (i32, i32) {
    %c0_i32 = arith.constant 0 : i32
    %c0_i32_0 = arith.constant 0 : i32
    %c0_i32_1 = arith.constant 0 : i32
    return %c0_i32, %c0_i32_0 : i32, i32
  }
  func.func @transform_8(%arg0: i32) -> (i32, i32) {
    %c0_i32 = arith.constant 0 : i32
    %c0_i32_0 = arith.constant 0 : i32
    %c0_i32_1 = arith.constant 0 : i32
    return %c0_i32, %c0_i32_0 : i32, i32
  }
  func.func @transform_9(%arg0: i32) -> (i32, i32) {
    %c0_i32 = arith.constant 0 : i32
    %c0_i32_0 = arith.constant 0 : i32
    return %arg0, %c0_i32 : i32, i32
  }
}

</mosaic_0001>

<bundles_post_ra>
// kernel: classifier_forward.1
= control target key start
LH: loop header
LB: loop body
LE: loop exit
PB: predicated region body
PF: predicated region fallthrough
CT: control target
= control target key end

     0   :  { %s10885_s0 = inlined_call_operand.vmem [shape: bf16[32,2560], index: 0, kind: input, shape index: {}]   ;;  %s10886_s1 = inlined_call_operand.vmem [shape: bf16[2560,512], index: 1, kind: input, shape index: {}]   ;;  %s10887_s2 = inlined_call_operand.vmem [shape: f32[1,512], index: 2, kind: input, shape index: {}]   ;;  %s10888_s3 = inlined_call_operand.vmem [shape: bf16[512,256], index: 3, kind: input, shape index: {}]   ;;  %s10889_s4 = inlined_call_operand.vmem [shape: f32[1,256], index: 4, kind: input, shape index: {}]   ;;  %s10890_s5 = inlined_call_operand.vmem [shape: bf16[256,128], index: 5, kind: input, shape index: {}]   ;;  %s10891_s6 = inlined_call_operand.vmem [shape: f32[1,128], index: 6, kind: input, shape index: {}]   ;;  %s10892_s7 = inlined_call_operand.vmem [shape: bf16[128,128], index: 7, kind: input, shape index: {}]   ;;  %s10893_s8 = inlined_call_operand.vmem [shape: f32[1,128], index: 8, kind: input, shape index: {}]   ;;  %s10894_s9 = inlined_call_operand.hbm [shape: f32[32,128], index: 9, kind: output, shape index: {}]  }
   0x1   :  { %v7118_v0 = vld [vmem:[%s10886_s1 + $0x4] ss:$16 sps:$4 sm:$0xff]   ;;  %v7122_v2 = vld [vmem:[%s10886_s1] ss:$16 sps:$4 sm:$0xff]   ;;  %v8517_v51 = vld [vmem:[%s10885_s0 + $0xc] ss:$80 sps:$4 sm:$0xff]  }
   0x2   :  { %v7120_v1 = vld [vmem:[%s10886_s1 + $0x204] ss:$16 sps:$4 sm:$0xff]   ;;  %4136 = vmatprep.subr.bf16.mxu1 %v7118_v0  ;;  %v7123_v3 = vld [vmem:[%s10886_s1 + $0x200] ss:$16 sps:$4 sm:$0xff]   ;;  %4221 = vmatprep.mubr.bf16.mxu0 %v8517_v51 }
   0x3   :  { %4189 = vmatprep.subr.bf16.mxu0 %v7120_v1  ;;  %v7124_v4 = vld [vmem:[%s10886_s1 + $0x24] ss:$16 sps:$4 sm:$0xff]   ;;  %4137 = vmatpush1.bf16.msra.mxu1 %v7122_v2  ;;  %v7128_v6 = vld [vmem:[%s10886_s1 + $0x20] ss:$16 sps:$4 sm:$0xff]  }
   0x4   :  { %4190 = vmatpush1.bf16.msra.mxu0 %v7123_v3  ;;  %v7126_v5 = vld [vmem:[%s10886_s1 + $0x224] ss:$16 sps:$4 sm:$0xff]   ;;  %4138 = vmatprep.subr.bf16.mxu1 %v7124_v4  ;;  %v7129_v7 = vld [vmem:[%s10886_s1 + $0x220] ss:$16 sps:$4 sm:$0xff]   ;;  %v7225_v3 = vld [vmem:[%s10886_s1 + $0xc] ss:$16 sps:$4 sm:$0xff]  }
   0x5   :  { %4191 = vmatprep.subr.bf16.mxu0 %v7126_v5  ;;  %v7130_v8 = vld [vmem:[%s10886_s1 + $0x44] ss:$16 sps:$4 sm:$0xff]   ;;  %v7134_v10 = vld [vmem:[%s10886_s1 + $0x40] ss:$16 sps:$4 sm:$0xff]   ;;  %v8577_v5 = vld [vmem:[%s10885_s0 + $0x8] ss:$80 sps:$4 sm:$0xff]  }
   0x6   :  { %v7132_v9 = vld [vmem:[%s10886_s1 + $0x244] ss:$16 sps:$4 sm:$0xff]   ;;  %v7135_v11 = vld [vmem:[%s10886_s1 + $0x240] ss:$16 sps:$4 sm:$0xff]  }
   0x7   :  { %4139 = vmatpush1.bf16.msra.mxu1 %v7128_v6  ;;  %v7136_v12 = vld [vmem:[%s10886_s1 + $0x64] ss:$16 sps:$4 sm:$0xff]   ;;  %v7140_v14 = vld [vmem:[%s10886_s1 + $0x60] ss:$16 sps:$4 sm:$0xff]  }
   0x8   :  { %4192 = vmatpush1.bf16.msra.mxu0 %v7129_v7  ;;  %4140 = vmatprep.subr.bf16.mxu1 %v7130_v8  ;;  %v7138_v13 = vld [vmem:[%s10886_s1 + $0x264] ss:$16 sps:$4 sm:$0xff]   ;;  %v7141_v15 = vld [vmem:[%s10886_s1 + $0x260] ss:$16 sps:$4 sm:$0xff]   ;;  %v7223_v7 = vld [vmem:[%s10886_s1 + $0x8] ss:$16 sps:$4 sm:$0xff]  }
   0x9   :  { %4193 = vmatprep.subr.bf16.mxu0 %v7132_v9  ;;  %v7142_v16 = vld [vmem:[%s10886_s1 + $0x84] ss:$16 sps:$4 sm:$0xff]   ;;  %v7146_v18 = vld [vmem:[%s10886_s1 + $0x80] ss:$16 sps:$4 sm:$0xff]   ;;  %v7231_v9 = vld [vmem:[%s10886_s1 + $0x2c] ss:$16 sps:$4 sm:$0xff]  }
   0xa   :  { %v7144_v17 = vld [vmem:[%s10886_s1 + $0x284] ss:$16 sps:$4 sm:$0xff]   ;;  %v7147_v19 = vld [vmem:[%s10886_s1 + $0x280] ss:$16 sps:$4 sm:$0xff]  }
   0xb   :  { %4141 = vmatpush1.bf16.msra.mxu1 %v7134_v10  ;;  %v7148_v20 = vld [vmem:[%s10886_s1 + $0xa4] ss:$16 sps:$4 sm:$0xff]   ;;  %v7152_v22 = vld [vmem:[%s10886_s1 + $0xa0] ss:$16 sps:$4 sm:$0xff]  }
   0xc   :  { %4194 = vmatpush1.bf16.msra.mxu0 %v7135_v11  ;;  %4142 = vmatprep.subr.bf16.mxu1 %v7136_v12  ;;  %v7150_v21 = vld [vmem:[%s10886_s1 + $0x2a4] ss:$16 sps:$4 sm:$0xff]   ;;  %v7153_v23 = vld [vmem:[%s10886_s1 + $0x2a0] ss:$16 sps:$4 sm:$0xff]   ;;  %v7229_v11 = vld [vmem:[%s10886_s1 + $0x28] ss:$16 sps:$4 sm:$0xff]  }
   0xd   :  { %4195 = vmatprep.subr.bf16.mxu0 %v7138_v13  ;;  %v7154_v24 = vld [vmem:[%s10886_s1 + $0xc4] ss:$16 sps:$4 sm:$0xff]   ;;  %v7158_v26 = vld [vmem:[%s10886_s1 + $0xc0] ss:$16 sps:$4 sm:$0xff]   ;;  %v7237_v13 = vld [vmem:[%s10886_s1 + $0x4c] ss:$16 sps:$4 sm:$0xff]  }
   0xe   :  { %v7156_v25 = vld [vmem:[%s10886_s1 + $0x2c4] ss:$16 sps:$4 sm:$0xff]   ;;  %v7159_v27 = vld [vmem:[%s10886_s1 + $0x2c0] ss:$16 sps:$4 sm:$0xff]  }
   0xf   :  { %4143 = vmatpush1.bf16.msra.mxu1 %v7140_v14  ;;  %v7160_v28 = vld [vmem:[%s10886_s1 + $0xe4] ss:$16 sps:$4 sm:$0xff]   ;;  %v7164_v30 = vld [vmem:[%s10886_s1 + $0xe0] ss:$16 sps:$4 sm:$0xff]  }
  0x10   :  { %4196 = vmatpush1.bf16.msra.mxu0 %v7141_v15  ;;  %4144 = vmatprep.subr.bf16.mxu1 %v7142_v16  ;;  %v7162_v29 = vld [vmem:[%s10886_s1 + $0x2e4] ss:$16 sps:$4 sm:$0xff]   ;;  %v7165_v31 = vld [vmem:[%s10886_s1 + $0x2e0] ss:$16 sps:$4 sm:$0xff]   ;;  %v7235_v15 = vld [vmem:[%s10886_s1 + $0x48] ss:$16 sps:$4 sm:$0xff]  }
  0x11   :  { %4197 = vmatprep.subr.bf16.mxu0 %v7144_v17  ;;  %v7166_v32 = vld [vmem:[%s10886_s1 + $0x104] ss:$16 sps:$4 sm:$0xff]   ;;  %v7170_v34 = vld [vmem:[%s10886_s1 + $0x100] ss:$16 sps:$4 sm:$0xff]   ;;  %v7243_v17 = vld [vmem:[%s10886_s1 + $0x6c] ss:$16 sps:$4 sm:$0xff]  }
  0x12   :  { %v7168_v33 = vld [vmem:[%s10886_s1 + $0x304] ss:$16 sps:$4 sm:$0xff]   ;;  %v7171_v35 = vld [vmem:[%s10886_s1 + $0x300] ss:$16 sps:$4 sm:$0xff]  }
  0x13   :  { %4145 = vmatpush1.bf16.msra.mxu1 %v7146_v18  ;;  %v7172_v36 = vld [vmem:[%s10886_s1 + $0x124] ss:$16 sps:$4 sm:$0xff]   ;;  %v7176_v38 = vld [vmem:[%s10886_s1 + $0x120] ss:$16 sps:$4 sm:$0xff]  }
  0x14   :  { %4198 = vmatpush1.bf16.msra.mxu0 %v7147_v19  ;;  %4146 = vmatprep.subr.bf16.mxu1 %v7148_v20  ;;  %v7174_v37 = vld [vmem:[%s10886_s1 + $0x324] ss:$16 sps:$4 sm:$0xff]   ;;  %v7177_v39 = vld [vmem:[%s10886_s1 + $0x320] ss:$16 sps:$4 sm:$0xff]   ;;  %v7241_v19 = vld [vmem:[%s10886_s1 + $0x68] ss:$16 sps:$4 sm:$0xff]  }
  0x15   :  { %4199 = vmatprep.subr.bf16.mxu0 %v7150_v21  ;;  %v7178_v40 = vld [vmem:[%s10886_s1 + $0x144] ss:$16 sps:$4 sm:$0xff]   ;;  %v7182_v42 = vld [vmem:[%s10886_s1 + $0x140] ss:$16 sps:$4 sm:$0xff]   ;;  %v7249_v21 = vld [vmem:[%s10886_s1 + $0x8c] ss:$16 sps:$4 sm:$0xff]  }
  0x16   :  { %v7180_v41 = vld [vmem:[%s10886_s1 + $0x344] ss:$16 sps:$4 sm:$0xff]   ;;  %v7183_v43 = vld [vmem:[%s10886_s1 + $0x340] ss:$16 sps:$4 sm:$0xff]  }
  0x17   :  { %4147 = vmatpush1.bf16.msra.mxu1 %v7152_v22  ;;  %v7184_v44 = vld [vmem:[%s10886_s1 + $0x164] ss:$16 sps:$4 sm:$0xff]   ;;  %v7188_v46 = vld [vmem:[%s10886_s1 + $0x160] ss:$16 sps:$4 sm:$0xff]  }
  0x18   :  { %4200 = vmatpush1.bf16.msra.mxu0 %v7153_v23  ;;  %4148 = vmatprep.subr.bf16.mxu1 %v7154_v24  ;;  %v7186_v45 = vld [vmem:[%s10886_s1 + $0x364] ss:$16 sps:$4 sm:$0xff]   ;;  %v7189_v47 = vld [vmem:[%s10886_s1 + $0x360] ss:$16 sps:$4 sm:$0xff]   ;;  %v7247_v23 = vld [vmem:[%s10886_s1 + $0x88] ss:$16 sps:$4 sm:$0xff]  }
  0x19   :  { %4201 = vmatprep.subr.bf16.mxu0 %v7156_v25  ;;  %v7190_v48 = vld [vmem:[%s10886_s1 + $0x184] ss:$16 sps:$4 sm:$0xff]   ;;  %v7194_v52 = vld [vmem:[%s10886_s1 + $0x180] ss:$16 sps:$4 sm:$0xff]   ;;  %v7255_v25 = vld [vmem:[%s10886_s1 + $0xac] ss:$16 sps:$4 sm:$0xff]  }
  0x1a   :  { %v8509_v49 = vld [vmem:[%s10885_s0 + $0x4] ss:$80 sps:$4 sm:$0xff]   ;;  %v7195_v53 = vld [vmem:[%s10886_s1 + $0x380] ss:$16 sps:$4 sm:$0xff]  }
  0x1b   :  { %4149 = vmatpush1.bf16.msra.mxu1 %v7158_v26  ;;  %v7192_v50 = vld [vmem:[%s10886_s1 + $0x384] ss:$16 sps:$4 sm:$0xff]   ;;  %4168 = vmatprep.mubr.bf16.mxu1 %v8509_v49  ;;  %v7200_v56 = vld [vmem:[%s10886_s1 + $0x1a0] ss:$16 sps:$4 sm:$0xff]  }
  0x1c   :  { %4202 = vmatpush1.bf16.msra.mxu0 %v7159_v27  ;;  %4150 = vmatprep.subr.bf16.mxu1 %v7160_v28  ;;  %v7196_v54 = vld [vmem:[%s10886_s1 + $0x1a4] ss:$16 sps:$4 sm:$0xff]   ;;  %v7201_v57 = vld [vmem:[%s10886_s1 + $0x3a0] ss:$16 sps:$4 sm:$0xff]   ;;  %v7253_v27 = vld [vmem:[%s10886_s1 + $0xa8] ss:$16 sps:$4 sm:$0xff]  }
  0x1d   :  { %4203 = vmatprep.subr.bf16.mxu0 %v7162_v29  ;;  %v7198_v55 = vld [vmem:[%s10886_s1 + $0x3a4] ss:$16 sps:$4 sm:$0xff]   ;;  %v7206_v60 = vld [vmem:[%s10886_s1 + $0x1c0] ss:$16 sps:$4 sm:$0xff]  }
  0x1e   :  { %v7202_v58 = vld [vmem:[%s10886_s1 + $0x1c4] ss:$16 sps:$4 sm:$0xff]   ;;  %v7207_v61 = vld [vmem:[%s10886_s1 + $0x3c0] ss:$16 sps:$4 sm:$0xff]  }
  0x1f   :  { %4151 = vmatpush1.bf16.msra.mxu1 %v7164_v30  ;;  %v7204_v59 = vld [vmem:[%s10886_s1 + $0x3c4] ss:$16 sps:$4 sm:$0xff]   ;;  %v7212_v0 = vld [vmem:[%s10886_s1 + $0x1e0] ss:$16 sps:$4 sm:$0xff]  }
  0x20   :  { %4204 = vmatpush1.bf16.msra.mxu0 %v7165_v31  ;;  %4152 = vmatprep.subr.bf16.mxu1 %v7166_v32  ;;  %v7208_v62 = vld [vmem:[%s10886_s1 + $0x1e4] ss:$16 sps:$4 sm:$0xff]   ;;  %v7213_v1 = vld [vmem:[%s10886_s1 + $0x3e0] ss:$16 sps:$4 sm:$0xff]   ;;  %v8663_v31 = vld [vmem:[%s10885_s0 + $0xac] ss:$80 sps:$4 sm:$0xff]  }
  0x21   :  { %4205 = vmatprep.subr.bf16.mxu0 %v7168_v33  ;;  %v7210_v63 = vld [vmem:[%s10886_s1 + $0x3e4] ss:$16 sps:$4 sm:$0xff]   ;;  %v8572_v4 = vld [vmem:[%s10885_s0] ss:$80 sps:$4 sm:$0xff]   ;;  %v7261_v32 = vld [vmem:[%s10886_s1 + $0xcc] ss:$16 sps:$4 sm:$0xff]  }
  0x22   :  { %v7222_v2 = vld [vmem:[%s10886_s1 + $0x404] ss:$16 sps:$4 sm:$0xff]   ;;  %v7220_v6 = vld [vmem:[%s10886_s1 + $0x400] ss:$16 sps:$4 sm:$0xff]  }
  0x23   :  { %4153 = vmatpush1.bf16.msra.mxu1 %v7170_v34  ;;  %v7228_v8 = vld [vmem:[%s10886_s1 + $0x424] ss:$16 sps:$4 sm:$0xff]   ;;  %v7226_v10 = vld [vmem:[%s10886_s1 + $0x420] ss:$16 sps:$4 sm:$0xff]   ;;  %v7259_v34 = vld [vmem:[%s10886_s1 + $0xc8] ss:$16 sps:$4 sm:$0xff]  }
  0x24   :  { %4206 = vmatpush1.bf16.msra.mxu0 %v7171_v35  ;;  %4154 = vmatprep.subr.bf16.mxu1 %v7172_v36  ;;  %v7234_v12 = vld [vmem:[%s10886_s1 + $0x444] ss:$16 sps:$4 sm:$0xff]   ;;  %v7232_v14 = vld [vmem:[%s10886_s1 + $0x440] ss:$16 sps:$4 sm:$0xff]   ;;  %v8680_v35 = vld [vmem:[%s10885_s0 + $0xa8] ss:$80 sps:$4 sm:$0xff]  }
  0x25   :  { %4207 = vmatprep.subr.bf16.mxu0 %v7174_v37  ;;  %v7240_v16 = vld [vmem:[%s10886_s1 + $0x464] ss:$16 sps:$4 sm:$0xff]   ;;  %v7238_v18 = vld [vmem:[%s10886_s1 + $0x460] ss:$16 sps:$4 sm:$0xff]   ;;  %v7267_v37 = vld [vmem:[%s10886_s1 + $0xec] ss:$16 sps:$4 sm:$0xff]  }
  0x26   :  { %v7246_v20 = vld [vmem:[%s10886_s1 + $0x484] ss:$16 sps:$4 sm:$0xff]   ;;  %v7244_v22 = vld [vmem:[%s10886_s1 + $0x480] ss:$16 sps:$4 sm:$0xff]  }
  0x27   :  { %4155 = vmatpush1.bf16.msra.mxu1 %v7176_v38  ;;  %v7252_v24 = vld [vmem:[%s10886_s1 + $0x4a4] ss:$16 sps:$4 sm:$0xff]   ;;  %v7250_v26 = vld [vmem:[%s10886_s1 + $0x4a0] ss:$16 sps:$4 sm:$0xff]  }
  0x28   :  { %4208 = vmatpush1.bf16.msra.mxu0 %v7177_v39  ;;  %4156 = vmatprep.subr.bf16.mxu1 %v7178_v40  ;;  %v7258_v28 = vld [vmem:[%s10886_s1 + $0x4c4] ss:$16 sps:$4 sm:$0xff]   ;;  %v8658_v30 = vld [vmem:[%s10885_s0 + $0xa0] ss:$80 sps:$4 sm:$0xff]   ;;  %v7265_v39 = vld [vmem:[%s10886_s1 + $0xe8] ss:$16 sps:$4 sm:$0xff]  }
  0x29   :  { %4209 = vmatprep.subr.bf16.mxu0 %v7180_v41  ;;  %v8653_v29 = vld [vmem:[%s10885_s0 + $0xa4] ss:$80 sps:$4 sm:$0xff]   ;;  %v7256_v33 = vld [vmem:[%s10886_s1 + $0x4c0] ss:$16 sps:$4 sm:$0xff]  }
  0x2a   :  { %v7264_v36 = vld [vmem:[%s10886_s1 + $0x4e4] ss:$16 sps:$4 sm:$0xff]   ;;  %v7262_v38 = vld [vmem:[%s10886_s1 + $0x4e0] ss:$16 sps:$4 sm:$0xff]  }
  0x2b   :  { %4157 = vmatpush1.bf16.msra.mxu1 %v7182_v42  ;;  %v8699_v40 = vld [vmem:[%s10885_s0 + $0x14] ss:$80 sps:$4 sm:$0xff]   ;;  %v7273_v42 = vld [vmem:[%s10886_s1 + $0x10c] ss:$16 sps:$4 sm:$0xff]  }
  0x2c   :  { %4210 = vmatpush1.bf16.msra.mxu0 %v7183_v43  ;;  %4158 = vmatprep.subr.bf16.mxu1 %v7184_v44  ;;  %v7270_v41 = vld [vmem:[%s10886_s1 + $0x504] ss:$16 sps:$4 sm:$0xff]   ;;  %v7268_v43 = vld [vmem:[%s10886_s1 + $0x500] ss:$16 sps:$4 sm:$0xff]   ;;  %v7271_v44 = vld [vmem:[%s10886_s1 + $0x108] ss:$16 sps:$4 sm:$0xff]  }
  0x2d   :  { %4211 = vmatprep.subr.bf16.mxu0 %v7186_v45  ;;  %v7276_v45 = vld [vmem:[%s10886_s1 + $0x524] ss:$16 sps:$4 sm:$0xff]  }
  0x2f   :  { %4159 = vmatpush1.bf16.msra.mxu1 %v7188_v46  ;;  %v7279_v46 = vld [vmem:[%s10886_s1 + $0x12c] ss:$16 sps:$4 sm:$0xff]  }
  0x30   :  { %4212 = vmatpush1.bf16.msra.mxu0 %v7189_v47  ;;  %4160 = vmatprep.subr.bf16.mxu1 %v7190_v48  ;;  %v7274_v47 = vld [vmem:[%s10886_s1 + $0x520] ss:$16 sps:$4 sm:$0xff]   ;;  %v7277_v48 = vld [vmem:[%s10886_s1 + $0x128] ss:$16 sps:$4 sm:$0xff]  }
  0x31   :  { %4213 = vmatprep.subr.bf16.mxu0 %v7192_v50  ;;  %v7285_v50 = vld [vmem:[%s10886_s1 + $0x14c] ss:$16 sps:$4 sm:$0xff]  }
  0x33   :  { %4161 = vmatpush1.bf16.msra.mxu1 %v7194_v52  ;;  %v7280_v52 = vld [vmem:[%s10886_s1 + $0x540] ss:$16 sps:$4 sm:$0xff]  }
  0x34   :  { %4214 = vmatpush1.bf16.msra.mxu0 %v7195_v53  ;;  %4162 = vmatprep.subr.bf16.mxu1 %v7196_v54  ;;  %v7283_v53 = vld [vmem:[%s10886_s1 + $0x148] ss:$16 sps:$4 sm:$0xff]   ;;  %v7288_v54 = vld [vmem:[%s10886_s1 + $0x564] ss:$16 sps:$4 sm:$0xff]  }
  0x35   :  { %4215 = vmatprep.subr.bf16.mxu0 %v7198_v55  ;;  %v7291_v55 = vld [vmem:[%s10886_s1 + $0x16c] ss:$16 sps:$4 sm:$0xff]  }
  0x37   :  { %4163 = vmatpush1.bf16.msra.mxu1 %v7200_v56  ;;  %v7286_v56 = vld [vmem:[%s10886_s1 + $0x560] ss:$16 sps:$4 sm:$0xff]  }
  0x38   :  { %4216 = vmatpush1.bf16.msra.mxu0 %v7201_v57  ;;  %4164 = vmatprep.subr.bf16.mxu1 %v7202_v58  ;;  %v7289_v57 = vld [vmem:[%s10886_s1 + $0x168] ss:$16 sps:$4 sm:$0xff]   ;;  %v7294_v58 = vld [vmem:[%s10886_s1 + $0x584] ss:$16 sps:$4 sm:$0xff]  }
  0x39   :  { %4217 = vmatprep.subr.bf16.mxu0 %v7204_v59  ;;  %v7297_v59 = vld [vmem:[%s10886_s1 + $0x18c] ss:$16 sps:$4 sm:$0xff]  }
  0x3b   :  { %4165 = vmatpush1.bf16.msra.mxu1 %v7206_v60  ;;  %v7292_v60 = vld [vmem:[%s10886_s1 + $0x580] ss:$16 sps:$4 sm:$0xff]  }
  0x3c   :  { %4218 = vmatpush1.bf16.msra.mxu0 %v7207_v61  ;;  %4166 = vmatprep.subr.bf16.mxu1 %v7208_v62  ;;  %v7295_v61 = vld [vmem:[%s10886_s1 + $0x188] ss:$16 sps:$4 sm:$0xff]   ;;  %v7300_v62 = vld [vmem:[%s10886_s1 + $0x5a4] ss:$16 sps:$4 sm:$0xff]  }
  0x3d   :  { %4219 = vmatprep.subr.bf16.mxu0 %v7210_v63  ;;  %v7303_v63 = vld [vmem:[%s10886_s1 + $0x1ac] ss:$16 sps:$4 sm:$0xff]  }
  0x3f   :  { %4167 = vmatpush1.bf16.msra.mxu1 %v7212_v0  ;;  %v7298_v0 = vld [vmem:[%s10886_s1 + $0x5a0] ss:$16 sps:$4 sm:$0xff]  }
  0x40   :  { %4220 = vmatpush1.bf16.msra.mxu0 %v7213_v1  ;;  %4666 = vmatprep.subr.bf16.mxu1 %v7225_v3  ;;  %v7301_v1 = vld [vmem:[%s10886_s1 + $0x1a8] ss:$16 sps:$4 sm:$0xff]   ;;  %v7314_v3 = vld [vmem:[%s10886_s1 + $0x1cc] ss:$16 sps:$4 sm:$0xff]  }
  0x41   :  { %4242 = vmatprep.subr.bf16.mxu0 %v7222_v2  ;;  %v7311_v2 = vld [vmem:[%s10886_s1 + $0x5c4] ss:$16 sps:$4 sm:$0xff]  }
  0x42   :  { %4169 = vmatmul.mubr.bf16.vlgmr.msra.gmra.mrb[0].mxu1 %v8572_v4 }
  0x43   :  { %4222 = vmatmul.mubr.bf16.vlgmr.msra.gmra.mrb[0].mxu0 %v8577_v5  ;;  %4667 = vmatpush1.bf16.msra.mxu1 %v7223_v7  ;;  %v7312_v7 = vld [vmem:[%s10886_s1 + $0x1c8] ss:$16 sps:$4 sm:$0xff]  }
  0x44   :  { %4243 = vmatpush1.bf16.msra.mxu0 %v7220_v6  ;;  %4668 = vmatprep.subr.bf16.mxu1 %v7231_v9  ;;  %v7309_v6 = vld [vmem:[%s10886_s1 + $0x5c0] ss:$16 sps:$4 sm:$0xff]   ;;  %v7321_v9 = vld [vmem:[%s10886_s1 + $0x1ec] ss:$16 sps:$4 sm:$0xff]  }
  0x45   :  { %4244 = vmatprep.subr.bf16.mxu0 %v7228_v8  ;;  %4178 = vmatprep.mubr.bf16.mxu1 %v8653_v29  ;;  %v7318_v8 = vld [vmem:[%s10886_s1 + $0x5e4] ss:$16 sps:$4 sm:$0xff]  }
  0x46   :  { %4231 = vmatprep.mubr.bf16.mxu0 %v8663_v31 }
  0x47   :  { %4669 = vmatpush1.bf16.msra.mxu1 %v7229_v11  ;;  %v7319_v11 = vld [vmem:[%s10886_s1 + $0x1e8] ss:$16 sps:$4 sm:$0xff]  }
  0x48   :  { %4245 = vmatpush1.bf16.msra.mxu0 %v7226_v10  ;;  %4670 = vmatprep.subr.bf16.mxu1 %v7237_v13  ;;  %v7316_v10 = vld [vmem:[%s10886_s1 + $0x5e0] ss:$16 sps:$4 sm:$0xff]   ;;  %v7330_v13 = vld [vmem:[%s10886_s1 + $0x20c] ss:$16 sps:$4 sm:$0xff]  }
  0x49   :  { %4246 = vmatprep.subr.bf16.mxu0 %v7234_v12  ;;  %v7327_v12 = vld [vmem:[%s10886_s1 + $0x604] ss:$16 sps:$4 sm:$0xff]  }
  0x4a   :  { %4179 = vmatmul.mubr.bf16.gmra.mrb[4].mxu1 %v8658_v30 }
  0x4b   :  { %4671 = vmatpush1.bf16.msra.mxu1 %v7235_v15  ;;  %4232 = vmatmul.mubr.bf16.gmra.mrb[4].mxu0 %v8680_v35  ;;  %v7325_v15 = vld [vmem:[%s10886_s1 + $0x600] ss:$16 sps:$4 sm:$0xff]  }
  0x4c   :  { %4247 = vmatpush1.bf16.msra.mxu0 %v7232_v14  ;;  %4672 = vmatprep.subr.bf16.mxu1 %v7243_v17  ;;  %v8807_v14 = vld [vmem:[%s10885_s0 + $0x10] ss:$80 sps:$4 sm:$0xff]   ;;  %v7333_v17 = vld [vmem:[%s10886_s1 + $0x624] ss:$16 sps:$4 sm:$0xff]  }
  0x4d   :  { %4248 = vmatprep.subr.bf16.mxu0 %v7240_v16  ;;  %4698 = vmatprep.mubr.bf16.mxu1 %v8509_v49  ;;  %v7282_v49 = vld [vmem:[%s10886_s1 + $0x544] ss:$16 sps:$4 sm:$0xff]   ;;  %v7328_v16 = vld [vmem:[%s10886_s1 + $0x208] ss:$16 sps:$4 sm:$0xff]  }
  0x4e   :  { %4274 = vmatprep.mubr.bf16.mxu0 %v8699_v40 }
  0x4f   :  { %4673 = vmatpush1.bf16.msra.mxu1 %v7241_v19  ;;  %v8824_v19 = vld [vmem:[%s10885_s0 + $0xb4] ss:$80 sps:$4 sm:$0xff]  }
  0x50   :  { %4249 = vmatpush1.bf16.msra.mxu0 %v7238_v18  ;;  %4674 = vmatprep.subr.bf16.mxu1 %v7249_v21  ;;  %v7336_v18 = vld [vmem:[%s10886_s1 + $0x22c] ss:$16 sps:$4 sm:$0xff]   ;;  %v7334_v21 = vld [vmem:[%s10886_s1 + $0x228] ss:$16 sps:$4 sm:$0xff]  }
  0x51   :  { %4250 = vmatprep.subr.bf16.mxu0 %v7246_v20  ;;  %v7331_v20 = vld [vmem:[%s10886_s1 + $0x620] ss:$16 sps:$4 sm:$0xff]  }
  0x53   :  { %4675 = vmatpush1.bf16.msra.mxu1 %v7247_v23  ;;  %v7337_v23 = vld [vmem:[%s10886_s1 + $0x640] ss:$16 sps:$4 sm:$0xff]  }
  0x54   :  { %4251 = vmatpush1.bf16.msra.mxu0 %v7244_v22  ;;  %4676 = vmatprep.subr.bf16.mxu1 %v7255_v25  ;;  %v7339_v22 = vld [vmem:[%s10886_s1 + $0x644] ss:$16 sps:$4 sm:$0xff]   ;;  %v8851_v25 = vld [vmem:[%s10885_s0 + $0xb0] ss:$80 sps:$4 sm:$0xff]  }
  0x55   :  { %4252 = vmatprep.subr.bf16.mxu0 %v7252_v24  ;;  %v7340_v24 = vld [vmem:[%s10886_s1 + $0x248] ss:$16 sps:$4 sm:$0xff]  }
  0x57   :  { %4677 = vmatpush1.bf16.msra.mxu1 %v7253_v27  ;;  %v7348_v27 = vld [vmem:[%s10886_s1 + $0x26c] ss:$16 sps:$4 sm:$0xff]  }
  0x58   :  { %4253 = vmatpush1.bf16.msra.mxu0 %v7250_v26  ;;  %4678 = vmatprep.subr.bf16.mxu1 %v7261_v32  ;;  %v7345_v26 = vld [vmem:[%s10886_s1 + $0x664] ss:$16 sps:$4 sm:$0xff]   ;;  %v7346_v32 = vld [vmem:[%s10886_s1 + $0x268] ss:$16 sps:$4 sm:$0xff]  }
  0x59   :  { %4254 = vmatprep.subr.bf16.mxu0 %v7258_v28  ;;  %v8862_v28 = vld [vmem:[%s10885_s0 + $0x1c] ss:$80 sps:$4 sm:$0xff]  }
  0x5b   :  { %4679 = vmatpush1.bf16.msra.mxu1 %v7259_v34  ;;  %v7354_v34 = vld [vmem:[%s10886_s1 + $0x28c] ss:$16 sps:$4 sm:$0xff]  }
  0x5c   :  { %4255 = vmatpush1.bf16.msra.mxu0 %v7256_v33  ;;  %4680 = vmatprep.subr.bf16.mxu1 %v7267_v37  ;;  %v7351_v33 = vld [vmem:[%s10886_s1 + $0x684] ss:$16 sps:$4 sm:$0xff]  }
  0x5d   :  { %4256 = vmatprep.subr.bf16.mxu0 %v7264_v36  ;;  %v7352_v36 = vld [vmem:[%s10886_s1 + $0x288] ss:$16 sps:$4 sm:$0xff]   ;;  %v7357_v37 = vld [vmem:[%s10886_s1 + $0x6a4] ss:$16 sps:$4 sm:$0xff]  }
  0x5f   :  { %4681 = vmatpush1.bf16.msra.mxu1 %v7265_v39  ;;  %v7358_v39 = vld [vmem:[%s10886_s1 + $0x2a8] ss:$16 sps:$4 sm:$0xff]  }
  0x60   :  { %4257 = vmatpush1.bf16.msra.mxu0 %v7262_v38  ;;  %4682 = vmatprep.subr.bf16.mxu1 %v7273_v42  ;;  %v7355_v38 = vld [vmem:[%s10886_s1 + $0x6a0] ss:$16 sps:$4 sm:$0xff]   ;;  %v7366_v42 = vld [vmem:[%s10886_s1 + $0x2cc] ss:$16 sps:$4 sm:$0xff]  }
  0x61   :  { %4258 = vmatprep.subr.bf16.mxu0 %v7270_v41  ;;  %v7363_v41 = vld [vmem:[%s10886_s1 + $0x6c4] ss:$16 sps:$4 sm:$0xff]  }
  0x63   :  { %4683 = vmatpush1.bf16.msra.mxu1 %v7271_v44  ;;  %v7364_v44 = vld [vmem:[%s10886_s1 + $0x2c8] ss:$16 sps:$4 sm:$0xff]  }
  0x64   :  { %4259 = vmatpush1.bf16.msra.mxu0 %v7268_v43  ;;  %4684 = vmatprep.subr.bf16.mxu1 %v7279_v46  ;;  %v7361_v43 = vld [vmem:[%s10886_s1 + $0x6c0] ss:$16 sps:$4 sm:$0xff]   ;;  %v7372_v46 = vld [vmem:[%s10886_s1 + $0x2ec] ss:$16 sps:$4 sm:$0xff]  }
  0x65   :  { %4260 = vmatprep.subr.bf16.mxu0 %v7276_v45  ;;  %v7369_v45 = vld [vmem:[%s10886_s1 + $0x6e4] ss:$16 sps:$4 sm:$0xff]  }
  0x67   :  { %4685 = vmatpush1.bf16.msra.mxu1 %v7277_v48  ;;  %v7370_v48 = vld [vmem:[%s10886_s1 + $0x2e8] ss:$16 sps:$4 sm:$0xff]  }
  0x68   :  { %4261 = vmatpush1.bf16.msra.mxu0 %v7274_v47  ;;  %4686 = vmatprep.subr.bf16.mxu1 %v7285_v50  ;;  %v7367_v47 = vld [vmem:[%s10886_s1 + $0x6e0] ss:$16 sps:$4 sm:$0xff]   ;;  %v7378_v50 = vld [vmem:[%s10886_s1 + $0x30c] ss:$16 sps:$4 sm:$0xff]  }
  0x69   :  { %4262 = vmatprep.subr.bf16.mxu0 %v7282_v49  ;;  %v7375_v49 = vld [vmem:[%s10886_s1 + $0x704] ss:$16 sps:$4 sm:$0xff]  }
  0x6b   :  { %4687 = vmatpush1.bf16.msra.mxu1 %v7283_v53  ;;  %v7376_v53 = vld [vmem:[%s10886_s1 + $0x308] ss:$16 sps:$4 sm:$0xff]  }
  0x6c   :  { %4263 = vmatpush1.bf16.msra.mxu0 %v7280_v52  ;;  %4688 = vmatprep.subr.bf16.mxu1 %v7291_v55  ;;  %v7373_v52 = vld [vmem:[%s10886_s1 + $0x700] ss:$16 sps:$4 sm:$0xff]   ;;  %v7384_v55 = vld [vmem:[%s10886_s1 + $0x32c] ss:$16 sps:$4 sm:$0xff]  }
  0x6d   :  { %4264 = vmatprep.subr.bf16.mxu0 %v7288_v54  ;;  %v7381_v54 = vld [vmem:[%s10886_s1 + $0x724] ss:$16 sps:$4 sm:$0xff]  }
  0x6f   :  { %4689 = vmatpush1.bf16.msra.mxu1 %v7289_v57  ;;  %v7382_v57 = vld [vmem:[%s10886_s1 + $0x328] ss:$16 sps:$4 sm:$0xff]  }
  0x70   :  { %4265 = vmatpush1.bf16.msra.mxu0 %v7286_v56  ;;  %4690 = vmatprep.subr.bf16.mxu1 %v7297_v59  ;;  %v7379_v56 = vld [vmem:[%s10886_s1 + $0x720] ss:$16 sps:$4 sm:$0xff]   ;;  %v7390_v59 = vld [vmem:[%s10886_s1 + $0x34c] ss:$16 sps:$4 sm:$0xff]  }
  0x71   :  { %4266 = vmatprep.subr.bf16.mxu0 %v7294_v58  ;;  %v7387_v58 = vld [vmem:[%s10886_s1 + $0x744] ss:$16 sps:$4 sm:$0xff]  }
  0x73   :  { %4691 = vmatpush1.bf16.msra.mxu1 %v7295_v61  ;;  %v7388_v61 = vld [vmem:[%s10886_s1 + $0x348] ss:$16 sps:$4 sm:$0xff]  }
  0x74   :  { %4267 = vmatpush1.bf16.msra.mxu0 %v7292_v60  ;;  %4692 = vmatprep.subr.bf16.mxu1 %v7303_v63  ;;  %v7385_v60 = vld [vmem:[%s10886_s1 + $0x740] ss:$16 sps:$4 sm:$0xff]   ;;  %v7396_v63 = vld [vmem:[%s10886_s1 + $0x36c] ss:$16 sps:$4 sm:$0xff]  }
  0x75   :  { %4268 = vmatprep.subr.bf16.mxu0 %v7300_v62  ;;  %v7393_v62 = vld [vmem:[%s10886_s1 + $0x764] ss:$16 sps:$4 sm:$0xff]  }
  0x77   :  { %4693 = vmatpush1.bf16.msra.mxu1 %v7301_v1  ;;  %v7394_v1 = vld [vmem:[%s10886_s1 + $0x368] ss:$16 sps:$4 sm:$0xff]  }
  0x78   :  { %4269 = vmatpush1.bf16.msra.mxu0 %v7298_v0  ;;  %4694 = vmatprep.subr.bf16.mxu1 %v7314_v3  ;;  %v7391_v0 = vld [vmem:[%s10886_s1 + $0x760] ss:$16 sps:$4 sm:$0xff]   ;;  %v7402_v3 = vld [vmem:[%s10886_s1 + $0x38c] ss:$16 sps:$4 sm:$0xff]  }
  0x79   :  { %4270 = vmatprep.subr.bf16.mxu0 %v7311_v2  ;;  %v7399_v2 = vld [vmem:[%s10886_s1 + $0x784] ss:$16 sps:$4 sm:$0xff]  }
  0x7b   :  { %4695 = vmatpush1.bf16.msra.mxu1 %v7312_v7  ;;  %v7400_v7 = vld [vmem:[%s10886_s1 + $0x388] ss:$16 sps:$4 sm:$0xff]  }
  0x7c   :  { %4271 = vmatpush1.bf16.msra.mxu0 %v7309_v6  ;;  %4696 = vmatprep.subr.bf16.mxu1 %v7321_v9  ;;  %v7397_v6 = vld [vmem:[%s10886_s1 + $0x780] ss:$16 sps:$4 sm:$0xff]   ;;  %v7408_v9 = vld [vmem:[%s10886_s1 + $0x3ac] ss:$16 sps:$4 sm:$0xff]  }
  0x7d   :  { %4272 = vmatprep.subr.bf16.mxu0 %v7318_v8  ;;  %v7405_v8 = vld [vmem:[%s10886_s1 + $0x7a4] ss:$16 sps:$4 sm:$0xff]  }
  0x7f   :  { %4697 = vmatpush1.bf16.msra.mxu1 %v7319_v11  ;;  %v7406_v11 = vld [vmem:[%s10886_s1 + $0x3a8] ss:$16 sps:$4 sm:$0xff]  }
  0x80   :  { %4273 = vmatpush1.bf16.msra.mxu0 %v7316_v10  ;;  %4719 = vmatprep.subr.bf16.mxu1 %v7330_v13  ;;  %v7403_v10 = vld [vmem:[%s10886_s1 + $0x7a0] ss:$16 sps:$4 sm:$0xff]   ;;  %v7416_v13 = vld [vmem:[%s10886_s1 + $0x3cc] ss:$16 sps:$4 sm:$0xff]  }
  0x81   :  { %4295 = vmatprep.subr.bf16.mxu0 %v7327_v12  ;;  %v7413_v12 = vld [vmem:[%s10886_s1 + $0x7c4] ss:$16 sps:$4 sm:$0xff]  }
  0x82   :  { %4699 = vmatmul.mubr.bf16.vlgmr.msra.gmra.mrb[8].mxu1 %v8572_v4  ;;  %v7342_v4 = vld [vmem:[%s10886_s1 + $0x24c] ss:$16 sps:$4 sm:$0xff]  }
  0x83   :  { %4275 = vmatmul.mubr.bf16.vlgmr.msra.gmra.mrb[0].mxu0 %v8807_v14  ;;  %4720 = vmatpush1.bf16.msra.mxu1 %v7328_v16  ;;  %v7414_v16 = vld [vmem:[%s10886_s1 + $0x3c8] ss:$16 sps:$4 sm:$0xff]  }
  0x84   :  { %4296 = vmatpush1.bf16.msra.mxu0 %v7325_v15  ;;  %4721 = vmatprep.subr.bf16.mxu1 %v7336_v18  ;;  %v7411_v15 = vld [vmem:[%s10886_s1 + $0x7c0] ss:$16 sps:$4 sm:$0xff]   ;;  %v7423_v18 = vld [vmem:[%s10886_s1 + $0x3ec] ss:$16 sps:$4 sm:$0xff]  }
  0x85   :  { %4297 = vmatprep.subr.bf16.mxu0 %v7333_v17  ;;  %4284 = vmatprep.mubr.bf16.mxu0 %v8824_v19  ;;  %v7420_v17 = vld [vmem:[%s10886_s1 + $0x7e4] ss:$16 sps:$4 sm:$0xff]  }
  0x86   :  { %4708 = vmatprep.mubr.bf16.mxu1 %v8653_v29  ;;  %v7343_v29 = vld [vmem:[%s10886_s1 + $0x660] ss:$16 sps:$4 sm:$0xff]  }
  0x87   :  { %4722 = vmatpush1.bf16.msra.mxu1 %v7334_v21  ;;  %v7421_v21 = vld [vmem:[%s10886_s1 + $0x3e8] ss:$16 sps:$4 sm:$0xff]  }
  0x88   :  { %4298 = vmatpush1.bf16.msra.mxu0 %v7331_v20  ;;  %4723 = vmatprep.subr.bf16.mxu1 %v7342_v4  ;;  %v7418_v20 = vld [vmem:[%s10886_s1 + $0x7e0] ss:$16 sps:$4 sm:$0xff]   ;;  %v7432_v4 = vld [vmem:[%s10886_s1 + $0x40c] ss:$16 sps:$4 sm:$0xff]  }
  0x89   :  { %4299 = vmatprep.subr.bf16.mxu0 %v7339_v22  ;;  %v7429_v22 = vld [vmem:[%s10886_s1 + $0x804] ss:$16 sps:$4 sm:$0xff]  }
  0x8a   :  { %4709 = vmatmul.mubr.bf16.gmra.mrb[12].mxu1 %v8658_v30  ;;  %v7349_v30 = vld [vmem:[%s10886_s1 + $0x680] ss:$16 sps:$4 sm:$0xff]  }
  0x8b   :  { %4285 = vmatmul.mubr.bf16.gmra.mrb[4].mxu0 %v8851_v25  ;;  %4724 = vmatpush1.bf16.msra.mxu1 %v7340_v24  ;;  %v7427_v24 = vld [vmem:[%s10886_s1 + $0x800] ss:$16 sps:$4 sm:$0xff]  }
  0x8c   :  { %4300 = vmatpush1.bf16.msra.mxu0 %v7337_v23  ;;  %4725 = vmatprep.subr.bf16.mxu1 %v7348_v27  ;;  %v9027_v23 = vld [vmem:[%s10885_s0 + $0x18] ss:$80 sps:$4 sm:$0xff]   ;;  %v7435_v27 = vld [vmem:[%s10886_s1 + $0x824] ss:$16 sps:$4 sm:$0xff]  }
  0x8d   :  { %4301 = vmatprep.subr.bf16.mxu0 %v7345_v26  ;;  %4327 = vmatprep.mubr.bf16.mxu0 %v8862_v28  ;;  %v7430_v26 = vld [vmem:[%s10886_s1 + $0x408] ss:$16 sps:$4 sm:$0xff]  }
  0x8e   :  { %4751 = vmatprep.mubr.bf16.mxu1 %v8517_v51  ;;  %v7360_v51 = vld [vmem:[%s10886_s1 + $0x2ac] ss:$16 sps:$4 sm:$0xff]  }
  0x8f   :  { %4726 = vmatpush1.bf16.msra.mxu1 %v7346_v32  ;;  %v9044_v32 = vld [vmem:[%s10885_s0 + $0xbc] ss:$80 sps:$4 sm:$0xff]  }
  0x90   :  { %4302 = vmatpush1.bf16.msra.mxu0 %v7343_v29  ;;  %4727 = vmatprep.subr.bf16.mxu1 %v7354_v34  ;;  %v7438_v29 = vld [vmem:[%s10886_s1 + $0x42c] ss:$16 sps:$4 sm:$0xff]   ;;  %v7436_v34 = vld [vmem:[%s10886_s1 + $0x428] ss:$16 sps:$4 sm:$0xff]  }
  0x91   :  { %4303 = vmatprep.subr.bf16.mxu0 %v7351_v33  ;;  %v7433_v33 = vld [vmem:[%s10886_s1 + $0x820] ss:$16 sps:$4 sm:$0xff]  }
  0x93   :  { %4728 = vmatpush1.bf16.msra.mxu1 %v7352_v36  ;;  %v7439_v36 = vld [vmem:[%s10886_s1 + $0x840] ss:$16 sps:$4 sm:$0xff]  }
  0x94   :  { %4304 = vmatpush1.bf16.msra.mxu0 %v7349_v30  ;;  %4729 = vmatprep.subr.bf16.mxu1 %v7360_v51  ;;  %v7441_v30 = vld [vmem:[%s10886_s1 + $0x844] ss:$16 sps:$4 sm:$0xff]   ;;  %v7442_v51 = vld [vmem:[%s10886_s1 + $0x448] ss:$16 sps:$4 sm:$0xff]  }
  0x95   :  { %4305 = vmatprep.subr.bf16.mxu0 %v7357_v37  ;;  %v9068_v37 = vld [vmem:[%s10885_s0 + $0xb8] ss:$80 sps:$4 sm:$0xff]  }
  0x97   :  { %4730 = vmatpush1.bf16.msra.mxu1 %v7358_v39  ;;  %v9082_v39 = vld [vmem:[%s10885_s0 + $0x24] ss:$80 sps:$4 sm:$0xff]  }
  0x98   :  { %4306 = vmatpush1.bf16.msra.mxu0 %v7355_v38  ;;  %4731 = vmatprep.subr.bf16.mxu1 %v7366_v42  ;;  %v7447_v38 = vld [vmem:[%s10886_s1 + $0x864] ss:$16 sps:$4 sm:$0xff]   ;;  %v7448_v42 = vld [vmem:[%s10886_s1 + $0x468] ss:$16 sps:$4 sm:$0xff]  }
  0x99   :  { %4307 = vmatprep.subr.bf16.mxu0 %v7363_v41  ;;  %v7445_v41 = vld [vmem:[%s10886_s1 + $0x860] ss:$16 sps:$4 sm:$0xff]  }
  0x9b   :  { %4732 = vmatpush1.bf16.msra.mxu1 %v7364_v44  ;;  %v7456_v44 = vld [vmem:[%s10886_s1 + $0x48c] ss:$16 sps:$4 sm:$0xff]  }
  0x9c   :  { %4308 = vmatpush1.bf16.msra.mxu0 %v7361_v43  ;;  %4733 = vmatprep.subr.bf16.mxu1 %v7372_v46  ;;  %v7453_v43 = vld [vmem:[%s10886_s1 + $0x884] ss:$16 sps:$4 sm:$0xff]  }
  0x9d   :  { %4309 = vmatprep.subr.bf16.mxu0 %v7369_v45  ;;  %v7454_v45 = vld [vmem:[%s10886_s1 + $0x488] ss:$16 sps:$4 sm:$0xff]   ;;  %v7459_v46 = vld [vmem:[%s10886_s1 + $0x8a4] ss:$16 sps:$4 sm:$0xff]  }
  0x9f   :  { %4734 = vmatpush1.bf16.msra.mxu1 %v7370_v48  ;;  %v7460_v48 = vld [vmem:[%s10886_s1 + $0x4a8] ss:$16 sps:$4 sm:$0xff]  }
  0xa0   :  { %4310 = vmatpush1.bf16.msra.mxu0 %v7367_v47  ;;  %4735 = vmatprep.subr.bf16.mxu1 %v7378_v50  ;;  %v7457_v47 = vld [vmem:[%s10886_s1 + $0x8a0] ss:$16 sps:$4 sm:$0xff]   ;;  %v7468_v50 = vld [vmem:[%s10886_s1 + $0x4cc] ss:$16 sps:$4 sm:$0xff]  }
  0xa1   :  { %4311 = vmatprep.subr.bf16.mxu0 %v7375_v49  ;;  %v7465_v49 = vld [vmem:[%s10886_s1 + $0x8c4] ss:$16 sps:$4 sm:$0xff]  }
  0xa3   :  { %4736 = vmatpush1.bf16.msra.mxu1 %v7376_v53  ;;  %v7466_v53 = vld [vmem:[%s10886_s1 + $0x4c8] ss:$16 sps:$4 sm:$0xff]  }
  0xa4   :  { %4312 = vmatpush1.bf16.msra.mxu0 %v7373_v52  ;;  %4737 = vmatprep.subr.bf16.mxu1 %v7384_v55  ;;  %v7463_v52 = vld [vmem:[%s10886_s1 + $0x8c0] ss:$16 sps:$4 sm:$0xff]   ;;  %v7474_v55 = vld [vmem:[%s10886_s1 + $0x4ec] ss:$16 sps:$4 sm:$0xff]  }
  0xa5   :  { %4313 = vmatprep.subr.bf16.mxu0 %v7381_v54  ;;  %v7471_v54 = vld [vmem:[%s10886_s1 + $0x8e4] ss:$16 sps:$4 sm:$0xff]  }
  0xa7   :  { %4738 = vmatpush1.bf16.msra.mxu1 %v7382_v57  ;;  %v7472_v57 = vld [vmem:[%s10886_s1 + $0x4e8] ss:$16 sps:$4 sm:$0xff]  }
  0xa8   :  { %4314 = vmatpush1.bf16.msra.mxu0 %v7379_v56  ;;  %4739 = vmatprep.subr.bf16.mxu1 %v7390_v59  ;;  %v7469_v56 = vld [vmem:[%s10886_s1 + $0x8e0] ss:$16 sps:$4 sm:$0xff]   ;;  %v7480_v59 = vld [vmem:[%s10886_s1 + $0x50c] ss:$16 sps:$4 sm:$0xff]  }
  0xa9   :  { %4315 = vmatprep.subr.bf16.mxu0 %v7387_v58  ;;  %v7477_v58 = vld [vmem:[%s10886_s1 + $0x904] ss:$16 sps:$4 sm:$0xff]  }
  0xab   :  { %4740 = vmatpush1.bf16.msra.mxu1 %v7388_v61  ;;  %v7478_v61 = vld [vmem:[%s10886_s1 + $0x508] ss:$16 sps:$4 sm:$0xff]  }
  0xac   :  { %4316 = vmatpush1.bf16.msra.mxu0 %v7385_v60  ;;  %4741 = vmatprep.subr.bf16.mxu1 %v7396_v63  ;;  %v7475_v60 = vld [vmem:[%s10886_s1 + $0x900] ss:$16 sps:$4 sm:$0xff]   ;;  %v7486_v63 = vld [vmem:[%s10886_s1 + $0x52c] ss:$16 sps:$4 sm:$0xff]  }
  0xad   :  { %4317 = vmatprep.subr.bf16.mxu0 %v7393_v62  ;;  %v7483_v62 = vld [vmem:[%s10886_s1 + $0x924] ss:$16 sps:$4 sm:$0xff]  }
  0xaf   :  { %4742 = vmatpush1.bf16.msra.mxu1 %v7394_v1  ;;  %v7484_v1 = vld [vmem:[%s10886_s1 + $0x528] ss:$16 sps:$4 sm:$0xff]  }
  0xb0   :  { %4318 = vmatpush1.bf16.msra.mxu0 %v7391_v0  ;;  %4743 = vmatprep.subr.bf16.mxu1 %v7402_v3  ;;  %v7481_v0 = vld [vmem:[%s10886_s1 + $0x920] ss:$16 sps:$4 sm:$0xff]   ;;  %v7492_v3 = vld [vmem:[%s10886_s1 + $0x54c] ss:$16 sps:$4 sm:$0xff]  }
  0xb1   :  { %4319 = vmatprep.subr.bf16.mxu0 %v7399_v2  ;;  %v7489_v2 = vld [vmem:[%s10886_s1 + $0x944] ss:$16 sps:$4 sm:$0xff]  }
  0xb3   :  { %4744 = vmatpush1.bf16.msra.mxu1 %v7400_v7  ;;  %v7490_v7 = vld [vmem:[%s10886_s1 + $0x548] ss:$16 sps:$4 sm:$0xff]  }
  0xb4   :  { %4320 = vmatpush1.bf16.msra.mxu0 %v7397_v6  ;;  %4745 = vmatprep.subr.bf16.mxu1 %v7408_v9  ;;  %v7487_v6 = vld [vmem:[%s10886_s1 + $0x940] ss:$16 sps:$4 sm:$0xff]   ;;  %v7498_v9 = vld [vmem:[%s10886_s1 + $0x56c] ss:$16 sps:$4 sm:$0xff]  }
  0xb5   :  { %4321 = vmatprep.subr.bf16.mxu0 %v7405_v8  ;;  %v7495_v8 = vld [vmem:[%s10886_s1 + $0x964] ss:$16 sps:$4 sm:$0xff]  }
  0xb7   :  { %4746 = vmatpush1.bf16.msra.mxu1 %v7406_v11  ;;  %v7496_v11 = vld [vmem:[%s10886_s1 + $0x568] ss:$16 sps:$4 sm:$0xff]  }
  0xb8   :  { %4322 = vmatpush1.bf16.msra.mxu0 %v7403_v10  ;;  %4747 = vmatprep.subr.bf16.mxu1 %v7416_v13  ;;  %v7493_v10 = vld [vmem:[%s10886_s1 + $0x960] ss:$16 sps:$4 sm:$0xff]   ;;  %v7504_v13 = vld [vmem:[%s10886_s1 + $0x58c] ss:$16 sps:$4 sm:$0xff]  }
  0xb9   :  { %4323 = vmatprep.subr.bf16.mxu0 %v7413_v12  ;;  %v7501_v12 = vld [vmem:[%s10886_s1 + $0x984] ss:$16 sps:$4 sm:$0xff]  }
  0xbb   :  { %4748 = vmatpush1.bf16.msra.mxu1 %v7414_v16  ;;  %v7502_v16 = vld [vmem:[%s10886_s1 + $0x588] ss:$16 sps:$4 sm:$0xff]  }
  0xbc   :  { %4324 = vmatpush1.bf16.msra.mxu0 %v7411_v15  ;;  %4749 = vmatprep.subr.bf16.mxu1 %v7423_v18  ;;  %v7499_v15 = vld [vmem:[%s10886_s1 + $0x980] ss:$16 sps:$4 sm:$0xff]   ;;  %v7510_v18 = vld [vmem:[%s10886_s1 + $0x5ac] ss:$16 sps:$4 sm:$0xff]  }
  0xbd   :  { %4325 = vmatprep.subr.bf16.mxu0 %v7420_v17  ;;  %v7507_v17 = vld [vmem:[%s10886_s1 + $0x9a4] ss:$16 sps:$4 sm:$0xff]  }
  0xbf   :  { %4750 = vmatpush1.bf16.msra.mxu1 %v7421_v21  ;;  %v7508_v21 = vld [vmem:[%s10886_s1 + $0x5a8] ss:$16 sps:$4 sm:$0xff]  }
  0xc0   :  { %4326 = vmatpush1.bf16.msra.mxu0 %v7418_v20  ;;  %4772 = vmatprep.subr.bf16.mxu1 %v7432_v4  ;;  %v7505_v20 = vld [vmem:[%s10886_s1 + $0x9a0] ss:$16 sps:$4 sm:$0xff]   ;;  %v7518_v4 = vld [vmem:[%s10886_s1 + $0x5cc] ss:$16 sps:$4 sm:$0xff]  }
  0xc1   :  { %4348 = vmatprep.subr.bf16.mxu0 %v7429_v22  ;;  %v7515_v22 = vld [vmem:[%s10886_s1 + $0x9c4] ss:$16 sps:$4 sm:$0xff]  }
  0xc2   :  { %4752 = vmatmul.mubr.bf16.vlgmr.msra.gmra.mrb[8].mxu1 %v8577_v5  ;;  %v7444_v5 = vld [vmem:[%s10886_s1 + $0x44c] ss:$16 sps:$4 sm:$0xff]  }
  0xc3   :  { %4328 = vmatmul.mubr.bf16.vlgmr.msra.gmra.mrb[0].mxu0 %v9027_v23  ;;  %4773 = vmatpush1.bf16.msra.mxu1 %v7430_v26  ;;  %v7516_v26 = vld [vmem:[%s10886_s1 + $0x5c8] ss:$16 sps:$4 sm:$0xff]  }
  0xc4   :  { %4349 = vmatpush1.bf16.msra.mxu0 %v7427_v24  ;;  %4774 = vmatprep.subr.bf16.mxu1 %v7438_v29  ;;  %v7513_v24 = vld [vmem:[%s10886_s1 + $0x9c0] ss:$16 sps:$4 sm:$0xff]   ;;  %v7525_v29 = vld [vmem:[%s10886_s1 + $0x5ec] ss:$16 sps:$4 sm:$0xff]  }
  0xc5   :  { %4350 = vmatprep.subr.bf16.mxu0 %v7435_v27  ;;  %4337 = vmatprep.mubr.bf16.mxu0 %v9044_v32  ;;  %v7522_v27 = vld [vmem:[%s10886_s1 + $0x9e4] ss:$16 sps:$4 sm:$0xff]  }
  0xc6   :  { %4761 = vmatprep.mubr.bf16.mxu1 %v8663_v31  ;;  %v7450_v31 = vld [vmem:[%s10886_s1 + $0x46c] ss:$16 sps:$4 sm:$0xff]  }
  0xc7   :  { %4775 = vmatpush1.bf16.msra.mxu1 %v7436_v34  ;;  %v7523_v34 = vld [vmem:[%s10886_s1 + $0x5e8] ss:$16 sps:$4 sm:$0xff]  }
  0xc8   :  { %4351 = vmatpush1.bf16.msra.mxu0 %v7433_v33  ;;  %4776 = vmatprep.subr.bf16.mxu1 %v7444_v5  ;;  %v7520_v33 = vld [vmem:[%s10886_s1 + $0x9e0] ss:$16 sps:$4 sm:$0xff]   ;;  %v7534_v5 = vld [vmem:[%s10886_s1 + $0x60c] ss:$16 sps:$4 sm:$0xff]  }
  0xc9   :  { %4352 = vmatprep.subr.bf16.mxu0 %v7441_v30  ;;  %v7531_v30 = vld [vmem:[%s10886_s1 + $0xa04] ss:$16 sps:$4 sm:$0xff]  }
  0xca   :  { %4762 = vmatmul.mubr.bf16.gmra.mrb[12].mxu1 %v8680_v35  ;;  %v7451_v35 = vld [vmem:[%s10886_s1 + $0x880] ss:$16 sps:$4 sm:$0xff]  }
  0xcb   :  { %4338 = vmatmul.mubr.bf16.gmra.mrb[4].mxu0 %v9068_v37  ;;  %4777 = vmatpush1.bf16.msra.mxu1 %v7442_v51  ;;  %v7529_v51 = vld [vmem:[%s10886_s1 + $0xa00] ss:$16 sps:$4 sm:$0xff]  }
  0xcc   :  { %4353 = vmatpush1.bf16.msra.mxu0 %v7439_v36  ;;  %4778 = vmatprep.subr.bf16.mxu1 %v7450_v31  ;;  %v7526_v36 = vld [vmem:[%s10885_s0 + $0x20] ss:$80 sps:$4 sm:$0xff]   ;;  %v7537_v31 = vld [vmem:[%s10886_s1 + $0xa24] ss:$16 sps:$4 sm:$0xff]  }
  0xcd   :  { %4354 = vmatprep.subr.bf16.mxu0 %v7447_v38  ;;  %4380 = vmatprep.mubr.bf16.mxu0 %v9082_v39  ;;  %v7532_v38 = vld [vmem:[%s10886_s1 + $0x608] ss:$16 sps:$4 sm:$0xff]  }
  0xce   :  { %4804 = vmatprep.mubr.bf16.mxu1 %v8699_v40  ;;  %v7462_v40 = vld [vmem:[%s10886_s1 + $0x4ac] ss:$16 sps:$4 sm:$0xff]  }
  0xcf   :  { %4779 = vmatpush1.bf16.msra.mxu1 %v7448_v42  ;;  %v7613_v42 = vld [vmem:[%s10885_s0 + $0xc4] ss:$80 sps:$4 sm:$0xff]  }
  0xd0   :  { %4355 = vmatpush1.bf16.msra.mxu0 %v7445_v41  ;;  %4780 = vmatprep.subr.bf16.mxu1 %v7456_v44  ;;  %v7540_v41 = vld [vmem:[%s10886_s1 + $0x62c] ss:$16 sps:$4 sm:$0xff]   ;;  %v7538_v44 = vld [vmem:[%s10886_s1 + $0x628] ss:$16 sps:$4 sm:$0xff]  }
  0xd1   :  { %4356 = vmatprep.subr.bf16.mxu0 %v7453_v43  ;;  %v7535_v43 = vld [vmem:[%s10886_s1 + $0xa20] ss:$16 sps:$4 sm:$0xff]  }
  0xd3   :  { %4781 = vmatpush1.bf16.msra.mxu1 %v7454_v45  ;;  %v7541_v45 = vld [vmem:[%s10886_s1 + $0xa40] ss:$16 sps:$4 sm:$0xff]  }
  0xd4   :  { %4357 = vmatpush1.bf16.msra.mxu0 %v7451_v35  ;;  %4782 = vmatprep.subr.bf16.mxu1 %v7462_v40  ;;  %v7543_v35 = vld [vmem:[%s10886_s1 + $0xa44] ss:$16 sps:$4 sm:$0xff]   ;;  %v7544_v40 = vld [vmem:[%s10886_s1 + $0x648] ss:$16 sps:$4 sm:$0xff]  }
  0xd5   :  { %4358 = vmatprep.subr.bf16.mxu0 %v7459_v46  ;;  %v7621_v46 = vld [vmem:[%s10885_s0 + $0xc0] ss:$80 sps:$4 sm:$0xff]  }
  0xd7   :  { %4783 = vmatpush1.bf16.msra.mxu1 %v7460_v48  ;;  %v7630_v48 = vld [vmem:[%s10885_s0 + $0x2c] ss:$80 sps:$4 sm:$0xff]  }
  0xd8   :  { %4359 = vmatpush1.bf16.msra.mxu0 %v7457_v47  ;;  %4784 = vmatprep.subr.bf16.mxu1 %v7468_v50  ;;  %v7549_v47 = vld [vmem:[%s10886_s1 + $0xa64] ss:$16 sps:$4 sm:$0xff]   ;;  %v7550_v50 = vld [vmem:[%s10886_s1 + $0x668] ss:$16 sps:$4 sm:$0xff]  }
  0xd9   :  { %4360 = vmatprep.subr.bf16.mxu0 %v7465_v49  ;;  %v7547_v49 = vld [vmem:[%s10886_s1 + $0xa60] ss:$16 sps:$4 sm:$0xff]  }
  0xdb   :  { %4785 = vmatpush1.bf16.msra.mxu1 %v7466_v53  ;;  %v7558_v53 = vld [vmem:[%s10886_s1 + $0x68c] ss:$16 sps:$4 sm:$0xff]  }
  0xdc   :  { %4361 = vmatpush1.bf16.msra.mxu0 %v7463_v52  ;;  %4786 = vmatprep.subr.bf16.mxu1 %v7474_v55  ;;  %v7555_v52 = vld [vmem:[%s10886_s1 + $0xa84] ss:$16 sps:$4 sm:$0xff]  }
  0xdd   :  { %4362 = vmatprep.subr.bf16.mxu0 %v7471_v54  ;;  %v7556_v54 = vld [vmem:[%s10886_s1 + $0x688] ss:$16 sps:$4 sm:$0xff]   ;;  %v7561_v55 = vld [vmem:[%s10886_s1 + $0xaa4] ss:$16 sps:$4 sm:$0xff]  }
  0xdf   :  { %4787 = vmatpush1.bf16.msra.mxu1 %v7472_v57  ;;  %v7562_v57 = vld [vmem:[%s10886_s1 + $0x6a8] ss:$16 sps:$4 sm:$0xff]  }
  0xe0   :  { %4363 = vmatpush1.bf16.msra.mxu0 %v7469_v56  ;;  %4788 = vmatprep.subr.bf16.mxu1 %v7480_v59  ;;  %v7559_v56 = vld [vmem:[%s10886_s1 + $0xaa0] ss:$16 sps:$4 sm:$0xff]   ;;  %v7570_v59 = vld [vmem:[%s10886_s1 + $0x6cc] ss:$16 sps:$4 sm:$0xff]  }
  0xe1   :  { %4364 = vmatprep.subr.bf16.mxu0 %v7477_v58  ;;  %v7567_v58 = vld [vmem:[%s10886_s1 + $0xac4] ss:$16 sps:$4 sm:$0xff]  }
  0xe3   :  { %4789 = vmatpush1.bf16.msra.mxu1 %v7478_v61 }
  0xe4   :  { %4365 = vmatpush1.bf16.msra.mxu0 %v7475_v60  ;;  %4790 = vmatprep.subr.bf16.mxu1 %v7486_v63 }
  0xe5   :  { %4366 = vmatprep.subr.bf16.mxu0 %v7483_v62  ;;  %v7565_v62 = vld [vmem:[%s10886_s1 + $0xac0] ss:$16 sps:$4 sm:$0xff]  }
  0xe7   :  { %4791 = vmatpush1.bf16.msra.mxu1 %v7484_v1 }
  0xe8   :  { %4367 = vmatpush1.bf16.msra.mxu0 %v7481_v0  ;;  %4792 = vmatprep.subr.bf16.mxu1 %v7492_v3  ;;  %v7568_v0 = vld [vmem:[%s10886_s1 + $0x6c8] ss:$16 sps:$4 sm:$0xff]   ;;  %v7576_v3 = vld [vmem:[%s10886_s1 + $0x6ec] ss:$16 sps:$4 sm:$0xff]  }
  0xe9   :  { %4368 = vmatprep.subr.bf16.mxu0 %v7489_v2  ;;  %v7573_v2 = vld [vmem:[%s10886_s1 + $0xae4] ss:$16 sps:$4 sm:$0xff]  }
  0xeb   :  { %4793 = vmatpush1.bf16.msra.mxu1 %v7490_v7  ;;  %v7574_v7 = vld [vmem:[%s10886_s1 + $0x6e8] ss:$16 sps:$4 sm:$0xff]  }
  0xec   :  { %4369 = vmatpush1.bf16.msra.mxu0 %v7487_v6  ;;  %4794 = vmatprep.subr.bf16.mxu1 %v7498_v9  ;;  %v7571_v6 = vld [vmem:[%s10886_s1 + $0xae0] ss:$16 sps:$4 sm:$0xff]   ;;  %v7582_v9 = vld [vmem:[%s10886_s1 + $0x70c] ss:$16 sps:$4 sm:$0xff]  }
  0xed   :  { %4370 = vmatprep.subr.bf16.mxu0 %v7495_v8  ;;  %v7579_v8 = vld [vmem:[%s10886_s1 + $0xb04] ss:$16 sps:$4 sm:$0xff]  }
  0xef   :  { %4795 = vmatpush1.bf16.msra.mxu1 %v7496_v11  ;;  %v7580_v11 = vld [vmem:[%s10886_s1 + $0x708] ss:$16 sps:$4 sm:$0xff]  }
  0xf0   :  { %4371 = vmatpush1.bf16.msra.mxu0 %v7493_v10  ;;  %4796 = vmatprep.subr.bf16.mxu1 %v7504_v13  ;;  %v7577_v10 = vld [vmem:[%s10886_s1 + $0xb00] ss:$16 sps:$4 sm:$0xff]   ;;  %v7588_v13 = vld [vmem:[%s10886_s1 + $0x72c] ss:$16 sps:$4 sm:$0xff]  }
  0xf1   :  { %4372 = vmatprep.subr.bf16.mxu0 %v7501_v12  ;;  %v7585_v12 = vld [vmem:[%s10886_s1 + $0xb24] ss:$16 sps:$4 sm:$0xff]  }
  0xf3   :  { %4797 = vmatpush1.bf16.msra.mxu1 %v7502_v16  ;;  %v7586_v16 = vld [vmem:[%s10886_s1 + $0x728] ss:$16 sps:$4 sm:$0xff]  }
  0xf4   :  { %4373 = vmatpush1.bf16.msra.mxu0 %v7499_v15  ;;  %4798 = vmatprep.subr.bf16.mxu1 %v7510_v18  ;;  %v7583_v15 = vld [vmem:[%s10886_s1 + $0xb20] ss:$16 sps:$4 sm:$0xff]   ;;  %v7594_v18 = vld [vmem:[%s10886_s1 + $0x74c] ss:$16 sps:$4 sm:$0xff]  }
  0xf5   :  { %4374 = vmatprep.subr.bf16.mxu0 %v7507_v17  ;;  %v7591_v17 = vld [vmem:[%s10886_s1 + $0xb44] ss:$16 sps:$4 sm:$0xff]  }
  0xf7   :  { %4799 = vmatpush1.bf16.msra.mxu1 %v7508_v21  ;;  %v7592_v21 = vld [vmem:[%s10886_s1 + $0x748] ss:$16 sps:$4 sm:$0xff]  }
  0xf8   :  { %4375 = vmatpush1.bf16.msra.mxu0 %v7505_v20  ;;  %4800 = vmatprep.subr.bf16.mxu1 %v7518_v4  ;;  %v7589_v20 = vld [vmem:[%s10886_s1 + $0xb40] ss:$16 sps:$4 sm:$0xff]   ;;  %v7600_v4 = vld [vmem:[%s10886_s1 + $0x76c] ss:$16 sps:$4 sm:$0xff]  }
  0xf9   :  { %4376 = vmatprep.subr.bf16.mxu0 %v7515_v22  ;;  %v7597_v22 = vld [vmem:[%s10886_s1 + $0xb64] ss:$16 sps:$4 sm:$0xff]  }
  0xfb   :  { %4801 = vmatpush1.bf16.msra.mxu1 %v7516_v26  ;;  %v7595_v26 = vld [vmem:[%s10886_s1 + $0xb60] ss:$16 sps:$4 sm:$0xff]  }
  0xfc   :  { %4377 = vmatpush1.bf16.msra.mxu0 %v7513_v24  ;;  %4802 = vmatprep.subr.bf16.mxu1 %v7525_v29  ;;  %v7598_v29 = vld [vmem:[%s10886_s1 + $0x768] ss:$16 sps:$4 sm:$0xff]  }
  0xfd   :  { %4378 = vmatprep.subr.bf16.mxu0 %v7522_v27 }
  0xff   :  { %4803 = vmatpush1.bf16.msra.mxu1 %v7523_v34  ;;  %v7603_v34 = vld [vmem:[%s10886_s1 + $0xb84] ss:$16 sps:$4 sm:$0xff]  }
 0x100   :  { %4379 = vmatpush1.bf16.msra.mxu0 %v7520_v33  ;;  %4825 = vmatprep.subr.bf16.mxu1 %v7534_v5 }
 0x101   :  { %4401 = vmatprep.subr.bf16.mxu0 %v7531_v30  ;;  %v7606_v30 = vld [vmem:[%s10886_s1 + $0x78c] ss:$16 sps:$4 sm:$0xff]  }
 0x102   :  { %4805 = vmatmul.mubr.bf16.vlgmr.msra.gmra.mrb[8].mxu1 %v8807_v14  ;;  %v7546_v14 = vld [vmem:[%s10886_s1 + $0x64c] ss:$16 sps:$4 sm:$0xff]  }
 0x103   :  { %4381 = vmatmul.mubr.bf16.vlgmr.msra.gmra.mrb[0].mxu0 %v7526_v36  ;;  %4826 = vmatpush1.bf16.msra.mxu1 %v7532_v38  ;;  %v7601_v36 = vld [vmem:[%s10886_s1 + $0xb80] ss:$16 sps:$4 sm:$0xff]   ;;  %v7609_v38 = vld [vmem:[%s10886_s1 + $0xba4] ss:$16 sps:$4 sm:$0xff]  }
 0x104   :  { %4402 = vmatpush1.bf16.msra.mxu0 %v7529_v51  ;;  %4827 = vmatprep.subr.bf16.mxu1 %v7540_v41  ;;  %v7604_v51 = vld [vmem:[%s10886_s1 + $0x788] ss:$16 sps:$4 sm:$0xff]   ;;  %v7607_v41 = vld [vmem:[%s10886_s1 + $0xba0] ss:$16 sps:$4 sm:$0xff]  }
 0x105   :  { %4403 = vmatprep.subr.bf16.mxu0 %v7537_v31  ;;  %4390 = vmatprep.mubr.bf16.mxu0 %v7613_v42  ;;  %v7612_v31 = vld [vmem:[%s10886_s1 + $0x7ac] ss:$16 sps:$4 sm:$0xff]   ;;  %v7610_v42 = vld [vmem:[%s10886_s1 + $0x7a8] ss:$16 sps:$4 sm:$0xff]  }
 0x106   :  { %4814 = vmatprep.mubr.bf16.mxu1 %v8824_v19  ;;  %v7552_v19 = vld [vmem:[%s10886_s1 + $0x66c] ss:$16 sps:$4 sm:$0xff]  }
 0x107   :  { %4828 = vmatpush1.bf16.msra.mxu1 %v7538_v44  ;;  %v7620_v44 = vld [vmem:[%s10886_s1 + $0x7cc] ss:$16 sps:$4 sm:$0xff]  }
 0x108   :  { %4404 = vmatpush1.bf16.msra.mxu0 %v7535_v43  ;;  %4829 = vmatprep.subr.bf16.mxu1 %v7546_v14  ;;  %v7617_v43 = vld [vmem:[%s10886_s1 + $0xbc4] ss:$16 sps:$4 sm:$0xff]   ;;  %v7618_v14 = vld [vmem:[%s10886_s1 + $0x7c8] ss:$16 sps:$4 sm:$0xff]  }
 0x109   :  { %4405 = vmatprep.subr.bf16.mxu0 %v7543_v35  ;;  %v7615_v35 = vld [vmem:[%s10886_s1 + $0xbc0] ss:$16 sps:$4 sm:$0xff]  }
 0x10a   :  { %4815 = vmatmul.mubr.bf16.gmra.mrb[12].mxu1 %v8851_v25  ;;  %v7553_v25 = vld [vmem:[%s10886_s1 + $0xa80] ss:$16 sps:$4 sm:$0xff]  }
 0x10b   :  { %4391 = vmatmul.mubr.bf16.gmra.mrb[4].mxu0 %v7621_v46  ;;  %4830 = vmatpush1.bf16.msra.mxu1 %v7544_v40  ;;  %v7627_v46 = vld [vmem:[%s10886_s1 + $0x7ec] ss:$16 sps:$4 sm:$0xff]   ;;  %v7622_v40 = vld [vmem:[%s10886_s1 + $0xbe0] ss:$16 sps:$4 sm:$0xff]  }
 0x10c   :  { %4406 = vmatpush1.bf16.msra.mxu0 %v7541_v45  ;;  %4831 = vmatprep.subr.bf16.mxu1 %v7552_v19  ;;  %v7624_v45 = vld [vmem:[%s10886_s1 + $0xbe4] ss:$16 sps:$4 sm:$0xff]   ;;  %v7628_v19 = vld [vmem:[%s10885_s0 + $0x28] ss:$80 sps:$4 sm:$0xff]  }
 0x10d   :  { %4407 = vmatprep.subr.bf16.mxu0 %v7549_v47  ;;  %4433 = vmatprep.mubr.bf16.mxu0 %v7630_v48  ;;  %v7625_v47 = vld [vmem:[%s10886_s1 + $0x7e8] ss:$16 sps:$4 sm:$0xff]   ;;  %v7633_v48 = vld [vmem:[%s10886_s1 + $0xc04] ss:$16 sps:$4 sm:$0xff]  }
 0x10e   :  { %4857 = vmatprep.mubr.bf16.mxu1 %v8862_v28  ;;  %v7564_v28 = vld [vmem:[%s10886_s1 + $0x6ac] ss:$16 sps:$4 sm:$0xff]  }
 0x10f   :  { %4832 = vmatpush1.bf16.msra.mxu1 %v7550_v50  ;;  %v7631_v50 = vld [vmem:[%s10886_s1 + $0xc00] ss:$16 sps:$4 sm:$0xff]  }
 0x110   :  { %4408 = vmatpush1.bf16.msra.mxu0 %v7547_v49  ;;  %4833 = vmatprep.subr.bf16.mxu1 %v7558_v53  ;;  %v7636_v49 = vld [vmem:[%s10886_s1 + $0x80c] ss:$16 sps:$4 sm:$0xff]   ;;  %v7639_v53 = vld [vmem:[%s10886_s1 + $0xc24] ss:$16 sps:$4 sm:$0xff]  }
 0x111   :  { %4409 = vmatprep.subr.bf16.mxu0 %v7555_v52  ;;  %v7634_v52 = vld [vmem:[%s10886_s1 + $0x808] ss:$16 sps:$4 sm:$0xff]  }
 0x113   :  { %4834 = vmatpush1.bf16.msra.mxu1 %v7556_v54  ;;  %v7715_v54 = vld [vmem:[%s10885_s0 + $0xcc] ss:$80 sps:$4 sm:$0xff]  }
 0x114   :  { %4410 = vmatpush1.bf16.msra.mxu0 %v7553_v25  ;;  %4835 = vmatprep.subr.bf16.mxu1 %v7564_v28  ;;  %v7642_v25 = vld [vmem:[%s10886_s1 + $0x82c] ss:$16 sps:$4 sm:$0xff]   ;;  %v7640_v28 = vld [vmem:[%s10886_s1 + $0x828] ss:$16 sps:$4 sm:$0xff]  }
 0x115   :  { %4411 = vmatprep.subr.bf16.mxu0 %v7561_v55  ;;  %v9332_v60 = vpop.f32.mrb[0].mxu1  ;;  %v7637_v55 = vld [vmem:[%s10886_s1 + $0xc20] ss:$16 sps:$4 sm:$0xff]  }
 0x116   :  { %v9334_v61 = vpop.f32.mrb[1].mxu1 }
 0x117   :  { %v9339_v63 = vpop.f32.mrb[2].mxu1  ;;  %4836 = vmatpush1.bf16.msra.mxu1 %v7562_v57  ;;  %v7648_v57 = vld [vmem:[%s10886_s1 + $0x84c] ss:$16 sps:$4 sm:$0xff]  }
 0x118   :  { %4412 = vmatpush1.bf16.msra.mxu0 %v7559_v56  ;;  %v9344_v1 = vpop.f32.mrb[3].mxu1  ;;  %4837 = vmatprep.subr.bf16.mxu1 %v7570_v59  ;;  %v7645_v56 = vld [vmem:[%s10886_s1 + $0xc44] ss:$16 sps:$4 sm:$0xff]   ;;  %v7646_v59 = vld [vmem:[%s10886_s1 + $0x848] ss:$16 sps:$4 sm:$0xff]  }
 0x119   :  { %4413 = vmatprep.subr.bf16.mxu0 %v7567_v58  ;;  %v7643_v58 = vld [vmem:[%s10886_s1 + $0xc40] ss:$16 sps:$4 sm:$0xff]  }
 0x11b   :  { %4838 = vmatpush1.bf16.msra.mxu1 %v7568_v0  ;;  %v7654_v0 = vld [vmem:[%s10886_s1 + $0x86c] ss:$16 sps:$4 sm:$0xff]  }
 0x11c   :  { %4414 = vmatpush1.bf16.msra.mxu0 %v7565_v62  ;;  %4839 = vmatprep.subr.bf16.mxu1 %v7576_v3  ;;  %v7651_v62 = vld [vmem:[%s10886_s1 + $0xc64] ss:$16 sps:$4 sm:$0xff]   ;;  %v7652_v3 = vld [vmem:[%s10886_s1 + $0x868] ss:$16 sps:$4 sm:$0xff]  }
 0x11d   :  { %4415 = vmatprep.subr.bf16.mxu0 %v7573_v2  ;;  %v9400_v24 = vpop.f32.mrb[4].mxu1  ;;  %v7649_v2 = vld [vmem:[%s10886_s1 + $0xc60] ss:$16 sps:$4 sm:$0xff]  }
 0x11e   :  { %v9405_v27 = vpop.f32.mrb[5].mxu1 }
 0x11f   :  { %4840 = vmatpush1.bf16.msra.mxu1 %v7574_v7  ;;  %v9410_v33 = vpop.f32.mrb[6].mxu1  ;;  %v7655_v7 = vld [vmem:[%s10886_s1 + $0xc80] ss:$16 sps:$4 sm:$0xff]  }
 0x120   :  { %4416 = vmatpush1.bf16.msra.mxu0 %v7571_v6  ;;  %4841 = vmatprep.subr.bf16.mxu1 %v7582_v9  ;;  %v9418_v5 = vpop.f32.mrb[7].mxu1  ;;  %v7657_v6 = vld [vmem:[%s10886_s1 + $0xc84] ss:$16 sps:$4 sm:$0xff]  }
 0x121   :  { %4417 = vmatprep.subr.bf16.mxu0 %v7579_v8  ;;  %v7658_v8 = vld [vmem:[%s10886_s1 + $0x888] ss:$16 sps:$4 sm:$0xff]   ;;  %v7663_v9 = vld [vmem:[%s10886_s1 + $0xca4] ss:$16 sps:$4 sm:$0xff]  }
 0x123   :  { %4842 = vmatpush1.bf16.msra.mxu1 %v7580_v11  ;;  %v7664_v11 = vld [vmem:[%s10886_s1 + $0x8a8] ss:$16 sps:$4 sm:$0xff]  }
 0x124   :  { %4418 = vmatpush1.bf16.msra.mxu0 %v7577_v10  ;;  %4843 = vmatprep.subr.bf16.mxu1 %v7588_v13  ;;  %v7661_v10 = vld [vmem:[%s10886_s1 + $0xca0] ss:$16 sps:$4 sm:$0xff]   ;;  %v7672_v13 = vld [vmem:[%s10886_s1 + $0x8cc] ss:$16 sps:$4 sm:$0xff]  }
 0x125   :  { %4419 = vmatprep.subr.bf16.mxu0 %v7585_v12  ;;  %v7669_v12 = vld [vmem:[%s10886_s1 + $0xcc4] ss:$16 sps:$4 sm:$0xff]  }
 0x127   :  { %4844 = vmatpush1.bf16.msra.mxu1 %v7586_v16  ;;  %v7670_v16 = vld [vmem:[%s10886_s1 + $0x8c8] ss:$16 sps:$4 sm:$0xff]  }
 0x128   :  { %4420 = vmatpush1.bf16.msra.mxu0 %v7583_v15  ;;  %4845 = vmatprep.subr.bf16.mxu1 %v7594_v18  ;;  %v7667_v15 = vld [vmem:[%s10886_s1 + $0xcc0] ss:$16 sps:$4 sm:$0xff]   ;;  %v7678_v18 = vld [vmem:[%s10886_s1 + $0x8ec] ss:$16 sps:$4 sm:$0xff]  }
 0x129   :  { %4421 = vmatprep.subr.bf16.mxu0 %v7591_v17  ;;  %v7675_v17 = vld [vmem:[%s10886_s1 + $0xce4] ss:$16 sps:$4 sm:$0xff]  }
 0x12b   :  { %4846 = vmatpush1.bf16.msra.mxu1 %v7592_v21  ;;  %v7676_v21 = vld [vmem:[%s10886_s1 + $0x8e8] ss:$16 sps:$4 sm:$0xff]  }
 0x12c   :  { %4422 = vmatpush1.bf16.msra.mxu0 %v7589_v20  ;;  %4847 = vmatprep.subr.bf16.mxu1 %v7600_v4  ;;  %v7673_v20 = vld [vmem:[%s10886_s1 + $0xce0] ss:$16 sps:$4 sm:$0xff]   ;;  %v7684_v4 = vld [vmem:[%s10886_s1 + $0x90c] ss:$16 sps:$4 sm:$0xff]  }
 0x12d   :  { %4423 = vmatprep.subr.bf16.mxu0 %v7597_v22  ;;  %v7681_v22 = vld [vmem:[%s10886_s1 + $0xd04] ss:$16 sps:$4 sm:$0xff]  }
 0x12f   :  { %4848 = vmatpush1.bf16.msra.mxu1 %v7598_v29  ;;  %v7682_v29 = vld [vmem:[%s10886_s1 + $0x908] ss:$16 sps:$4 sm:$0xff]  }
 0x130   :  { %4424 = vmatpush1.bf16.msra.mxu0 %v7595_v26  ;;  %4849 = vmatprep.subr.bf16.mxu1 %v7606_v30  ;;  %v7679_v26 = vld [vmem:[%s10886_s1 + $0xd00] ss:$16 sps:$4 sm:$0xff]   ;;  %v7690_v30 = vld [vmem:[%s10886_s1 + $0x92c] ss:$16 sps:$4 sm:$0xff]  }
 0x131   :  { %4425 = vmatprep.subr.bf16.mxu0 %v7603_v34  ;;  %v7687_v34 = vld [vmem:[%s10886_s1 + $0xd24] ss:$16 sps:$4 sm:$0xff]  }
 0x133   :  { %4850 = vmatpush1.bf16.msra.mxu1 %v7604_v51  ;;  %v7688_v51 = vld [vmem:[%s10886_s1 + $0x928] ss:$16 sps:$4 sm:$0xff]  }
 0x134   :  { %4426 = vmatpush1.bf16.msra.mxu0 %v7601_v36  ;;  %4851 = vmatprep.subr.bf16.mxu1 %v7612_v31  ;;  %v7685_v36 = vld [vmem:[%s10886_s1 + $0xd20] ss:$16 sps:$4 sm:$0xff]   ;;  %v7696_v31 = vld [vmem:[%s10886_s1 + $0x94c] ss:$16 sps:$4 sm:$0xff]  }
 0x135   :  { %4427 = vmatprep.subr.bf16.mxu0 %v7609_v38  ;;  %v7693_v38 = vld [vmem:[%s10886_s1 + $0xd44] ss:$16 sps:$4 sm:$0xff]  }
 0x137   :  { %4852 = vmatpush1.bf16.msra.mxu1 %v7610_v42  ;;  %v7694_v42 = vld [vmem:[%s10886_s1 + $0x948] ss:$16 sps:$4 sm:$0xff]  }
 0x138   :  { %4428 = vmatpush1.bf16.msra.mxu0 %v7607_v41  ;;  %4853 = vmatprep.subr.bf16.mxu1 %v7620_v44  ;;  %v7691_v41 = vld [vmem:[%s10886_s1 + $0xd40] ss:$16 sps:$4 sm:$0xff]   ;;  %v7702_v44 = vld [vmem:[%s10886_s1 + $0x96c] ss:$16 sps:$4 sm:$0xff]  }
 0x139   :  { %4429 = vmatprep.subr.bf16.mxu0 %v7617_v43  ;;  %v7699_v43 = vld [vmem:[%s10886_s1 + $0xd64] ss:$16 sps:$4 sm:$0xff]  }
 0x13b   :  { %4854 = vmatpush1.bf16.msra.mxu1 %v7618_v14  ;;  %v7700_v14 = vld [vmem:[%s10886_s1 + $0x968] ss:$16 sps:$4 sm:$0xff]  }
 0x13c   :  { %4430 = vmatpush1.bf16.msra.mxu0 %v7615_v35  ;;  %4855 = vmatprep.subr.bf16.mxu1 %v7627_v46  ;;  %v7697_v35 = vld [vmem:[%s10886_s1 + $0xd60] ss:$16 sps:$4 sm:$0xff]   ;;  %v7708_v46 = vld [vmem:[%s10886_s1 + $0x98c] ss:$16 sps:$4 sm:$0xff]  }
 0x13d   :  { %4431 = vmatprep.subr.bf16.mxu0 %v7624_v45  ;;  %v7705_v45 = vld [vmem:[%s10886_s1 + $0xd84] ss:$16 sps:$4 sm:$0xff]  }
 0x13f   :  { %4856 = vmatpush1.bf16.msra.mxu1 %v7625_v47  ;;  %v7706_v47 = vld [vmem:[%s10886_s1 + $0x988] ss:$16 sps:$4 sm:$0xff]  }
 0x140   :  { %4432 = vmatpush1.bf16.msra.mxu0 %v7622_v40  ;;  %4878 = vmatprep.subr.bf16.mxu1 %v7636_v49  ;;  %v7703_v40 = vld [vmem:[%s10886_s1 + $0xd80] ss:$16 sps:$4 sm:$0xff]  }
 0x141   :  { %4454 = vmatprep.subr.bf16.mxu0 %v7633_v48  ;;  %v7714_v48 = vld [vmem:[%s10886_s1 + $0x9ac] ss:$16 sps:$4 sm:$0xff]   ;;  %v7709_v49 = vld [vmem:[%s10886_s1 + $0xda0] ss:$16 sps:$4 sm:$0xff]  }
 0x142   :  { %4858 = vmatmul.mubr.bf16.vlgmr.msra.gmra.mrb[8].mxu1 %v9027_v23  ;;  %v7723_v23 = vld [vmem:[%s10885_s0 + $0xc8] ss:$80 sps:$4 sm:$0xff]  }
 0x143   :  { %4434 = vmatmul.mubr.bf16.vlgmr.msra.gmra.mrb[0].mxu0 %v7628_v19  ;;  %4879 = vmatpush1.bf16.msra.mxu1 %v7634_v52  ;;  %v7711_v19 = vld [vmem:[%s10886_s1 + $0xda4] ss:$16 sps:$4 sm:$0xff]  }
 0x144   :  { %4455 = vmatpush1.bf16.msra.mxu0 %v7631_v50  ;;  %4880 = vmatprep.subr.bf16.mxu1 %v7642_v25  ;;  %v7712_v50 = vld [vmem:[%s10886_s1 + $0x9a8] ss:$16 sps:$4 sm:$0xff]   ;;  %v7719_v52 = vld [vmem:[%s10886_s1 + $0xdc4] ss:$16 sps:$4 sm:$0xff]   ;;  %v7717_v25 = vld [vmem:[%s10886_s1 + $0xdc0] ss:$16 sps:$4 sm:$0xff]  }
 0x145   :  { %4456 = vmatprep.subr.bf16.mxu0 %v7639_v53  ;;  %4443 = vmatprep.mubr.bf16.mxu0 %v7715_v54  ;;  %v7722_v53 = vld [vmem:[%s10886_s1 + $0x9cc] ss:$16 sps:$4 sm:$0xff]   ;;  %v7720_v54 = vld [vmem:[%s10886_s1 + $0x9c8] ss:$16 sps:$4 sm:$0xff]  }
 0x146   :  { %4867 = vmatprep.mubr.bf16.mxu1 %v9044_v32  ;;  %v7732_v32 = vld [vmem:[%s10885_s0 + $0x34] ss:$80 sps:$4 sm:$0xff]  }
 0x147   :  { %4881 = vmatpush1.bf16.msra.mxu1 %v7640_v28  ;;  %v7729_v28 = vld [vmem:[%s10886_s1 + $0x9ec] ss:$16 sps:$4 sm:$0xff]  }
 0x148   :  { %4457 = vmatpush1.bf16.msra.mxu0 %v7637_v55  ;;  %4882 = vmatprep.subr.bf16.mxu1 %v7648_v57  ;;  %v7726_v55 = vld [vmem:[%s10886_s1 + $0xde4] ss:$16 sps:$4 sm:$0xff]   ;;  %v7727_v57 = vld [vmem:[%s10886_s1 + $0x9e8] ss:$16 sps:$4 sm:$0xff]  }
 0x149   :  { %4458 = vmatprep.subr.bf16.mxu0 %v7645_v56  ;;  %v7724_v56 = vld [vmem:[%s10886_s1 + $0xde0] ss:$16 sps:$4 sm:$0xff]  }
 0x14a   :  { %4868 = vmatmul.mubr.bf16.gmra.mrb[12].mxu1 %v9068_v37  ;;  %v7660_v37 = vld [vmem:[%s10886_s1 + $0x88c] ss:$16 sps:$4 sm:$0xff]  }
 0x14b   :  { %4444 = vmatmul.mubr.bf16.gmra.mrb[4].mxu0 %v7723_v23  ;;  %4883 = vmatpush1.bf16.msra.mxu1 %v7646_v59  ;;  %v9673_v23 = vld [vmem:[%s10885_s0 + $0x30] ss:$80 sps:$4 sm:$0xff]   ;;  %v7738_v59 = vld [vmem:[%s10886_s1 + $0xa0c] ss:$16 sps:$4 sm:$0xff]  }
 0x14c   :  { %4459 = vmatpush1.bf16.msra.mxu0 %v7643_v58  ;;  %4884 = vmatprep.subr.bf16.mxu1 %v7654_v0  ;;  %v7735_v58 = vld [vmem:[%s10886_s1 + $0xe04] ss:$16 sps:$4 sm:$0xff]   ;;  %v7736_v0 = vld [vmem:[%s10886_s1 + $0xa08] ss:$16 sps:$4 sm:$0xff]  }
 0x14d   :  { %4460 = vmatprep.subr.bf16.mxu0 %v7651_v62  ;;  %4486 = vmatprep.mubr.bf16.mxu0 %v7732_v32  ;;  %v7733_v62 = vld [vmem:[%s10886_s1 + $0xe00] ss:$16 sps:$4 sm:$0xff]   ;;  %v7741_v32 = vld [vmem:[%s10886_s1 + $0xe24] ss:$16 sps:$4 sm:$0xff]  }
 0x14e   :  { %4910 = vmatprep.mubr.bf16.mxu1 %v9082_v39  ;;  %v7666_v39 = vld [vmem:[%s10886_s1 + $0x8ac] ss:$16 sps:$4 sm:$0xff]  }
 0x14f   :  { %4885 = vmatpush1.bf16.msra.mxu1 %v7652_v3  ;;  %v9696_v3 = vld [vmem:[%s10885_s0 + $0xd4] ss:$80 sps:$4 sm:$0xff]  }
 0x150   :  { %4461 = vmatpush1.bf16.msra.mxu0 %v7649_v2  ;;  %4886 = vmatprep.subr.bf16.mxu1 %v7660_v37  ;;  %v7744_v2 = vld [vmem:[%s10886_s1 + $0xa2c] ss:$16 sps:$4 sm:$0xff]   ;;  %v8274_v37 = vld [vmem:[%s10885_s0 + $0x20] ss:$80 sps:$4 sm:$0xff]  }
 0x151   :  { %4462 = vmatprep.subr.bf16.mxu0 %v7657_v6  ;;  %v7739_v6 = vld [vmem:[%s10886_s1 + $0xe20] ss:$16 sps:$4 sm:$0xff]  }
 0x153   :  { %4887 = vmatpush1.bf16.msra.mxu1 %v7658_v8  ;;  %v7747_v8 = vld [vmem:[%s10886_s1 + $0xe44] ss:$16 sps:$4 sm:$0xff]  }
 0x154   :  { %4463 = vmatpush1.bf16.msra.mxu0 %v7655_v7  ;;  %4888 = vmatprep.subr.bf16.mxu1 %v7666_v39  ;;  %v7742_v7 = vld [vmem:[%s10886_s1 + $0xa28] ss:$16 sps:$4 sm:$0xff]   ;;  %v9717_v39 = vld [vmem:[%s10885_s0 + $0xd0] ss:$80 sps:$4 sm:$0xff]  }
 0x155   :  { %4464 = vmatprep.subr.bf16.mxu0 %v7663_v9  ;;  %v7750_v9 = vld [vmem:[%s10886_s1 + $0xa4c] ss:$16 sps:$4 sm:$0xff]  }
 0x157   :  { %4889 = vmatpush1.bf16.msra.mxu1 %v7664_v11  ;;  %v8275_v11 = vld [vmem:[%s10885_s0 + $0xc4] ss:$80 sps:$4 sm:$0xff]  }
 0x158   :  { %4465 = vmatpush1.bf16.msra.mxu0 %v7661_v10  ;;  %4890 = vmatprep.subr.bf16.mxu1 %v7672_v13  ;;  %v7745_v10 = vld [vmem:[%s10886_s1 + $0xe40] ss:$16 sps:$4 sm:$0xff]   ;;  %v7753_v13 = vld [vmem:[%s10886_s1 + $0xe64] ss:$16 sps:$4 sm:$0xff]  }
 0x159   :  { %4466 = vmatprep.subr.bf16.mxu0 %v7669_v12  ;;  %v7748_v12 = vld [vmem:[%s10886_s1 + $0xa48] ss:$16 sps:$4 sm:$0xff]  }
 0x15b   :  { %4891 = vmatpush1.bf16.msra.mxu1 %v7670_v16  ;;  %v9738_v16 = vld [vmem:[%s10885_s0 + $0x3c] ss:$80 sps:$4 sm:$0xff]  }
 0x15c   :  { %4467 = vmatpush1.bf16.msra.mxu0 %v7667_v15  ;;  %4892 = vmatprep.subr.bf16.mxu1 %v7678_v18  ;;  %v7756_v15 = vld [vmem:[%s10886_s1 + $0xa6c] ss:$16 sps:$4 sm:$0xff]   ;;  %v7751_v18 = vld [vmem:[%s10886_s1 + $0xe60] ss:$16 sps:$4 sm:$0xff]  }
 0x15d   :  { %4468 = vmatprep.subr.bf16.mxu0 %v7675_v17  ;;  %v8276_v17 = vld [vmem:[%s10885_s0 + $0xc0] ss:$80 sps:$4 sm:$0xff]  }
 0x15f   :  { %4893 = vmatpush1.bf16.msra.mxu1 %v7676_v21  ;;  %v7759_v21 = vld [vmem:[%s10886_s1 + $0xe84] ss:$16 sps:$4 sm:$0xff]  }
 0x160   :  { %4469 = vmatpush1.bf16.msra.mxu0 %v7673_v20  ;;  %4894 = vmatprep.subr.bf16.mxu1 %v7684_v4  ;;  %v7754_v20 = vld [vmem:[%s10886_s1 + $0xa68] ss:$16 sps:$4 sm:$0xff]   ;;  %v8277_v4 = vld [vmem:[%s10885_s0 + $0x2c] ss:$80 sps:$4 sm:$0xff]  }
 0x161   :  { %4470 = vmatprep.subr.bf16.mxu0 %v7681_v22  ;;  %v7762_v22 = vld [vmem:[%s10886_s1 + $0xa8c] ss:$16 sps:$4 sm:$0xff]  }
 0x163   :  { %4895 = vmatpush1.bf16.msra.mxu1 %v7682_v29  ;;  %v7760_v29 = vld [vmem:[%s10886_s1 + $0xa88] ss:$16 sps:$4 sm:$0xff]  }
 0x164   :  { %4471 = vmatpush1.bf16.msra.mxu0 %v7679_v26  ;;  %4896 = vmatprep.subr.bf16.mxu1 %v7690_v30  ;;  %v7757_v26 = vld [vmem:[%s10886_s1 + $0xe80] ss:$16 sps:$4 sm:$0xff]   ;;  %v7768_v30 = vld [vmem:[%s10886_s1 + $0xaac] ss:$16 sps:$4 sm:$0xff]  }
 0x165   :  { %4472 = vmatprep.subr.bf16.mxu0 %v7687_v34  ;;  %v7765_v34 = vld [vmem:[%s10886_s1 + $0xea4] ss:$16 sps:$4 sm:$0xff]  }
 0x167   :  { %4897 = vmatpush1.bf16.msra.mxu1 %v7688_v51  ;;  %v7766_v51 = vld [vmem:[%s10886_s1 + $0xaa8] ss:$16 sps:$4 sm:$0xff]  }
 0x168   :  { %4473 = vmatpush1.bf16.msra.mxu0 %v7685_v36  ;;  %4898 = vmatprep.subr.bf16.mxu1 %v7696_v31  ;;  %v7763_v36 = vld [vmem:[%s10886_s1 + $0xea0] ss:$16 sps:$4 sm:$0xff]   ;;  %v7774_v31 = vld [vmem:[%s10886_s1 + $0xacc] ss:$16 sps:$4 sm:$0xff]  }
 0x169   :  { %4474 = vmatprep.subr.bf16.mxu0 %v7693_v38  ;;  %v7771_v38 = vld [vmem:[%s10886_s1 + $0xec4] ss:$16 sps:$4 sm:$0xff]  }
 0x16b   :  { %4899 = vmatpush1.bf16.msra.mxu1 %v7694_v42  ;;  %v7772_v42 = vld [vmem:[%s10886_s1 + $0xac8] ss:$16 sps:$4 sm:$0xff]  }
 0x16c   :  { %4475 = vmatpush1.bf16.msra.mxu0 %v7691_v41  ;;  %4900 = vmatprep.subr.bf16.mxu1 %v7702_v44  ;;  %v7769_v41 = vld [vmem:[%s10886_s1 + $0xec0] ss:$16 sps:$4 sm:$0xff]   ;;  %v7780_v44 = vld [vmem:[%s10886_s1 + $0xaec] ss:$16 sps:$4 sm:$0xff]  }
 0x16d   :  { %4476 = vmatprep.subr.bf16.mxu0 %v7699_v43  ;;  %v7777_v43 = vld [vmem:[%s10886_s1 + $0xee4] ss:$16 sps:$4 sm:$0xff]  }
 0x16f   :  { %4901 = vmatpush1.bf16.msra.mxu1 %v7700_v14  ;;  %v7778_v14 = vld [vmem:[%s10886_s1 + $0xae8] ss:$16 sps:$4 sm:$0xff]  }
 0x170   :  { %4477 = vmatpush1.bf16.msra.mxu0 %v7697_v35  ;;  %4902 = vmatprep.subr.bf16.mxu1 %v7708_v46  ;;  %v7775_v35 = vld [vmem:[%s10886_s1 + $0xee0] ss:$16 sps:$4 sm:$0xff]   ;;  %v7786_v46 = vld [vmem:[%s10886_s1 + $0xb0c] ss:$16 sps:$4 sm:$0xff]  }
 0x171   :  { %4478 = vmatprep.subr.bf16.mxu0 %v7705_v45  ;;  %v7783_v45 = vld [vmem:[%s10886_s1 + $0xf04] ss:$16 sps:$4 sm:$0xff]  }
 0x173   :  { %4903 = vmatpush1.bf16.msra.mxu1 %v7706_v47  ;;  %v7784_v47 = vld [vmem:[%s10886_s1 + $0xb08] ss:$16 sps:$4 sm:$0xff]  }
 0x174   :  { %4479 = vmatpush1.bf16.msra.mxu0 %v7703_v40  ;;  %4904 = vmatprep.subr.bf16.mxu1 %v7714_v48  ;;  %v7781_v40 = vld [vmem:[%s10886_s1 + $0xf00] ss:$16 sps:$4 sm:$0xff]   ;;  %v7792_v48 = vld [vmem:[%s10886_s1 + $0xb2c] ss:$16 sps:$4 sm:$0xff]  }
 0x175   :  { %4480 = vmatprep.subr.bf16.mxu0 %v7711_v19  ;;  %v7789_v19 = vld [vmem:[%s10886_s1 + $0xf24] ss:$16 sps:$4 sm:$0xff]  }
 0x177   :  { %4905 = vmatpush1.bf16.msra.mxu1 %v7712_v50  ;;  %v7790_v50 = vld [vmem:[%s10886_s1 + $0xb28] ss:$16 sps:$4 sm:$0xff]  }
 0x178   :  { %4481 = vmatpush1.bf16.msra.mxu0 %v7709_v49  ;;  %4906 = vmatprep.subr.bf16.mxu1 %v7722_v53  ;;  %v7787_v49 = vld [vmem:[%s10886_s1 + $0xf20] ss:$16 sps:$4 sm:$0xff]   ;;  %v7798_v53 = vld [vmem:[%s10886_s1 + $0xb4c] ss:$16 sps:$4 sm:$0xff]  }
 0x179   :  { %4482 = vmatprep.subr.bf16.mxu0 %v7719_v52  ;;  %v7795_v52 = vld [vmem:[%s10886_s1 + $0xf44] ss:$16 sps:$4 sm:$0xff]  }
 0x17b   :  { %4907 = vmatpush1.bf16.msra.mxu1 %v7720_v54  ;;  %v7796_v54 = vld [vmem:[%s10886_s1 + $0xb48] ss:$16 sps:$4 sm:$0xff]  }
 0x17c   :  { %4483 = vmatpush1.bf16.msra.mxu0 %v7717_v25  ;;  %4908 = vmatprep.subr.bf16.mxu1 %v7729_v28  ;;  %v7793_v25 = vld [vmem:[%s10886_s1 + $0xf40] ss:$16 sps:$4 sm:$0xff]   ;;  %v7804_v28 = vld [vmem:[%s10886_s1 + $0xb6c] ss:$16 sps:$4 sm:$0xff]  }
 0x17d   :  { %4484 = vmatprep.subr.bf16.mxu0 %v7726_v55  ;;  %v7801_v55 = vld [vmem:[%s10886_s1 + $0xf64] ss:$16 sps:$4 sm:$0xff]  }
 0x17f   :  { %4909 = vmatpush1.bf16.msra.mxu1 %v7727_v57  ;;  %v7802_v57 = vld [vmem:[%s10886_s1 + $0xb68] ss:$16 sps:$4 sm:$0xff]  }
 0x180   :  { %4485 = vmatpush1.bf16.msra.mxu0 %v7724_v56  ;;  %4931 = vmatprep.subr.bf16.mxu1 %v7738_v59  ;;  %v7799_v56 = vld [vmem:[%s10886_s1 + $0xf60] ss:$16 sps:$4 sm:$0xff]   ;;  %v7810_v59 = vld [vmem:[%s10886_s1 + $0xb8c] ss:$16 sps:$4 sm:$0xff]  }
 0x181   :  { %4507 = vmatprep.subr.bf16.mxu0 %v7735_v58  ;;  %v7807_v58 = vld [vmem:[%s10886_s1 + $0xf84] ss:$16 sps:$4 sm:$0xff]  }
 0x182   :  { %4911 = vmatmul.mubr.bf16.vlgmr.msra.gmra.mrb[8].mxu1 %v8274_v37  ;;  %v7814_v37 = vld [vmem:[%s10886_s1 + $0xba8] ss:$16 sps:$4 sm:$0xff]  }
 0x183   :  { %4487 = vmatmul.mubr.bf16.vlgmr.msra.gmra.mrb[0].mxu0 %v9673_v23  ;;  %4932 = vmatpush1.bf16.msra.mxu1 %v7736_v0  ;;  %v7808_v0 = vld [vmem:[%s10886_s1 + $0xb88] ss:$16 sps:$4 sm:$0xff]  }
 0x184   :  { %4508 = vmatpush1.bf16.msra.mxu0 %v7733_v62  ;;  %4933 = vmatprep.subr.bf16.mxu1 %v7744_v2  ;;  %v7805_v62 = vld [vmem:[%s10886_s1 + $0xf80] ss:$16 sps:$4 sm:$0xff]   ;;  %v7816_v2 = vld [vmem:[%s10886_s1 + $0xbac] ss:$16 sps:$4 sm:$0xff]  }
 0x185   :  { %4509 = vmatprep.subr.bf16.mxu0 %v7741_v32  ;;  %4496 = vmatprep.mubr.bf16.mxu0 %v9696_v3  ;;  %v7813_v32 = vld [vmem:[%s10886_s1 + $0xfa4] ss:$16 sps:$4 sm:$0xff]  }
 0x186   :  { %4920 = vmatprep.mubr.bf16.mxu1 %v8275_v11  ;;  %v7828_v11 = vld [vmem:[%s10886_s1 + $0xfe4] ss:$16 sps:$4 sm:$0xff]  }
 0x187   :  { %4934 = vmatpush1.bf16.msra.mxu1 %v7742_v7  ;;  %v7821_v7 = vld [vmem:[%s10886_s1 + $0xfc4] ss:$16 sps:$4 sm:$0xff]  }
 0x188   :  { %4510 = vmatpush1.bf16.msra.mxu0 %v7739_v6  ;;  %4935 = vmatprep.subr.bf16.mxu1 %v7750_v9  ;;  %v7811_v6 = vld [vmem:[%s10886_s1 + $0xfa0] ss:$16 sps:$4 sm:$0xff]  }
 0x189   :  { %4511 = vmatprep.subr.bf16.mxu0 %v7747_v8  ;;  %v7824_v8 = vld [vmem:[%s10886_s1 + $0xbcc] ss:$16 sps:$4 sm:$0xff]   ;;  %v7819_v9 = vld [vmem:[%s10886_s1 + $0xfc0] ss:$16 sps:$4 sm:$0xff]  }
 0x18a   :  { %4921 = vmatmul.mubr.bf16.gmra.mrb[12].mxu1 %v8276_v17  ;;  %v9901_v17 = vld [vmem:[%s10885_s0 + $0x38] ss:$80 sps:$4 sm:$0xff]  }
 0x18b   :  { %4497 = vmatmul.mubr.bf16.gmra.mrb[4].mxu0 %v9717_v39  ;;  %4936 = vmatpush1.bf16.msra.mxu1 %v7748_v12  ;;  %v7831_v12 = vld [vmem:[%s10886_s1 + $0xbec] ss:$16 sps:$4 sm:$0xff]  }
 0x18c   :  { %4512 = vmatpush1.bf16.msra.mxu0 %v7745_v10  ;;  %4937 = vmatprep.subr.bf16.mxu1 %v7756_v15  ;;  %v7822_v10 = vld [vmem:[%s10886_s1 + $0xbc8] ss:$16 sps:$4 sm:$0xff]  }
 0x18d   :  { %4513 = vmatprep.subr.bf16.mxu0 %v7753_v13  ;;  %4539 = vmatprep.mubr.bf16.mxu0 %v9738_v16  ;;  %v7826_v13 = vld [vmem:[%s10886_s1 + $0xfe0] ss:$16 sps:$4 sm:$0xff]   ;;  %v7829_v15 = vld [vmem:[%s10886_s1 + $0xbe8] ss:$16 sps:$4 sm:$0xff]  }
 0x18e   :  { %4963 = vmatprep.mubr.bf16.mxu1 %v8277_v4  ;;  %v7843_v4 = vld [vmem:[%s10886_s1 + $0x1024] ss:$16 sps:$4 sm:$0xff]  }
 0x18f   :  { %4938 = vmatpush1.bf16.msra.mxu1 %v7754_v20  ;;  %v7840_v20 = vld [vmem:[%s10886_s1 + $0xc0c] ss:$16 sps:$4 sm:$0xff]  }
 0x190   :  { %4514 = vmatpush1.bf16.msra.mxu0 %v7751_v18  ;;  %4939 = vmatprep.subr.bf16.mxu1 %v7762_v22  ;;  %v7837_v18 = vld [vmem:[%s10886_s1 + $0x1004] ss:$16 sps:$4 sm:$0xff]   ;;  %v7838_v22 = vld [vmem:[%s10886_s1 + $0xc08] ss:$16 sps:$4 sm:$0xff]  }
 0x191   :  { %4515 = vmatprep.subr.bf16.mxu0 %v7759_v21  ;;  %v7835_v21 = vld [vmem:[%s10886_s1 + $0x1000] ss:$16 sps:$4 sm:$0xff]  }
 0x193   :  { %4940 = vmatpush1.bf16.msra.mxu1 %v7760_v29  ;;  %v7841_v29 = vld [vmem:[%s10886_s1 + $0x1020] ss:$16 sps:$4 sm:$0xff]  }
 0x194   :  { %4516 = vmatpush1.bf16.msra.mxu0 %v7757_v26  ;;  %4941 = vmatprep.subr.bf16.mxu1 %v7768_v30  ;;  %v7846_v26 = vld [vmem:[%s10886_s1 + $0xc2c] ss:$16 sps:$4 sm:$0xff]  }
 0x195   :  { %4517 = vmatprep.subr.bf16.mxu0 %v7765_v34  ;;  %v7844_v34 = vld [vmem:[%s10886_s1 + $0xc28] ss:$16 sps:$4 sm:$0xff]   ;;  %v9930_v30 = vld [vmem:[%s10885_s0 + $0xdc] ss:$80 sps:$4 sm:$0xff]  }
 0x197   :  { %4942 = vmatpush1.bf16.msra.mxu1 %v7766_v51  ;;  %v7849_v51 = vld [vmem:[%s10886_s1 + $0x1044] ss:$16 sps:$4 sm:$0xff]  }
 0x198   :  { %4518 = vmatpush1.bf16.msra.mxu0 %v7763_v36  ;;  %4943 = vmatprep.subr.bf16.mxu1 %v7774_v31  ;;  %v8278_v36 = vld [vmem:[%s10885_s0 + $0x28] ss:$80 sps:$4 sm:$0xff]  }
 0x199   :  { %4519 = vmatprep.subr.bf16.mxu0 %v7771_v38  ;;  %v7852_v38 = vld [vmem:[%s10886_s1 + $0xc4c] ss:$16 sps:$4 sm:$0xff]   ;;  %v9945_v31 = vld [vmem:[%s10885_s0 + $0xd8] ss:$80 sps:$4 sm:$0xff]  }
 0x19b   :  { %4944 = vmatpush1.bf16.msra.mxu1 %v7772_v42  ;;  %v8279_v42 = vld [vmem:[%s10885_s0 + $0xcc] ss:$80 sps:$4 sm:$0xff]  }
 0x19c   :  { %4520 = vmatpush1.bf16.msra.mxu0 %v7769_v41  ;;  %4945 = vmatprep.subr.bf16.mxu1 %v7780_v44  ;;  %v7847_v41 = vld [vmem:[%s10886_s1 + $0x1040] ss:$16 sps:$4 sm:$0xff]   ;;  %v7855_v44 = vld [vmem:[%s10886_s1 + $0x1064] ss:$16 sps:$4 sm:$0xff]  }
 0x19d   :  { %4521 = vmatprep.subr.bf16.mxu0 %v7777_v43  ;;  %v7850_v43 = vld [vmem:[%s10886_s1 + $0xc48] ss:$16 sps:$4 sm:$0xff]  }
 0x19f   :  { %4946 = vmatpush1.bf16.msra.mxu1 %v7778_v14  ;;  %v7853_v14 = vld [vmem:[%s10886_s1 + $0x1060] ss:$16 sps:$4 sm:$0xff]  }
 0x1a0   :  { %4522 = vmatpush1.bf16.msra.mxu0 %v7775_v35  ;;  %4947 = vmatprep.subr.bf16.mxu1 %v7786_v46  ;;  %v7858_v35 = vld [vmem:[%s10886_s1 + $0xc6c] ss:$16 sps:$4 sm:$0xff]   ;;  %v9972_v46 = vld [vmem:[%s10885_s0 + $0x44] ss:$80 sps:$4 sm:$0xff]  }
 0x1a1   :  { %4523 = vmatprep.subr.bf16.mxu0 %v7783_v45  ;;  %v7856_v45 = vld [vmem:[%s10886_s1 + $0xc68] ss:$16 sps:$4 sm:$0xff]  }
 0x1a3   :  { %4948 = vmatpush1.bf16.msra.mxu1 %v7784_v47  ;;  %v7861_v47 = vld [vmem:[%s10886_s1 + $0x1084] ss:$16 sps:$4 sm:$0xff]  }
 0x1a4   :  { %4524 = vmatpush1.bf16.msra.mxu0 %v7781_v40  ;;  %4949 = vmatprep.subr.bf16.mxu1 %v7792_v48  ;;  %v8280_v40 = vld [vmem:[%s10885_s0 + $0xc8] ss:$80 sps:$4 sm:$0xff]   ;;  %v7859_v48 = vld [vmem:[%s10886_s1 + $0x1080] ss:$16 sps:$4 sm:$0xff]  }
 0x1a5   :  { %4525 = vmatprep.subr.bf16.mxu0 %v7789_v19  ;;  %v7864_v19 = vld [vmem:[%s10886_s1 + $0xc8c] ss:$16 sps:$4 sm:$0xff]  }
 0x1a7   :  { %4950 = vmatpush1.bf16.msra.mxu1 %v7790_v50  ;;  %v8281_v50 = vld [vmem:[%s10885_s0 + $0x34] ss:$80 sps:$4 sm:$0xff]  }
 0x1a8   :  { %4526 = vmatpush1.bf16.msra.mxu0 %v7787_v49  ;;  %4951 = vmatprep.subr.bf16.mxu1 %v7798_v53  ;;  %v7862_v49 = vld [vmem:[%s10886_s1 + $0xc88] ss:$16 sps:$4 sm:$0xff]   ;;  %v7870_v53 = vld [vmem:[%s10886_s1 + $0xcac] ss:$16 sps:$4 sm:$0xff]  }
 0x1a9   :  { %4527 = vmatprep.subr.bf16.mxu0 %v7795_v52  ;;  %v7867_v52 = vld [vmem:[%s10886_s1 + $0x10a4] ss:$16 sps:$4 sm:$0xff]  }
 0x1ab   :  { %4952 = vmatpush1.bf16.msra.mxu1 %v7796_v54  ;;  %v7868_v54 = vld [vmem:[%s10886_s1 + $0xca8] ss:$16 sps:$4 sm:$0xff]  }
 0x1ac   :  { %4528 = vmatpush1.bf16.msra.mxu0 %v7793_v25  ;;  %4953 = vmatprep.subr.bf16.mxu1 %v7804_v28  ;;  %v7865_v25 = vld [vmem:[%s10886_s1 + $0x10a0] ss:$16 sps:$4 sm:$0xff]   ;;  %v7876_v28 = vld [vmem:[%s10886_s1 + $0xccc] ss:$16 sps:$4 sm:$0xff]  }
 0x1ad   :  { %4529 = vmatprep.subr.bf16.mxu0 %v7801_v55  ;;  %v7873_v55 = vld [vmem:[%s10886_s1 + $0x10c4] ss:$16 sps:$4 sm:$0xff]  }
 0x1af   :  { %4954 = vmatpush1.bf16.msra.mxu1 %v7802_v57  ;;  %v7874_v57 = vld [vmem:[%s10886_s1 + $0xcc8] ss:$16 sps:$4 sm:$0xff]  }
 0x1b0   :  { %4530 = vmatpush1.bf16.msra.mxu0 %v7799_v56  ;;  %4955 = vmatprep.subr.bf16.mxu1 %v7810_v59  ;;  %v7871_v56 = vld [vmem:[%s10886_s1 + $0x10c0] ss:$16 sps:$4 sm:$0xff]   ;;  %v7882_v59 = vld [vmem:[%s10886_s1 + $0xcec] ss:$16 sps:$4 sm:$0xff]  }
 0x1b1   :  { %4531 = vmatprep.subr.bf16.mxu0 %v7807_v58  ;;  %v7879_v58 = vld [vmem:[%s10886_s1 + $0x10e4] ss:$16 sps:$4 sm:$0xff]  }
 0x1b3   :  { %4956 = vmatpush1.bf16.msra.mxu1 %v7808_v0 }
 0x1b4   :  { %4532 = vmatpush1.bf16.msra.mxu0 %v7805_v62  ;;  %4957 = vmatprep.subr.bf16.mxu1 %v7816_v2 }
 0x1b5   :  { %4533 = vmatprep.subr.bf16.mxu0 %v7813_v32 }
 0x1b7   :  { %4958 = vmatpush1.bf16.msra.mxu1 %v7814_v37 }
 0x1b8   :  { %4534 = vmatpush1.bf16.msra.mxu0 %v7811_v6  ;;  %4959 = vmatprep.subr.bf16.mxu1 %v7824_v8 }
 0x1b9   :  { %4535 = vmatprep.subr.bf16.mxu0 %v7821_v7 }
 0x1bb   :  { %4960 = vmatpush1.bf16.msra.mxu1 %v7822_v10 }
 0x1bc   :  { %4536 = vmatpush1.bf16.msra.mxu0 %v7819_v9  ;;  %4961 = vmatprep.subr.bf16.mxu1 %v7831_v12 }
 0x1bd   :  { %4537 = vmatprep.subr.bf16.mxu0 %v7828_v11 }
 0x1bf   :  { %4962 = vmatpush1.bf16.msra.mxu1 %v7829_v15 }
 0x1c0   :  { %4538 = vmatpush1.bf16.msra.mxu0 %v7826_v13  ;;  %4984 = vmatprep.subr.bf16.mxu1 %v7840_v20 }
 0x1c1   :  { %4560 = vmatprep.subr.bf16.mxu0 %v7837_v18 }
 0x1c2   :  { %4964 = vmatmul.mubr.bf16.vlgmr.msra.gmra.mrb[8].mxu1 %v8278_v36 }
 0x1c3   :  { %4540 = vmatmul.mubr.bf16.vlgmr.msra.gmra.mrb[0].mxu0 %v9901_v17  ;;  %4985 = vmatpush1.bf16.msra.mxu1 %v7838_v22 }
 0x1c4   :  { %4561 = vmatpush1.bf16.msra.mxu0 %v7835_v21  ;;  %4986 = vmatprep.subr.bf16.mxu1 %v7846_v26 }
 0x1c5   :  { %4562 = vmatprep.subr.bf16.mxu0 %v7843_v4  ;;  %4549 = vmatprep.mubr.bf16.mxu0 %v9930_v30 }
 0x1c6   :  { %4973 = vmatprep.mubr.bf16.mxu1 %v8279_v42 }
 0x1c7   :  { %4987 = vmatpush1.bf16.msra.mxu1 %v7844_v34 }
 0x1c8   :  { %4563 = vmatpush1.bf16.msra.mxu0 %v7841_v29  ;;  %4988 = vmatprep.subr.bf16.mxu1 %v7852_v38 }
 0x1c9   :  { %4564 = vmatprep.subr.bf16.mxu0 %v7849_v51 }
 0x1ca   :  { %4974 = vmatmul.mubr.bf16.gmra.mrb[12].mxu1 %v8280_v40 }
 0x1cb   :  { %4550 = vmatmul.mubr.bf16.gmra.mrb[4].mxu0 %v9945_v31  ;;  %4989 = vmatpush1.bf16.msra.mxu1 %v7850_v43 }
 0x1cc   :  { %4565 = vmatpush1.bf16.msra.mxu0 %v7847_v41  ;;  %4990 = vmatprep.subr.bf16.mxu1 %v7858_v35 }
 0x1cd   :  { %4566 = vmatprep.subr.bf16.mxu0 %v7855_v44  ;;  %4592 = vmatprep.mubr.bf16.mxu0 %v9972_v46 }
 0x1ce   :  { %5016 = vmatprep.mubr.bf16.mxu1 %v8281_v50 }
 0x1cf   :  { %4991 = vmatpush1.bf16.msra.mxu1 %v7856_v45 }
 0x1d0   :  { %4567 = vmatpush1.bf16.msra.mxu0 %v7853_v14  ;;  %4992 = vmatprep.subr.bf16.mxu1 %v7864_v19 }
 0x1d1   :  { %4568 = vmatprep.subr.bf16.mxu0 %v7861_v47 }
 0x1d3   :  { %4993 = vmatpush1.bf16.msra.mxu1 %v7862_v49 }
 0x1d4   :  { %4569 = vmatpush1.bf16.msra.mxu0 %v7859_v48  ;;  %4994 = vmatprep.subr.bf16.mxu1 %v7870_v53 }
 0x1d5   :  { %4570 = vmatprep.subr.bf16.mxu0 %v7867_v52 }
 0x1d7   :  { %4995 = vmatpush1.bf16.msra.mxu1 %v7868_v54 }
 0x1d8   :  { %4571 = vmatpush1.bf16.msra.mxu0 %v7865_v25  ;;  %4996 = vmatprep.subr.bf16.mxu1 %v7876_v28 }
 0x1d9   :  { %4572 = vmatprep.subr.bf16.mxu0 %v7873_v55 }
 0x1da   :  { %14 = vsyncpa [#allocation3], 0  ;;  %v7877_v62 = vld [vmem:[%s10886_s1 + $0x10e0] ss:$16 sps:$4 sm:$0xff]   ;;  %v7880_v0 = vld [vmem:[%s10886_s1 + $0xce8] ss:$16 sps:$4 sm:$0xff]  }
 0x1db   :  { %4997 = vmatpush1.bf16.msra.mxu1 %v7874_v57  ;;  %v7885_v32 = vld [vmem:[%s10886_s1 + $0x1104] ss:$16 sps:$4 sm:$0xff]   ;;  %v7888_v2 = vld [vmem:[%s10886_s1 + $0xd0c] ss:$16 sps:$4 sm:$0xff]   ;;  %v7883_v6 = vld [vmem:[%s10886_s1 + $0x1100] ss:$16 sps:$4 sm:$0xff]  }
 0x1dc   :  { %4573 = vmatpush1.bf16.msra.mxu0 %v7871_v56  ;;  %4998 = vmatprep.subr.bf16.mxu1 %v7882_v59  ;;  %v7886_v37 = vld [vmem:[%s10886_s1 + $0xd08] ss:$16 sps:$4 sm:$0xff]   ;;  %v7891_v7 = vld [vmem:[%s10886_s1 + $0x1124] ss:$16 sps:$4 sm:$0xff]   ;;  %v7894_v8 = vld [vmem:[%s10886_s1 + $0xd2c] ss:$16 sps:$4 sm:$0xff]  }
 0x1dd   :  { %4574 = vmatprep.subr.bf16.mxu0 %v7879_v58  ;;  %v7889_v9 = vld [vmem:[%s10886_s1 + $0x1120] ss:$16 sps:$4 sm:$0xff]   ;;  %v7892_v10 = vld [vmem:[%s10886_s1 + $0xd28] ss:$16 sps:$4 sm:$0xff]   ;;  %v7897_v11 = vld [vmem:[%s10886_s1 + $0x1144] ss:$16 sps:$4 sm:$0xff]  }
 0x1de   :  { %v7900_v12 = vld [vmem:[%s10886_s1 + $0xd4c] ss:$16 sps:$4 sm:$0xff]   ;;  %v7895_v13 = vld [vmem:[%s10886_s1 + $0x1140] ss:$16 sps:$4 sm:$0xff]   ;;  %v7898_v15 = vld [vmem:[%s10886_s1 + $0xd48] ss:$16 sps:$4 sm:$0xff]  }
 0x1df   :  { %4999 = vmatpush1.bf16.msra.mxu1 %v7880_v0  ;;  %v7903_v18 = vld [vmem:[%s10886_s1 + $0x1164] ss:$16 sps:$4 sm:$0xff]   ;;  %v7906_v20 = vld [vmem:[%s10886_s1 + $0xd6c] ss:$16 sps:$4 sm:$0xff]   ;;  %v7901_v21 = vld [vmem:[%s10886_s1 + $0x1160] ss:$16 sps:$4 sm:$0xff]  }
 0x1e0   :  { %4575 = vmatpush1.bf16.msra.mxu0 %v7877_v62  ;;  %5000 = vmatprep.subr.bf16.mxu1 %v7888_v2  ;;  %v7904_v22 = vld [vmem:[%s10886_s1 + $0xd68] ss:$16 sps:$4 sm:$0xff]   ;;  %v7909_v4 = vld [vmem:[%s10886_s1 + $0x1184] ss:$16 sps:$4 sm:$0xff]   ;;  %v7912_v26 = vld [vmem:[%s10886_s1 + $0xd8c] ss:$16 sps:$4 sm:$0xff]  }
 0x1e1   :  { %4576 = vmatprep.subr.bf16.mxu0 %v7885_v32  ;;  %v7907_v29 = vld [vmem:[%s10886_s1 + $0x1180] ss:$16 sps:$4 sm:$0xff]   ;;  %v7910_v34 = vld [vmem:[%s10886_s1 + $0xd88] ss:$16 sps:$4 sm:$0xff]   ;;  %v7915_v36 = vld [vmem:[%s10886_s1 + $0x11a4] ss:$16 sps:$4 sm:$0xff]  }
 0x1e2   :  { %v7918_v51 = vld [vmem:[%s10886_s1 + $0xdac] ss:$16 sps:$4 sm:$0xff]   ;;  %v7913_v38 = vld [vmem:[%s10886_s1 + $0x11a0] ss:$16 sps:$4 sm:$0xff]   ;;  %v7916_v41 = vld [vmem:[%s10886_s1 + $0xda8] ss:$16 sps:$4 sm:$0xff]  }
 0x1e3   :  { %5001 = vmatpush1.bf16.msra.mxu1 %v7886_v37  ;;  %v7923_v42 = vld [vmem:[%s10886_s1 + $0x11c4] ss:$16 sps:$4 sm:$0xff]   ;;  %v7926_v43 = vld [vmem:[%s10886_s1 + $0xdcc] ss:$16 sps:$4 sm:$0xff]   ;;  %v7921_v44 = vld [vmem:[%s10886_s1 + $0x11c0] ss:$16 sps:$4 sm:$0xff]  }
 0x1e4   :  { %4577 = vmatpush1.bf16.msra.mxu0 %v7883_v6  ;;  %5002 = vmatprep.subr.bf16.mxu1 %v7894_v8  ;;  %v7924_v35 = vld [vmem:[%s10886_s1 + $0xdc8] ss:$16 sps:$4 sm:$0xff]   ;;  %v7930_v14 = vld [vmem:[%s10886_s1 + $0x11e4] ss:$16 sps:$4 sm:$0xff]   ;;  %v7933_v45 = vld [vmem:[%s10886_s1 + $0xdec] ss:$16 sps:$4 sm:$0xff]  }
 0x1e5   :  { %4578 = vmatprep.subr.bf16.mxu0 %v7891_v7  ;;  %v7928_v40 = vld [vmem:[%s10886_s1 + $0x11e0] ss:$16 sps:$4 sm:$0xff]   ;;  %v7931_v47 = vld [vmem:[%s10886_s1 + $0xde8] ss:$16 sps:$4 sm:$0xff]   ;;  %v7939_v19 = vld [vmem:[%s10886_s1 + $0x1204] ss:$16 sps:$4 sm:$0xff]  }
 0x1e6   :  { %v7942_v48 = vld [vmem:[%s10886_s1 + $0xe0c] ss:$16 sps:$4 sm:$0xff]   ;;  %v10135_v49 = vld [vmem:[%s10885_s0 + $0x40] ss:$80 sps:$4 sm:$0xff]   ;;  %v7940_v52 = vld [vmem:[%s10886_s1 + $0xe08] ss:$16 sps:$4 sm:$0xff]  }
 0x1e7   :  { %5003 = vmatpush1.bf16.msra.mxu1 %v7892_v10  ;;  %v7937_v50 = vld [vmem:[%s10886_s1 + $0x1200] ss:$16 sps:$4 sm:$0xff]   ;;  %v7945_v53 = vld [vmem:[%s10886_s1 + $0x1224] ss:$16 sps:$4 sm:$0xff]   ;;  %v7948_v25 = vld [vmem:[%s10886_s1 + $0xe2c] ss:$16 sps:$4 sm:$0xff]  }
 0x1e8   :  { %4579 = vmatpush1.bf16.msra.mxu0 %v7889_v9  ;;  %5004 = vmatprep.subr.bf16.mxu1 %v7900_v12  ;;  %v10152_v54 = vld [vmem:[%s10885_s0 + $0xe4] ss:$80 sps:$4 sm:$0xff]   ;;  %v7943_v55 = vld [vmem:[%s10886_s1 + $0x1220] ss:$16 sps:$4 sm:$0xff]   ;;  %v7946_v28 = vld [vmem:[%s10886_s1 + $0xe28] ss:$16 sps:$4 sm:$0xff]  }
 0x1e9   :  { %4580 = vmatprep.subr.bf16.mxu0 %v7897_v11  ;;  %v7951_v56 = vld [vmem:[%s10886_s1 + $0x1244] ss:$16 sps:$4 sm:$0xff]   ;;  %v10173_v57 = vld [vmem:[%s10885_s0 + $0xe0] ss:$80 sps:$4 sm:$0xff]   ;;  %v7952_v59 = vld [vmem:[%s10886_s1 + $0xe48] ss:$16 sps:$4 sm:$0xff]  }
 0x1ea   :  { %v7949_v58 = vld [vmem:[%s10886_s1 + $0x1240] ss:$16 sps:$4 sm:$0xff]   ;;  %v7960_v62 = vld [vmem:[%s10886_s1 + $0xe6c] ss:$16 sps:$4 sm:$0xff]   ;;  %v7958_v2 = vld [vmem:[%s10886_s1 + $0xe68] ss:$16 sps:$4 sm:$0xff]  }
 0x1eb   :  { %5005 = vmatpush1.bf16.msra.mxu1 %v7898_v15  ;;  %v10190_v0 = vld [vmem:[%s10885_s0 + $0x4c] ss:$80 sps:$4 sm:$0xff]   ;;  %v7955_v32 = vld [vmem:[%s10886_s1 + $0x1260] ss:$16 sps:$4 sm:$0xff]   ;;  %v7963_v6 = vld [vmem:[%s10886_s1 + $0x1284] ss:$16 sps:$4 sm:$0xff]  }
 0x1ec   :  { %4581 = vmatpush1.bf16.msra.mxu0 %v7895_v13  ;;  %5006 = vmatprep.subr.bf16.mxu1 %v7906_v20  ;;  %v7961_v37 = vld [vmem:[%s10886_s1 + $0x1280] ss:$16 sps:$4 sm:$0xff]   ;;  %v7964_v7 = vld [vmem:[%s10886_s1 + $0xe88] ss:$16 sps:$4 sm:$0xff]   ;;  %v7969_v8 = vld [vmem:[%s10886_s1 + $0x12a4] ss:$16 sps:$4 sm:$0xff]  }
 0x1ed   :  { %4582 = vmatprep.subr.bf16.mxu0 %v7903_v18  ;;  %v7967_v9 = vld [vmem:[%s10886_s1 + $0x12a0] ss:$16 sps:$4 sm:$0xff]   ;;  %v7970_v10 = vld [vmem:[%s10886_s1 + $0xea8] ss:$16 sps:$4 sm:$0xff]   ;;  %v7975_v11 = vld [vmem:[%s10886_s1 + $0x12c4] ss:$16 sps:$4 sm:$0xff]  }
 0x1ee   :  { %v7978_v12 = vld [vmem:[%s10886_s1 + $0xecc] ss:$16 sps:$4 sm:$0xff]   ;;  %v7973_v13 = vld [vmem:[%s10886_s1 + $0x12c0] ss:$16 sps:$4 sm:$0xff]   ;;  %v7976_v15 = vld [vmem:[%s10886_s1 + $0xec8] ss:$16 sps:$4 sm:$0xff]  }
 0x1ef   :  { %5007 = vmatpush1.bf16.msra.mxu1 %v7904_v22  ;;  %v7981_v18 = vld [vmem:[%s10886_s1 + $0x12e4] ss:$16 sps:$4 sm:$0xff]   ;;  %v7984_v20 = vld [vmem:[%s10886_s1 + $0xeec] ss:$16 sps:$4 sm:$0xff]   ;;  %v7982_v22 = vld [vmem:[%s10886_s1 + $0xee8] ss:$16 sps:$4 sm:$0xff]  }
 0x1f0   :  { %4583 = vmatpush1.bf16.msra.mxu0 %v7901_v21  ;;  %5008 = vmatprep.subr.bf16.mxu1 %v7912_v26  ;;  %v7979_v21 = vld [vmem:[%s10886_s1 + $0x12e0] ss:$16 sps:$4 sm:$0xff]   ;;  %v7990_v26 = vld [vmem:[%s10886_s1 + $0xf0c] ss:$16 sps:$4 sm:$0xff]  }
 0x1f1   :  { %4584 = vmatprep.subr.bf16.mxu0 %v7909_v4  ;;  %v7987_v4 = vld [vmem:[%s10886_s1 + $0x1304] ss:$16 sps:$4 sm:$0xff]  }
 0x1f3   :  { %5009 = vmatpush1.bf16.msra.mxu1 %v7910_v34  ;;  %v7988_v34 = vld [vmem:[%s10886_s1 + $0xf08] ss:$16 sps:$4 sm:$0xff]  }
 0x1f4   :  { %4585 = vmatpush1.bf16.msra.mxu0 %v7907_v29  ;;  %5010 = vmatprep.subr.bf16.mxu1 %v7918_v51  ;;  %v7985_v29 = vld [vmem:[%s10886_s1 + $0x1300] ss:$16 sps:$4 sm:$0xff]   ;;  %v7996_v51 = vld [vmem:[%s10886_s1 + $0xf2c] ss:$16 sps:$4 sm:$0xff]  }
 0x1f5   :  { %4586 = vmatprep.subr.bf16.mxu0 %v7915_v36  ;;  %v7993_v36 = vld [vmem:[%s10886_s1 + $0x1324] ss:$16 sps:$4 sm:$0xff]  }
 0x1f7   :  { %5011 = vmatpush1.bf16.msra.mxu1 %v7916_v41  ;;  %v7994_v41 = vld [vmem:[%s10886_s1 + $0xf28] ss:$16 sps:$4 sm:$0xff]  }
 0x1f8   :  { %4587 = vmatpush1.bf16.msra.mxu0 %v7913_v38  ;;  %5012 = vmatprep.subr.bf16.mxu1 %v7926_v43  ;;  %v7991_v38 = vld [vmem:[%s10886_s1 + $0x1320] ss:$16 sps:$4 sm:$0xff]   ;;  %v8002_v43 = vld [vmem:[%s10886_s1 + $0xf4c] ss:$16 sps:$4 sm:$0xff]  }
 0x1f9   :  { %4588 = vmatprep.subr.bf16.mxu0 %v7923_v42  ;;  %v7999_v42 = vld [vmem:[%s10886_s1 + $0x1344] ss:$16 sps:$4 sm:$0xff]  }
 0x1fb   :  { %5013 = vmatpush1.bf16.msra.mxu1 %v7924_v35  ;;  %v8000_v35 = vld [vmem:[%s10886_s1 + $0xf48] ss:$16 sps:$4 sm:$0xff]  }
 0x1fc   :  { %4589 = vmatpush1.bf16.msra.mxu0 %v7921_v44  ;;  %5014 = vmatprep.subr.bf16.mxu1 %v7933_v45  ;;  %v7997_v44 = vld [vmem:[%s10886_s1 + $0x1340] ss:$16 sps:$4 sm:$0xff]   ;;  %v8008_v45 = vld [vmem:[%s10886_s1 + $0xf6c] ss:$16 sps:$4 sm:$0xff]  }
 0x1fd   :  { %4590 = vmatprep.subr.bf16.mxu0 %v7930_v14  ;;  %v8005_v14 = vld [vmem:[%s10886_s1 + $0x1364] ss:$16 sps:$4 sm:$0xff]  }
 0x1ff   :  { %5015 = vmatpush1.bf16.msra.mxu1 %v7931_v47  ;;  %v8006_v47 = vld [vmem:[%s10886_s1 + $0xf68] ss:$16 sps:$4 sm:$0xff]  }
 0x200   :  { %4591 = vmatpush1.bf16.msra.mxu0 %v7928_v40  ;;  %5037 = vmatprep.subr.bf16.mxu1 %v7942_v48  ;;  %v8003_v40 = vld [vmem:[%s10886_s1 + $0x1360] ss:$16 sps:$4 sm:$0xff]   ;;  %v8014_v48 = vld [vmem:[%s10886_s1 + $0xf8c] ss:$16 sps:$4 sm:$0xff]  }
 0x201   :  { %4613 = vmatprep.subr.bf16.mxu0 %v7939_v19  ;;  %v8011_v19 = vld [vmem:[%s10886_s1 + $0x1384] ss:$16 sps:$4 sm:$0xff]  }
 0x202   :  { %5017 = vmatmul.mubr.bf16.vlgmr.msra.gmra.mrb[8].mxu1 %v9673_v23  ;;  %v7954_v23 = vld [vmem:[%s10886_s1 + $0xe4c] ss:$16 sps:$4 sm:$0xff]  }
 0x203   :  { %4593 = vmatmul.mubr.bf16.vlgmr.msra.gmra.mrb[0].mxu0 %v10135_v49  ;;  %5038 = vmatpush1.bf16.msra.mxu1 %v7940_v52  ;;  %v8012_v52 = vld [vmem:[%s10886_s1 + $0xf88] ss:$16 sps:$4 sm:$0xff]  }
 0x204   :  { %4614 = vmatpush1.bf16.msra.mxu0 %v7937_v50  ;;  %5039 = vmatprep.subr.bf16.mxu1 %v7948_v25  ;;  %v8009_v50 = vld [vmem:[%s10886_s1 + $0x1380] ss:$16 sps:$4 sm:$0xff]   ;;  %v8020_v25 = vld [vmem:[%s10886_s1 + $0xfac] ss:$16 sps:$4 sm:$0xff]  }
 0x205   :  { %4615 = vmatprep.subr.bf16.mxu0 %v7945_v53  ;;  %4602 = vmatprep.mubr.bf16.mxu0 %v10152_v54  ;;  %v8017_v53 = vld [vmem:[%s10886_s1 + $0x13a4] ss:$16 sps:$4 sm:$0xff]  }
 0x206   :  { %5026 = vmatprep.mubr.bf16.mxu1 %v9696_v3  ;;  %v7957_v3 = vld [vmem:[%s10886_s1 + $0x1264] ss:$16 sps:$4 sm:$0xff]  }
 0x207   :  { %5040 = vmatpush1.bf16.msra.mxu1 %v7946_v28  ;;  %v8018_v28 = vld [vmem:[%s10886_s1 + $0xfa8] ss:$16 sps:$4 sm:$0xff]  }
 0x208   :  { %4616 = vmatpush1.bf16.msra.mxu0 %v7943_v55  ;;  %5041 = vmatprep.subr.bf16.mxu1 %v7954_v23  ;;  %v8015_v55 = vld [vmem:[%s10886_s1 + $0x13a0] ss:$16 sps:$4 sm:$0xff]   ;;  %v8029_v23 = vld [vmem:[%s10886_s1 + $0xfcc] ss:$16 sps:$4 sm:$0xff]  }
 0x209   :  { %4617 = vmatprep.subr.bf16.mxu0 %v7951_v56  ;;  %v8026_v56 = vld [vmem:[%s10886_s1 + $0x13c4] ss:$16 sps:$4 sm:$0xff]  }
 0x20a   :  { %5027 = vmatmul.mubr.bf16.gmra.mrb[12].mxu1 %v9717_v39  ;;  %v7966_v39 = vld [vmem:[%s10886_s1 + $0xe8c] ss:$16 sps:$4 sm:$0xff]  }
 0x20b   :  { %4603 = vmatmul.mubr.bf16.gmra.mrb[4].mxu0 %v10173_v57  ;;  %5042 = vmatpush1.bf16.msra.mxu1 %v7952_v59  ;;  %v8027_v59 = vld [vmem:[%s10886_s1 + $0xfc8] ss:$16 sps:$4 sm:$0xff]  }
 0x20c   :  { %4618 = vmatpush1.bf16.msra.mxu0 %v7949_v58  ;;  %5043 = vmatprep.subr.bf16.mxu1 %v7960_v62  ;;  %v8024_v58 = vld [vmem:[%s10886_s1 + $0x13c0] ss:$16 sps:$4 sm:$0xff]   ;;  %v8035_v62 = vld [vmem:[%s10886_s1 + $0xfec] ss:$16 sps:$4 sm:$0xff]  }
 0x20d   :  { %4619 = vmatprep.subr.bf16.mxu0 %v7957_v3  ;;  %4645 = vmatprep.mubr.bf16.mxu0 %v10190_v0  ;;  %v8032_v3 = vld [vmem:[%s10886_s1 + $0x13e4] ss:$16 sps:$4 sm:$0xff]  }
 0x20e   :  { %5069 = vmatprep.mubr.bf16.mxu1 %v9738_v16  ;;  %v7972_v16 = vld [vmem:[%s10886_s1 + $0xeac] ss:$16 sps:$4 sm:$0xff]  }
 0x20f   :  { %5044 = vmatpush1.bf16.msra.mxu1 %v7958_v2  ;;  %v8033_v2 = vld [vmem:[%s10886_s1 + $0xfe8] ss:$16 sps:$4 sm:$0xff]  }
 0x210   :  { %4620 = vmatpush1.bf16.msra.mxu0 %v7955_v32  ;;  %5045 = vmatprep.subr.bf16.mxu1 %v7966_v39  ;;  %v8030_v32 = vld [vmem:[%s10886_s1 + $0x13e0] ss:$16 sps:$4 sm:$0xff]   ;;  %v10352_v39 = vld [vmem:[%s10885_s0 + $0x48] ss:$80 sps:$4 sm:$0xff]  }
 0x211   :  { %4621 = vmatprep.subr.bf16.mxu0 %v7963_v6  ;;  %v8041_v6 = vld [vmem:[%s10886_s1 + $0x100c] ss:$16 sps:$4 sm:$0xff]  }
 0x213   :  { %5046 = vmatpush1.bf16.msra.mxu1 %v7964_v7  ;;  %v10360_v7 = vld [vmem:[%s10885_s0 + $0xec] ss:$80 sps:$4 sm:$0xff]  }
 0x214   :  { %4622 = vmatpush1.bf16.msra.mxu0 %v7961_v37  ;;  %5047 = vmatprep.subr.bf16.mxu1 %v7972_v16  ;;  %v8039_v37 = vld [vmem:[%s10886_s1 + $0x1008] ss:$16 sps:$4 sm:$0xff]  }
 0x215   :  { %4623 = vmatprep.subr.bf16.mxu0 %v7969_v8  ;;  %v8044_v8 = vld [vmem:[%s10886_s1 + $0x102c] ss:$16 sps:$4 sm:$0xff]   ;;  %v8042_v16 = vld [vmem:[%s10886_s1 + $0x1028] ss:$16 sps:$4 sm:$0xff]  }
 0x217   :  { %5048 = vmatpush1.bf16.msra.mxu1 %v7970_v10  ;;  %v10378_v10 = vld [vmem:[%s10885_s0 + $0xe8] ss:$80 sps:$4 sm:$0xff]  }
 0x218   :  { %4624 = vmatpush1.bf16.msra.mxu0 %v7967_v9  ;;  %5049 = vmatprep.subr.bf16.mxu1 %v7978_v12  ;;  %v8050_v9 = vld [vmem:[%s10886_s1 + $0x104c] ss:$16 sps:$4 sm:$0xff]  }
 0x219   :  { %4625 = vmatprep.subr.bf16.mxu0 %v7975_v11  ;;  %v8053_v11 = vld [vmem:[%s10886_s1 + $0x106c] ss:$16 sps:$4 sm:$0xff]  }
 0x21a   :  { %v8140_v12 = vld [vmem:[%s10888_s3 + $0x4] ss:$8 sps:$4 sm:$0xff]  }
 0x21b   :  { %5050 = vmatpush1.bf16.msra.mxu1 %v7976_v15  ;;  %v8143_v15 = vld [vmem:[%s10888_s3 + $0x14] ss:$8 sps:$4 sm:$0xff]  }
 0x21c   :  { %4626 = vmatpush1.bf16.msra.mxu0 %v7973_v13  ;;  %5051 = vmatprep.subr.bf16.mxu1 %v7984_v20  ;;  %v8051_v13 = vld [vmem:[%s10886_s1 + $0x1068] ss:$16 sps:$4 sm:$0xff]  }
 0x21d   :  { %4627 = vmatprep.subr.bf16.mxu0 %v7981_v18  ;;  %v8141_v18 = vld [vmem:[%s10888_s3 + $0x10] ss:$8 sps:$4 sm:$0xff]  }
 0x21e   :  { %v8054_v20 = vld [vmem:[%s10886_s1 + $0x1088] ss:$16 sps:$4 sm:$0xff]  }
 0x21f   :  { %5052 = vmatpush1.bf16.msra.mxu1 %v7982_v22  ;;  %v8144_v22 = vld [vmem:[%s10888_s3 + $0x20] ss:$8 sps:$4 sm:$0xff]  }
 0x220   :  { %4628 = vmatpush1.bf16.msra.mxu0 %v7979_v21  ;;  %5053 = vmatprep.subr.bf16.mxu1 %v7990_v26  ;;  %v8059_v21 = vld [vmem:[%s10886_s1 + $0x10ac] ss:$16 sps:$4 sm:$0xff]   ;;  %v8057_v26 = vld [vmem:[%s10886_s1 + $0x10a8] ss:$16 sps:$4 sm:$0xff]  }
 0x221   :  { %4629 = vmatprep.subr.bf16.mxu0 %v7987_v4  ;;  %v8149_v4 = vld [vmem:[%s10888_s3 + $0x34] ss:$8 sps:$4 sm:$0xff]  }
 0x223   :  { %5054 = vmatpush1.bf16.msra.mxu1 %v7988_v34  ;;  %v8147_v34 = vld [vmem:[%s10888_s3 + $0x30] ss:$8 sps:$4 sm:$0xff]  }
 0x224   :  { %4630 = vmatpush1.bf16.msra.mxu0 %v7985_v29  ;;  %5055 = vmatprep.subr.bf16.mxu1 %v7996_v51  ;;  %v8062_v29 = vld [vmem:[%s10886_s1 + $0x10cc] ss:$16 sps:$4 sm:$0xff]   ;;  %v8060_v51 = vld [vmem:[%s10886_s1 + $0x10c8] ss:$16 sps:$4 sm:$0xff]  }
 0x225   :  { %4631 = vmatprep.subr.bf16.mxu0 %v7993_v36  ;;  %v8152_v36 = vld [vmem:[%s10888_s3 + $0x44] ss:$8 sps:$4 sm:$0xff]  }
 0x227   :  { %5056 = vmatpush1.bf16.msra.mxu1 %v7994_v41  ;;  %v8150_v41 = vld [vmem:[%s10888_s3 + $0x40] ss:$8 sps:$4 sm:$0xff]  }
 0x228   :  { %4632 = vmatpush1.bf16.msra.mxu0 %v7991_v38  ;;  %5057 = vmatprep.subr.bf16.mxu1 %v8002_v43  ;;  %v8065_v38 = vld [vmem:[%s10886_s1 + $0x10ec] ss:$16 sps:$4 sm:$0xff]   ;;  %v8063_v43 = vld [vmem:[%s10886_s1 + $0x10e8] ss:$16 sps:$4 sm:$0xff]  }
 0x229   :  { %4633 = vmatprep.subr.bf16.mxu0 %v7999_v42  ;;  %v8155_v42 = vld [vmem:[%s10888_s3 + $0x54] ss:$8 sps:$4 sm:$0xff]  }
 0x22b   :  { %5058 = vmatpush1.bf16.msra.mxu1 %v8000_v35  ;;  %v8153_v35 = vld [vmem:[%s10888_s3 + $0x50] ss:$8 sps:$4 sm:$0xff]  }
 0x22c   :  { %4634 = vmatpush1.bf16.msra.mxu0 %v7997_v44  ;;  %5059 = vmatprep.subr.bf16.mxu1 %v8008_v45  ;;  %v8068_v44 = vld [vmem:[%s10886_s1 + $0x110c] ss:$16 sps:$4 sm:$0xff]   ;;  %v8066_v45 = vld [vmem:[%s10886_s1 + $0x1108] ss:$16 sps:$4 sm:$0xff]  }
 0x22d   :  { %4635 = vmatprep.subr.bf16.mxu0 %v8005_v14  ;;  %v8158_v14 = vld [vmem:[%s10888_s3 + $0x64] ss:$8 sps:$4 sm:$0xff]  }
 0x22f   :  { %5060 = vmatpush1.bf16.msra.mxu1 %v8006_v47  ;;  %v8156_v47 = vld [vmem:[%s10888_s3 + $0x60] ss:$8 sps:$4 sm:$0xff]  }
 0x230   :  { %4636 = vmatpush1.bf16.msra.mxu0 %v8003_v40  ;;  %5061 = vmatprep.subr.bf16.mxu1 %v8014_v48  ;;  %v8071_v40 = vld [vmem:[%s10886_s1 + $0x112c] ss:$16 sps:$4 sm:$0xff]   ;;  %v8069_v48 = vld [vmem:[%s10886_s1 + $0x1128] ss:$16 sps:$4 sm:$0xff]  }
 0x231   :  { %4637 = vmatprep.subr.bf16.mxu0 %v8011_v19  ;;  %v8161_v19 = vld [vmem:[%s10888_s3 + $0x74] ss:$8 sps:$4 sm:$0xff]  }
 0x233   :  { %5062 = vmatpush1.bf16.msra.mxu1 %v8012_v52  ;;  %v8159_v52 = vld [vmem:[%s10888_s3 + $0x70] ss:$8 sps:$4 sm:$0xff]  }
 0x234   :  { %4638 = vmatpush1.bf16.msra.mxu0 %v8009_v50  ;;  %5063 = vmatprep.subr.bf16.mxu1 %v8020_v25  ;;  %v8074_v50 = vld [vmem:[%s10886_s1 + $0x114c] ss:$16 sps:$4 sm:$0xff]   ;;  %v8072_v25 = vld [vmem:[%s10886_s1 + $0x1148] ss:$16 sps:$4 sm:$0xff]  }
 0x235   :  { %4639 = vmatprep.subr.bf16.mxu0 %v8017_v53  ;;  %v8164_v53 = vld [vmem:[%s10888_s3 + $0x84] ss:$8 sps:$4 sm:$0xff]  }
 0x237   :  { %5064 = vmatpush1.bf16.msra.mxu1 %v8018_v28  ;;  %v8162_v28 = vld [vmem:[%s10888_s3 + $0x80] ss:$8 sps:$4 sm:$0xff]  }
 0x238   :  { %4640 = vmatpush1.bf16.msra.mxu0 %v8015_v55  ;;  %5065 = vmatprep.subr.bf16.mxu1 %v8029_v23  ;;  %v8077_v55 = vld [vmem:[%s10886_s1 + $0x116c] ss:$16 sps:$4 sm:$0xff]   ;;  %v8075_v23 = vld [vmem:[%s10886_s1 + $0x1168] ss:$16 sps:$4 sm:$0xff]  }
 0x239   :  { %4641 = vmatprep.subr.bf16.mxu0 %v8026_v56  ;;  %v8167_v56 = vld [vmem:[%s10888_s3 + $0x94] ss:$8 sps:$4 sm:$0xff]  }
 0x23b   :  { %5066 = vmatpush1.bf16.msra.mxu1 %v8027_v59  ;;  %v8165_v59 = vld [vmem:[%s10888_s3 + $0x90] ss:$8 sps:$4 sm:$0xff]  }
 0x23c   :  { %4642 = vmatpush1.bf16.msra.mxu0 %v8024_v58  ;;  %5067 = vmatprep.subr.bf16.mxu1 %v8035_v62  ;;  %v8080_v58 = vld [vmem:[%s10886_s1 + $0x118c] ss:$16 sps:$4 sm:$0xff]   ;;  %v8078_v62 = vld [vmem:[%s10886_s1 + $0x1188] ss:$16 sps:$4 sm:$0xff]  }
 0x23d   :  { %4643 = vmatprep.subr.bf16.mxu0 %v8032_v3  ;;  %v8170_v3 = vld [vmem:[%s10888_s3 + $0xa4] ss:$8 sps:$4 sm:$0xff]  }
 0x23f   :  { %5068 = vmatpush1.bf16.msra.mxu1 %v8033_v2  ;;  %v8168_v2 = vld [vmem:[%s10888_s3 + $0xa0] ss:$8 sps:$4 sm:$0xff]  }
 0x240   :  { %4644 = vmatpush1.bf16.msra.mxu0 %v8030_v32  ;;  %5090 = vmatprep.subr.bf16.mxu1 %v8041_v6  ;;  %v8083_v32 = vld [vmem:[%s10886_s1 + $0x11ac] ss:$16 sps:$4 sm:$0xff]  }
 0x241   :  { %5616 = vmatprep.subr.bf16.mxu0 %v8140_v12  ;;  %v8173_v6 = vld [vmem:[%s10888_s3 + $0xb4] ss:$8 sps:$4 sm:$0xff]  }
 0x242   :  { %5070 = vmatmul.mubr.bf16.vlgmr.msra.gmra.mrb[8].mxu1 %v9901_v17  ;;  %v8048_v17 = vld [vmem:[%s10886_s1 + $0x1048] ss:$16 sps:$4 sm:$0xff]   ;;  %v8179_v12 = vld [vmem:[%s10888_s3 + $0xd4] ss:$8 sps:$4 sm:$0xff]  }
 0x243   :  { %4646 = vmatmul.mubr.bf16.vlgmr.msra.gmra.mrb[0].mxu0 %v10352_v39  ;;  %5091 = vmatpush1.bf16.msra.mxu1 %v8039_v37  ;;  %v8081_v37 = vld [vmem:[%s10886_s1 + $0x11a8] ss:$16 sps:$4 sm:$0xff]  }
 0x244   :  { %4655 = vmatprep.mubr.bf16.mxu0 %v10360_v7  ;;  %5092 = vmatprep.subr.bf16.mxu1 %v8044_v8  ;;  %v8086_v8 = vld [vmem:[%s10886_s1 + $0x11cc] ss:$16 sps:$4 sm:$0xff]  }
 0x245   :  { %5079 = vmatprep.mubr.bf16.mxu1 %v9930_v30  ;;  %v8138_v30 = vld [vmem:[%s10888_s3] ss:$8 sps:$4 sm:$0xff]  }
 0x246   :  { %5617 = vmatpush1.bf16.msra.mxu0 %v8138_v30  ;;  %v8174_v30 = vld [vmem:[%s10888_s3 + $0xc0] ss:$8 sps:$4 sm:$0xff]  }
 0x247   :  { %5093 = vmatpush1.bf16.msra.mxu1 %v8042_v16  ;;  %5618 = vmatprep.subr.bf16.mxu0 %v8143_v15  ;;  %v8171_v16 = vld [vmem:[%s10888_s3 + $0xb0] ss:$8 sps:$4 sm:$0xff]   ;;  %v8092_v15 = vld [vmem:[%s10886_s1 + $0x120c] ss:$16 sps:$4 sm:$0xff]  }
 0x248   :  { %5094 = vmatprep.subr.bf16.mxu1 %v8050_v9  ;;  %v8176_v9 = vld [vmem:[%s10888_s3 + $0xc4] ss:$8 sps:$4 sm:$0xff]  }
 0x24a   :  { %5080 = vmatmul.mubr.bf16.gmra.mrb[12].mxu1 %v9945_v31  ;;  %v8056_v31 = vld [vmem:[%s10886_s1 + $0x108c] ss:$16 sps:$4 sm:$0xff]   ;;  %5619 = vmatpush1.bf16.msra.mxu0 %v8141_v18  ;;  %v8090_v18 = vld [vmem:[%s10886_s1 + $0x1208] ss:$16 sps:$4 sm:$0xff]  }
 0x24b   :  { %4656 = vmatmul.mubr.bf16.gmra.mrb[4].mxu0 %v10378_v10  ;;  %5095 = vmatpush1.bf16.msra.mxu1 %v8048_v17  ;;  %v8084_v17 = vld [vmem:[%s10886_s1 + $0x11c8] ss:$16 sps:$4 sm:$0xff]  }
 0x24c   :  { %5122 = vmatprep.mubr.bf16.mxu1 %v9972_v46  ;;  %5096 = vmatprep.subr.bf16.mxu1 %v8053_v11  ;;  %v8146_v46 = vld [vmem:[%s10888_s3 + $0x24] ss:$8 sps:$4 sm:$0xff]  }
 0x24d   :  { %5620 = vmatprep.subr.bf16.mxu0 %v8146_v46  ;;  %v8089_v11 = vld [vmem:[%s10886_s1 + $0x11ec] ss:$16 sps:$4 sm:$0xff]  }
 0x24e   :  { %5621 = vmatpush1.bf16.msra.mxu0 %v8144_v22  ;;  %v8095_v46 = vld [vmem:[%s10886_s1 + $0x122c] ss:$16 sps:$4 sm:$0xff]   ;;  %v8096_v22 = vld [vmem:[%s10886_s1 + $0x1248] ss:$16 sps:$4 sm:$0xff]  }
 0x24f   :  { %5097 = vmatpush1.bf16.msra.mxu1 %v8051_v13  ;;  %5622 = vmatprep.subr.bf16.mxu0 %v8149_v4  ;;  %v8087_v13 = vld [vmem:[%s10886_s1 + $0x11e8] ss:$16 sps:$4 sm:$0xff]   ;;  %v8104_v4 = vld [vmem:[%s10886_s1 + $0x128c] ss:$16 sps:$4 sm:$0xff]  }
 0x250   :  { %5098 = vmatprep.subr.bf16.mxu1 %v8056_v31  ;;  %v8177_v31 = vld [vmem:[%s10888_s3 + $0xd0] ss:$8 sps:$4 sm:$0xff]  }
 0x252   :  { %5623 = vmatpush1.bf16.msra.mxu0 %v8147_v34  ;;  %v8182_v34 = vld [vmem:[%s10888_s3 + $0xe4] ss:$8 sps:$4 sm:$0xff]  }
 0x253   :  { %5099 = vmatpush1.bf16.msra.mxu1 %v8054_v20  ;;  %5624 = vmatprep.subr.bf16.mxu0 %v8152_v36  ;;  %v8093_v20 = vld [vmem:[%s10886_s1 + $0x1228] ss:$16 sps:$4 sm:$0xff]  }
 0x254   :  { %5100 = vmatprep.subr.bf16.mxu1 %v8059_v21  ;;  %v8098_v21 = vld [vmem:[%s10886_s1 + $0x124c] ss:$16 sps:$4 sm:$0xff]   ;;  %v8108_v36 = vld [vmem:[%s10886_s1 + $0x12c8] ss:$16 sps:$4 sm:$0xff]  }
 0x256   :  { %5625 = vmatpush1.bf16.msra.mxu0 %v8150_v41  ;;  %v8185_v41 = vld [vmem:[%s10888_s3 + $0xf4] ss:$8 sps:$4 sm:$0xff]  }
 0x257   :  { %5101 = vmatpush1.bf16.msra.mxu1 %v8057_v26  ;;  %5626 = vmatprep.subr.bf16.mxu0 %v8155_v42  ;;  %v8102_v26 = vld [vmem:[%s10886_s1 + $0x1288] ss:$16 sps:$4 sm:$0xff]  }
 0x258   :  { %5102 = vmatprep.subr.bf16.mxu1 %v8062_v29  ;;  %v8110_v29 = vld [vmem:[%s10886_s1 + $0x12cc] ss:$16 sps:$4 sm:$0xff]   ;;  %v8111_v42 = vld [vmem:[%s10886_s1 + $0x12e8] ss:$16 sps:$4 sm:$0xff]  }
 0x25a   :  { %5627 = vmatpush1.bf16.msra.mxu0 %v8153_v35  ;;  %v8114_v35 = vld [vmem:[%s10886_s1 + $0x1308] ss:$16 sps:$4 sm:$0xff]  }
 0x25b   :  { %5103 = vmatpush1.bf16.msra.mxu1 %v8060_v51  ;;  %5628 = vmatprep.subr.bf16.mxu0 %v8158_v14  ;;  %v8180_v51 = vld [vmem:[%s10888_s3 + $0xe0] ss:$8 sps:$4 sm:$0xff]   ;;  %v8119_v14 = vld [vmem:[%s10886_s1 + $0x132c] ss:$16 sps:$4 sm:$0xff]  }
 0x25c   :  { %5104 = vmatprep.subr.bf16.mxu1 %v8065_v38  ;;  %v8113_v38 = vld [vmem:[%s10886_s1 + $0x12ec] ss:$16 sps:$4 sm:$0xff]  }
 0x25e   :  { %5629 = vmatpush1.bf16.msra.mxu0 %v8156_v47  ;;  %v8120_v47 = vld [vmem:[%s10886_s1 + $0x1348] ss:$16 sps:$4 sm:$0xff]  }
 0x25f   :  { %5105 = vmatpush1.bf16.msra.mxu1 %v8063_v43  ;;  %5630 = vmatprep.subr.bf16.mxu0 %v8161_v19  ;;  %v8183_v43 = vld [vmem:[%s10888_s3 + $0xf0] ss:$8 sps:$4 sm:$0xff]   ;;  %v8125_v19 = vld [vmem:[%s10886_s1 + $0x136c] ss:$16 sps:$4 sm:$0xff]  }
 0x260   :  { %5106 = vmatprep.subr.bf16.mxu1 %v8068_v44  ;;  %v8116_v44 = vld [vmem:[%s10886_s1 + $0x130c] ss:$16 sps:$4 sm:$0xff]  }
 0x262   :  { %5631 = vmatpush1.bf16.msra.mxu0 %v8159_v52  ;;  %v8128_v52 = vld [vmem:[%s10886_s1 + $0x138c] ss:$16 sps:$4 sm:$0xff]  }
 0x263   :  { %5107 = vmatpush1.bf16.msra.mxu1 %v8066_v45  ;;  %5632 = vmatprep.subr.bf16.mxu0 %v8164_v53  ;;  %v8117_v45 = vld [vmem:[%s10886_s1 + $0x1328] ss:$16 sps:$4 sm:$0xff]  }
 0x264   :  { %5108 = vmatprep.subr.bf16.mxu1 %v8071_v40  ;;  %v8122_v40 = vld [vmem:[%s10886_s1 + $0x134c] ss:$16 sps:$4 sm:$0xff]   ;;  %v8126_v53 = vld [vmem:[%s10886_s1 + $0x1388] ss:$16 sps:$4 sm:$0xff]  }
 0x266   :  { %5633 = vmatpush1.bf16.msra.mxu0 %v8162_v28  ;;  %v8134_v28 = vld [vmem:[%s10886_s1 + $0x13cc] ss:$16 sps:$4 sm:$0xff]  }
 0x267   :  { %5109 = vmatpush1.bf16.msra.mxu1 %v8069_v48  ;;  %5634 = vmatprep.subr.bf16.mxu0 %v8167_v56  ;;  %v8188_v48 = vld [vmem:[%s10888_s3 + $0x104] ss:$8 sps:$4 sm:$0xff]   ;;  %v8132_v56 = vld [vmem:[%s10886_s1 + $0x13c8] ss:$16 sps:$4 sm:$0xff]  }
 0x268   :  { %5110 = vmatprep.subr.bf16.mxu1 %v8074_v50  ;;  %v8123_v50 = vld [vmem:[%s10886_s1 + $0x1368] ss:$16 sps:$4 sm:$0xff]  }
 0x26a   :  { %5635 = vmatpush1.bf16.msra.mxu0 %v8165_v59  ;;  %v716_v59 = vlaneseq }
 0x26b   :  { %5111 = vmatpush1.bf16.msra.mxu1 %v8072_v25  ;;  %5636 = vmatprep.subr.bf16.mxu0 %v8170_v3  ;;  %v8131_v25 = vld [vmem:[%s10886_s1 + $0x13ac] ss:$16 sps:$4 sm:$0xff]  }
 0x26c   :  { %5112 = vmatprep.subr.bf16.mxu1 %v8077_v55  ;;  %v8129_v55 = vld [vmem:[%s10886_s1 + $0x13a8] ss:$16 sps:$4 sm:$0xff]   ;;  %v10667_v3 = vshrl.u32 %v716_v59, 7 }
 0x26e   :  { %5637 = vmatpush1.bf16.msra.mxu0 %v8168_v2  ;;  %v722_v2 = vsub.s32 1, %v10667_v3 }
 0x26f   :  { %5113 = vmatpush1.bf16.msra.mxu1 %v8075_v23  ;;  %5638 = vmatprep.subr.bf16.mxu0 %v8173_v6  ;;  %v8137_v23 = vld [vmem:[%s10886_s1 + $0x13ec] ss:$16 sps:$4 sm:$0xff]  }
 0x270   :  { %5114 = vmatprep.subr.bf16.mxu1 %v8080_v58  ;;  %v8135_v58 = vld [vmem:[%s10886_s1 + $0x13e8] ss:$16 sps:$4 sm:$0xff]  }
 0x272   :  { %5639 = vmatpush1.bf16.msra.mxu0 %v8171_v16 }
 0x273   :  { %5115 = vmatpush1.bf16.msra.mxu1 %v8078_v62  ;;  %5640 = vmatprep.subr.bf16.mxu0 %v8176_v9  ;;  %v718_v62 = vsub.s32 0, %v10667_v3 }
 0x274   :  { %5116 = vmatprep.subr.bf16.mxu1 %v8083_v32  ;;  %v10673_v32 = vld [vmem:[%s10887_s2] sm:$0xf] }
 0x276   :  { %5641 = vmatpush1.bf16.msra.mxu0 %v8174_v30 }
 0x277   :  { %5117 = vmatpush1.bf16.msra.mxu1 %v8081_v37  ;;  %5642 = vmatprep.subr.bf16.mxu0 %v8179_v12 }
 0x278   :  { %5118 = vmatprep.subr.bf16.mxu1 %v8086_v8 }
 0x27a   :  { %5643 = vmatpush1.bf16.msra.mxu0 %v8177_v31 }
 0x27b   :  { %5119 = vmatpush1.bf16.msra.mxu1 %v8084_v17  ;;  %5644 = vmatprep.subr.bf16.mxu0 %v8182_v34 }
 0x27c   :  { %5120 = vmatprep.subr.bf16.mxu1 %v8089_v11 }
 0x27e   :  { %5645 = vmatpush1.bf16.msra.mxu0 %v8180_v51 }
 0x27f   :  { %5121 = vmatpush1.bf16.msra.mxu1 %v8087_v13  ;;  %5646 = vmatprep.subr.bf16.mxu0 %v8185_v41 }
 0x280   :  { %5143 = vmatprep.subr.bf16.mxu1 %v8092_v15 }
 0x282   :  { %5123 = vmatmul.mubr.bf16.vlgmr.msra.gmra.mrb[8].mxu1 %v10135_v49  ;;  %v8101_v49 = vld [vmem:[%s10886_s1 + $0x126c] ss:$16 sps:$4 sm:$0xff]   ;;  %5647 = vmatpush1.bf16.msra.mxu0 %v8183_v43 }
 0x283   :  { %5144 = vmatpush1.bf16.msra.mxu1 %v8090_v18  ;;  %5132 = vmatprep.mubr.bf16.mxu1 %v10152_v54  ;;  %v8099_v54 = vld [vmem:[%s10886_s1 + $0x1268] ss:$16 sps:$4 sm:$0xff]  }
 0x284   :  { %5145 = vmatprep.subr.bf16.mxu1 %v8095_v46  ;;  %5669 = vmatprep.subr.bf16.mxu0 %v8188_v48  ;;  %v8206_v48 = vld [vmem:[%s10888_s3 + $0x164] ss:$8 sps:$4 sm:$0xff]  }
 0x287   :  { %5146 = vmatpush1.bf16.msra.mxu1 %v8093_v20 }
 0x288   :  { %5147 = vmatprep.subr.bf16.mxu1 %v8098_v21 }
 0x28a   :  { %5133 = vmatmul.mubr.bf16.gmra.mrb[12].mxu1 %v10173_v57  ;;  %v8107_v57 = vld [vmem:[%s10886_s1 + $0x12ac] ss:$16 sps:$4 sm:$0xff]  }
 0x28b   :  { %5148 = vmatpush1.bf16.msra.mxu1 %v8096_v22  ;;  %5175 = vmatprep.mubr.bf16.mxu1 %v10190_v0  ;;  %v8105_v0 = vld [vmem:[%s10886_s1 + $0x12a8] ss:$16 sps:$4 sm:$0xff]  }
 0x28c   :  { %5149 = vmatprep.subr.bf16.mxu1 %v8101_v49 }
 0x28f   :  { %5150 = vmatpush1.bf16.msra.mxu1 %v8099_v54 }
 0x290   :  { %5151 = vmatprep.subr.bf16.mxu1 %v8104_v4 }
 0x293   :  { %5152 = vmatpush1.bf16.msra.mxu1 %v8102_v26  ;;  %v8191_v26 = vld [vmem:[%s10888_s3 + $0x114] ss:$8 sps:$4 sm:$0xff]  }
 0x294   :  { %5153 = vmatprep.subr.bf16.mxu1 %v8107_v57 }
 0x297   :  { %5154 = vmatpush1.bf16.msra.mxu1 %v8105_v0 }
 0x298   :  { %5155 = vmatprep.subr.bf16.mxu1 %v8110_v29 }
 0x29b   :  { %5156 = vmatpush1.bf16.msra.mxu1 %v8108_v36 }
 0x29c   :  { %5157 = vmatprep.subr.bf16.mxu1 %v8113_v38  ;;  %v8194_v38 = vld [vmem:[%s10888_s3 + $0x124] ss:$8 sps:$4 sm:$0xff]  }
 0x29f   :  { %5158 = vmatpush1.bf16.msra.mxu1 %v8111_v42 }
 0x2a0   :  { %5159 = vmatprep.subr.bf16.mxu1 %v8116_v44  ;;  %v8192_v44 = vld [vmem:[%s10888_s3 + $0x120] ss:$8 sps:$4 sm:$0xff]  }
 0x2a3   :  { %5160 = vmatpush1.bf16.msra.mxu1 %v8114_v35  ;;  %v8197_v35 = vld [vmem:[%s10888_s3 + $0x134] ss:$8 sps:$4 sm:$0xff]  }
 0x2a4   :  { %5161 = vmatprep.subr.bf16.mxu1 %v8119_v14  ;;  %v8195_v14 = vld [vmem:[%s10888_s3 + $0x130] ss:$8 sps:$4 sm:$0xff]  }
 0x2a7   :  { %5162 = vmatpush1.bf16.msra.mxu1 %v8117_v45  ;;  %v8200_v45 = vld [vmem:[%s10888_s3 + $0x144] ss:$8 sps:$4 sm:$0xff]  }
 0x2a8   :  { %5163 = vmatprep.subr.bf16.mxu1 %v8122_v40  ;;  %v8198_v40 = vld [vmem:[%s10888_s3 + $0x140] ss:$8 sps:$4 sm:$0xff]  }
 0x2ab   :  { %5164 = vmatpush1.bf16.msra.mxu1 %v8120_v47  ;;  %v8203_v47 = vld [vmem:[%s10888_s3 + $0x154] ss:$8 sps:$4 sm:$0xff]  }
 0x2ac   :  { %5165 = vmatprep.subr.bf16.mxu1 %v8125_v19  ;;  %v8201_v19 = vld [vmem:[%s10888_s3 + $0x150] ss:$8 sps:$4 sm:$0xff]  }
 0x2af   :  { %5166 = vmatpush1.bf16.msra.mxu1 %v8123_v50  ;;  %v8204_v50 = vld [vmem:[%s10888_s3 + $0x160] ss:$8 sps:$4 sm:$0xff]  }
 0x2b0   :  { %5167 = vmatprep.subr.bf16.mxu1 %v8128_v52  ;;  %v8209_v52 = vld [vmem:[%s10888_s3 + $0x174] ss:$8 sps:$4 sm:$0xff]  }
 0x2b3   :  { %5168 = vmatpush1.bf16.msra.mxu1 %v8126_v53  ;;  %v8207_v53 = vld [vmem:[%s10888_s3 + $0x170] ss:$8 sps:$4 sm:$0xff]  }
 0x2b4   :  { %5169 = vmatprep.subr.bf16.mxu1 %v8131_v25  ;;  %v8212_v25 = vld [vmem:[%s10888_s3 + $0x184] ss:$8 sps:$4 sm:$0xff]  }
 0x2b7   :  { %5170 = vmatpush1.bf16.msra.mxu1 %v8129_v55  ;;  %v8210_v55 = vld [vmem:[%s10888_s3 + $0x180] ss:$8 sps:$4 sm:$0xff]  }
 0x2b8   :  { %5171 = vmatprep.subr.bf16.mxu1 %v8134_v28  ;;  %v8215_v28 = vld [vmem:[%s10888_s3 + $0x194] ss:$8 sps:$4 sm:$0xff]  }
 0x2bb   :  { %5172 = vmatpush1.bf16.msra.mxu1 %v8132_v56  ;;  %v8213_v56 = vld [vmem:[%s10888_s3 + $0x190] ss:$8 sps:$4 sm:$0xff]  }
 0x2bc   :  { %5173 = vmatprep.subr.bf16.mxu1 %v8137_v23  ;;  %v8218_v23 = vld [vmem:[%s10888_s3 + $0x1a4] ss:$8 sps:$4 sm:$0xff]  }
 0x2bf   :  { %5174 = vmatpush1.bf16.msra.mxu1 %v8135_v58  ;;  %v8216_v58 = vld [vmem:[%s10888_s3 + $0x1a0] ss:$8 sps:$4 sm:$0xff]  }
 0x2c2   :  { %5176 = vmatmul.mubr.bf16.vlgmr.msra.gmra.mrb[8].mxu1 %v10352_v39  ;;  %v719_v39 = vrot.slane %v10673_v32, %v718_v62 }
 0x2c3   :  { %5185 = vmatprep.mubr.bf16.mxu1 %v10360_v7  ;;  %v723_v7 = vrot.slane %v10673_v32, %v722_v2 }
 0x2c4   :  { %v4175_v8 = vadd.f32 %v9339_v63, %v719_v39  ;;  %v4185_v49 = vadd.f32 %v9410_v33, %v719_v39  ;;  %v8189_v33 = vld [vmem:[%s10888_s3 + $0x110] ss:$8 sps:$4 sm:$0xff]  }
 0x2c5   :  { %v4173_v6 = vadd.f32 %v9334_v61, %v723_v7  ;;  %v4177_v17 = vadd.f32 %v9344_v1, %v723_v7  ;;  %v4183_v61 = vadd.f32 %v9405_v27, %v723_v7  ;;  %v8186_v1 = vld [vmem:[%s10888_s3 + $0x100] ss:$8 sps:$4 sm:$0xff]   ;;  %v4187_v57 = vadd.f32 %v9418_v5, %v723_v7  ;;  %v8219_v7 = vld [vmem:[%s10888_s3 + $0x1b0] ss:$8 sps:$4 sm:$0xff]  }
 0x2ca   :  { %5186 = vmatmul.mubr.bf16.gmra.mrb[12].mxu1 %v10378_v10  ;;  %v4171_v10 = vadd.f32 %v9332_v60, %v719_v39  ;;  %v4181_v60 = vadd.f32 %v9400_v24, %v719_v39  ;;  %v8221_v39 = vld [vmem:[%s10888_s3 + $0x1b4] ss:$8 sps:$4 sm:$0xff]  }
 0x316   :  { %v4647_v37 = vpop.f32.mrb[0].mxu0 }
 0x317   :  { %v6940_v16 = vadd.f32 %v4647_v37, %v4171_v10  ;;  %v4649_v9 = vpop.f32.mrb[1].mxu0  ;;  %v8224_v10 = vld [vmem:[%s10888_s3 + $0x1c4] ss:$8 sps:$4 sm:$0xff]   ;;  %v8227_v37 = vld [vmem:[%s10888_s3 + $0x1d4] ss:$8 sps:$4 sm:$0xff]  }
 0x318   :  { %v6942_v11 = vadd.f32 %v4649_v9, %v4173_v6  ;;  %v4651_v30 = vpop.f32.mrb[2].mxu0  ;;  %v8222_v6 = vld [vmem:[%s10888_s3 + $0x1c0] ss:$8 sps:$4 sm:$0xff]  }
 0x319   :  { %v6944_v12 = vadd.f32 %v4651_v30, %v4175_v8  ;;  %v4653_v13 = vpop.f32.mrb[3].mxu0  ;;  %v5196_v31 = vmax.f32 %v6940_v16, 0.0  ;;  %v8225_v8 = vld [vmem:[%s10888_s3 + $0x1d0] ss:$8 sps:$4 sm:$0xff]   ;;  %v8230_v16 = vld [vmem:[%s10888_s3 + $0x1e4] ss:$8 sps:$4 sm:$0xff]  }
 0x31a   :  { %v6946_v15 = vadd.f32 %v4653_v13, %v4177_v17  ;;  %v5197_v46 = vmax.f32 %v6942_v11, 0.0  ;;  %v8228_v9 = vld [vmem:[%s10888_s3 + $0x1e0] ss:$8 sps:$4 sm:$0xff]   ;;  %v8233_v17 = vld [vmem:[%s10888_s3 + $0x1f4] ss:$8 sps:$4 sm:$0xff]   ;;  %v730_v13 = vsub.s32 3, %v10667_v3 }
 0x31b   :  { %v5200_v18 = vmax.f32 %v6944_v12, 0.0  ;;  %v8231_v11 = vld [vmem:[%s10888_s3 + $0x1f0] ss:$8 sps:$4 sm:$0xff]   ;;  %v8234_v30 = vld [vmem:[%s10890_s5 + $0x40] sm:$0xff]   ;;  %v726_v12 = vsub.s32 2, %v10667_v3 }
 0x31c   :  { %v5201_v20 = vmax.f32 %v6946_v15, 0.0 }
 0x31d   :  { %v5212_v21 = vpack.c.bf16 %v5200_v18, %v5196_v31  ;;  %v727_v15 = vrot.slane %v10673_v32, %v726_v12  ;;  %v731_v31 = vrot.slane %v10673_v32, %v730_v13 }
 0x31e   :  { %v5213_v22 = vpack.c.bf16 %v5201_v20, %v5197_v46  ;;  %v4657_v63 = vpop.f32.mrb[4].mxu0 }
 0x31f   :  { %v6948_v54 = vadd.f32 %v4657_v63, %v4181_v60  ;;  %v4659_v4 = vpop.f32.mrb[5].mxu0 }
 0x320   :  { %v6950_v24 = vadd.f32 %v4659_v4, %v4183_v61  ;;  %v4661_v0 = vpop.f32.mrb[6].mxu0  ;;  %5648 = vmatprep.mubr.bf16.mxu0 %v5213_v22 }
 0x321   :  { %v6952_v27 = vadd.f32 %v4661_v0, %v4185_v49  ;;  %v4663_v29 = vpop.f32.mrb[7].mxu0  ;;  %5649 = vmatmul.mubr.bf16.vlgmr.msra.gmra.mrb[8].mxu0 %v5212_v21  ;;  %v5204_v36 = vmax.f32 %v6948_v54, 0.0  ;;  %v8235_v0 = vld [vmem:[%s10890_s5] sm:$0xff]  }
 0x322   :  { %v6954_v34 = vadd.f32 %v4663_v29, %v4187_v57  ;;  %5670 = vmatpush1.bf16.msra.mxu0 %v8186_v1  ;;  %v5205_v5 = vmax.f32 %v6950_v24, 0.0  ;;  %v8236_v29 = vld [vmem:[%s10890_s5 + $0x48] sm:$0xff]  }
 0x323   :  { %v5208_v51 = vmax.f32 %v6952_v27, 0.0  ;;  %5671 = vmatprep.subr.bf16.mxu0 %v8191_v26 }
 0x324   :  { %v5209_v41 = vmax.f32 %v6954_v34, 0.0 }
 0x325   :  { %v5216_v42 = vpack.c.bf16 %v5208_v51, %v5204_v36 }
 0x326   :  { %v5217_v43 = vpack.c.bf16 %v5209_v41, %v5205_v5  ;;  %5672 = vmatpush1.bf16.msra.mxu0 %v8189_v33  ;;  %v8237_v5 = vld [vmem:[%s10890_s5 + $0x8] sm:$0xff]  }
 0x327   :  { %5673 = vmatprep.subr.bf16.mxu0 %v8194_v38 }
 0x328   :  { %5658 = vmatprep.mubr.bf16.mxu0 %v5217_v43  ;;  %v8238_v43 = vld [vmem:[%s10890_s5 + $0x50] sm:$0xff]  }
 0x329   :  { %5659 = vmatmul.mubr.bf16.gmra.mrb[12].mxu0 %v5216_v42 }
 0x32a   :  { %5674 = vmatpush1.bf16.msra.mxu0 %v8192_v44 }
 0x32b   :  { %5675 = vmatprep.subr.bf16.mxu0 %v8197_v35 }
 0x32e   :  { %5676 = vmatpush1.bf16.msra.mxu0 %v8195_v14 }
 0x32f   :  { %5677 = vmatprep.subr.bf16.mxu0 %v8200_v45 }
 0x332   :  { %5678 = vmatpush1.bf16.msra.mxu0 %v8198_v40  ;;  %v8239_v40 = vld [vmem:[%s10890_s5 + $0x10] sm:$0xff]  }
 0x333   :  { %5679 = vmatprep.subr.bf16.mxu0 %v8203_v47  ;;  %v8240_v47 = vld [vmem:[%s10890_s5 + $0x58] sm:$0xff]  }
 0x336   :  { %5680 = vmatpush1.bf16.msra.mxu0 %v8201_v19  ;;  %v8241_v19 = vld [vmem:[%s10890_s5 + $0x18] sm:$0xff]  }
 0x337   :  { %5681 = vmatprep.subr.bf16.mxu0 %v8206_v48  ;;  %v8242_v48 = vld [vmem:[%s10890_s5 + $0x60] sm:$0xff]  }
 0x33a   :  { %5682 = vmatpush1.bf16.msra.mxu0 %v8204_v50  ;;  %v8243_v50 = vld [vmem:[%s10890_s5 + $0x20] sm:$0xff]  }
 0x33b   :  { %5683 = vmatprep.subr.bf16.mxu0 %v8209_v52  ;;  %v8244_v52 = vld [vmem:[%s10890_s5 + $0x68] sm:$0xff]  }
 0x33e   :  { %5684 = vmatpush1.bf16.msra.mxu0 %v8207_v53  ;;  %v8245_v53 = vld [vmem:[%s10890_s5 + $0x28] sm:$0xff]  }
 0x33f   :  { %5685 = vmatprep.subr.bf16.mxu0 %v8212_v25  ;;  %v8246_v25 = vld [vmem:[%s10890_s5 + $0x70] sm:$0xff]  }
 0x342   :  { %5686 = vmatpush1.bf16.msra.mxu0 %v8210_v55  ;;  %v8247_v55 = vld [vmem:[%s10890_s5 + $0x30] sm:$0xff]  }
 0x343   :  { %5687 = vmatprep.subr.bf16.mxu0 %v8215_v28  ;;  %v8248_v28 = vld [vmem:[%s10890_s5 + $0x78] sm:$0xff]  }
 0x346   :  { %5688 = vmatpush1.bf16.msra.mxu0 %v8213_v56  ;;  %v8249_v56 = vld [vmem:[%s10890_s5 + $0x38] sm:$0xff]  }
 0x347   :  { %5689 = vmatprep.subr.bf16.mxu0 %v8218_v23  ;;  %v8250_v23 = vld [vmem:[%s10892_s7] sm:$0xff]  }
 0x348   :  { %6919 = vmatprep.subr.bf16.mxu1 %v8250_v23 }
 0x349   :  { %6920 = vmatpush3.bf16.msra.mxu1 %v8250_v23  ;;  %v6049_v23 = vand.u32 127, %v716_v59 }
 0x34a   :  { %5690 = vmatpush1.bf16.msra.mxu0 %v8216_v58  ;;  %v8251_v58 = vld [vmem:[%s10892_s7 + $0x8] sm:$0xff]  }
 0x34b   :  { %5691 = vmatprep.subr.bf16.mxu0 %v8221_v39  ;;  %6921 = vmatprep.subr.bf16.mxu1 %v8251_v58  ;;  %v8252_v39 = vld [vmem:[%s10892_s7 + $0x10] sm:$0xff]   ;;  %vm6050_vm0 = vcmp.lt.s32.totalorder %v6049_v23, 50 }
 0x34d   :  { %6922 = vmatpush3.bf16.msra.mxu1 %v8251_v58 }
 0x34e   :  { %5692 = vmatpush1.bf16.msra.mxu0 %v8219_v7  ;;  %6923 = vmatprep.subr.bf16.mxu1 %v8252_v39  ;;  %v5284_v7 = vld [vmem:[%s10889_s4] sm:$0x3] }
 0x34f   :  { %5693 = vmatprep.subr.bf16.mxu0 %v8224_v10  ;;  %v5289_v10 = vrot.slane %v5284_v7, %v718_v62 }
 0x351   :  { %6924 = vmatpush3.bf16.msra.mxu1 %v8252_v39 }
 0x352   :  { %5694 = vmatpush1.bf16.msra.mxu0 %v8222_v6  ;;  %v5293_v6 = vrot.slane %v5284_v7, %v722_v2 }
 0x353   :  { %5695 = vmatprep.subr.bf16.mxu0 %v8227_v37 }
 0x356   :  { %5696 = vmatpush1.bf16.msra.mxu0 %v8225_v8 }
 0x357   :  { %5697 = vmatprep.subr.bf16.mxu0 %v8230_v16 }
 0x35a   :  { %5698 = vmatpush1.bf16.msra.mxu0 %v8228_v9 }
 0x35b   :  { %5699 = vmatprep.subr.bf16.mxu0 %v8233_v17 }
 0x35e   :  { %5700 = vmatpush1.bf16.msra.mxu0 %v8231_v11 }
 0x35f   :  { %6881 = vmatprep.subr.bf16.mxu0 %v8234_v30 }
 0x395   :  { %v5177_v18 = vpop.f32.mrb[8].mxu1 }
 0x396   :  { %v6955_v46 = vadd.f32 %v5177_v18, %v727_v15  ;;  %v5179_v20 = vpop.f32.mrb[9].mxu1 }
 0x397   :  { %v6956_v60 = vadd.f32 %v5179_v20, %v731_v31  ;;  %v5181_v21 = vpop.f32.mrb[10].mxu1 }
 0x398   :  { %v6957_v61 = vadd.f32 %v5181_v21, %v727_v15  ;;  %v5183_v22 = vpop.f32.mrb[11].mxu1  ;;  %v5198_v1 = vmax.f32 %v6955_v46, 0.0 }
 0x399   :  { %v6958_v63 = vadd.f32 %v5183_v22, %v731_v31  ;;  %v5199_v54 = vmax.f32 %v6956_v60, 0.0 }
 0x39a   :  { %v5202_v49 = vmax.f32 %v6957_v61, 0.0 }
 0x39b   :  { %v5203_v4 = vmax.f32 %v6958_v63, 0.0 }
 0x39c   :  { %v5214_v26 = vpack.c.bf16 %v5202_v49, %v5198_v1 }
 0x39d   :  { %v5215_v57 = vpack.c.bf16 %v5203_v4, %v5199_v54  ;;  %v5187_v24 = vpop.f32.mrb[12].mxu1 }
 0x39e   :  { %v6959_v32 = vadd.f32 %v5187_v24, %v727_v15  ;;  %v5189_v27 = vpop.f32.mrb[13].mxu1  ;;  %v8253_v24 = vld [vmem:[%s10892_s7 + $0x18] sm:$0xff]  }
 0x39f   :  { %v6960_v34 = vadd.f32 %v5189_v27, %v731_v31  ;;  %v5191_v33 = vpop.f32.mrb[14].mxu1  ;;  %5701 = vmatprep.mubr.bf16.mxu0 %v5215_v57  ;;  %6925 = vmatprep.subr.bf16.mxu1 %v8253_v24  ;;  %v8256_v27 = vld [vmem:[%s10892_s7 + $0x30] sm:$0xff]  }
 0x3a0   :  { %v6961_v36 = vadd.f32 %v5191_v33, %v727_v15  ;;  %v5193_v51 = vpop.f32.mrb[15].mxu1  ;;  %5702 = vmatmul.mubr.bf16.vlgmr.msra.gmra.mrb[8].mxu0 %v5214_v26  ;;  %v5206_v41 = vmax.f32 %v6959_v32, 0.0  ;;  %6926 = vmatpush3.bf16.msra.mxu1 %v8253_v24  ;;  %v8255_v32 = vld [vmem:[%s10892_s7 + $0x28] sm:$0xff]   ;;  %v6855_v33 = vld [vmem:[%s10891_s6] ss:$0 sm:$0xff] }
 0x3a1   :  { %v6962_v38 = vadd.f32 %v5193_v51, %v731_v31  ;;  %6882 = vmatpush3.bf16.msra.mxu0 %v8235_v0  ;;  %v5207_v44 = vmax.f32 %v6960_v34, 0.0  ;;  %v8254_v0 = vld [vmem:[%s10892_s7 + $0x20] sm:$0xff]  }
 0x3a2   :  { %v5210_v42 = vmax.f32 %v6961_v36, 0.0  ;;  %6883 = vmatprep.subr.bf16.mxu0 %v8236_v29  ;;  %6927 = vmatprep.subr.bf16.mxu1 %v8254_v0  ;;  %v8257_v29 = vld [vmem:[%s10892_s7 + $0x38] sm:$0xff]  }
 0x3a3   :  { %v5211_v35 = vmax.f32 %v6962_v38, 0.0 }
 0x3a4   :  { %v5218_v14 = vpack.c.bf16 %v5210_v42, %v5206_v41  ;;  %6928 = vmatpush3.bf16.msra.mxu1 %v8254_v0 }
 0x3a5   :  { %v5219_v45 = vpack.c.bf16 %v5211_v35, %v5207_v44  ;;  %6884 = vmatpush3.bf16.msra.mxu0 %v8237_v5  ;;  %6929 = vmatprep.subr.bf16.mxu1 %v8255_v32 }
 0x3a6   :  { %6885 = vmatprep.subr.bf16.mxu0 %v8238_v43 }
 0x3a7   :  { %5711 = vmatprep.mubr.bf16.mxu0 %v5219_v45 }
 0x3a8   :  { %5712 = vmatmul.mubr.bf16.gmra.mrb[12].mxu0 %v5218_v14  ;;  %6930 = vmatpush3.bf16.msra.mxu1 %v8255_v32 }
 0x3a9   :  { %6886 = vmatpush3.bf16.msra.mxu0 %v8239_v40  ;;  %6931 = vmatprep.subr.bf16.mxu1 %v8256_v27 }
 0x3aa   :  { %6887 = vmatprep.subr.bf16.mxu0 %v8240_v47 }
 0x3ac   :  { %6932 = vmatpush3.bf16.msra.mxu1 %v8256_v27 }
 0x3ad   :  { %6888 = vmatpush3.bf16.msra.mxu0 %v8241_v19  ;;  %6933 = vmatprep.subr.bf16.mxu1 %v8257_v29 }
 0x3ae   :  { %6889 = vmatprep.subr.bf16.mxu0 %v8242_v48 }
 0x3b0   :  { %6934 = vmatpush3.bf16.msra.mxu1 %v8257_v29 }
 0x3b1   :  { %6890 = vmatpush3.bf16.msra.mxu0 %v8243_v50 }
 0x3b2   :  { %6891 = vmatprep.subr.bf16.mxu0 %v8244_v52 }
 0x3b5   :  { %6892 = vmatpush3.bf16.msra.mxu0 %v8245_v53 }
 0x3b6   :  { %6893 = vmatprep.subr.bf16.mxu0 %v8246_v25 }
 0x3b9   :  { %6894 = vmatpush3.bf16.msra.mxu0 %v8247_v55 }
 0x3ba   :  { %6895 = vmatprep.subr.bf16.mxu0 %v8248_v28 }
 0x3bd   :  { %6896 = vmatpush3.bf16.msra.mxu0 %v8249_v56  ;;  %v6872_v56 = vld [vmem:[%s10893_s8] ss:$0 sm:$0xff]  ;;  %s8306_s8 = smov [#allocation2]  }
 0x3be   :  { %s6100_s28 = sshll.u32 %s8306_s8, 4  ;;  %s6101_s28 = int_to_ptr.vmem [resolvable:$true] %s6100_s28 }
 0x3bf   :  { %s8282_s29 = scalar_lea.vmem %s6101_s28, 512  ;;  %p8287_p1 = scmp.lt.s32.totalorder %s6101_s28, %s6101_s28 }
 0x3c0   :  { %p8283_p0 = scmp.ne.s32.totalorder %s6101_s28, %s8282_s29  ;;  %p8288_p2 = scmp.lt.s32.totalorder %s8282_s29, %s8282_s29 }
 0x3c2   :  { %p8289_p3 = por %p8288_p2, %p8287_p1 }
 0x3c4   :  { %p8290_p4 = pnand %p8289_p3, %p8283_p0 }
 0x473   :  { %v5703_v37 = vpop.f32.mrb[8].mxu0 }
 0x474   :  { %v6963_v8 = vadd.f32 %v5703_v37, %v5289_v10  ;;  %v5705_v16 = vpop.f32.mrb[9].mxu0 }
 0x475   :  { %v6964_v9 = vadd.f32 %v5705_v16, %v5293_v6  ;;  %v5707_v17 = vpop.f32.mrb[10].mxu0 }
 0x476   :  { %v6965_v11 = vadd.f32 %v5707_v17, %v5289_v10  ;;  %v5709_v30 = vpop.f32.mrb[11].mxu0  ;;  %v5722_v13 = vmax.f32 %v6963_v8, 0.0 }
 0x477   :  { %v6966_v12 = vadd.f32 %v5709_v30, %v5293_v6  ;;  %v5723_v31 = vmax.f32 %v6964_v9, 0.0 }
 0x478   :  { %v5724_v15 = vmax.f32 %v6965_v11, 0.0 }
 0x479   :  { %v5725_v18 = vmax.f32 %v6966_v12, 0.0 }
 0x47a   :  { %v5730_v46 = vpack.c.bf16 %v5724_v15, %v5722_v13 }
 0x47b   :  { %v5731_v20 = vpack.c.bf16 %v5725_v18, %v5723_v31  ;;  %v5713_v60 = vpop.f32.mrb[12].mxu0 }
 0x47c   :  { %v6967_v21 = vadd.f32 %v5713_v60, %v5289_v10  ;;  %v5715_v62 = vpop.f32.mrb[13].mxu0 }
 0x47d   :  { %v6968_v61 = vadd.f32 %v5715_v62, %v5293_v6  ;;  %v5717_v3 = vpop.f32.mrb[14].mxu0  ;;  %5901 = vmatprep.mubr.bf16.mxu0 %v5731_v20 }
 0x47e   :  { %v6969_v2 = vadd.f32 %v5717_v3, %v5289_v10  ;;  %v5719_v22 = vpop.f32.mrb[15].mxu0  ;;  %5902 = vmatmul.mubr.bf16.vlgmr.msra.gmra.mrb[16].mxu0 %v5730_v46  ;;  %v5726_v1 = vmax.f32 %v6967_v21, 0.0 }
 0x47f   :  { %v6970_v63 = vadd.f32 %v5719_v22, %v5293_v6  ;;  %v5727_v54 = vmax.f32 %v6968_v61, 0.0 }
 0x480   :  { %v5728_v49 = vmax.f32 %v6969_v2, 0.0 }
 0x481   :  { %v5729_v4 = vmax.f32 %v6970_v63, 0.0 }
 0x482   :  { %v5732_v26 = vpack.c.bf16 %v5728_v49, %v5726_v1 }
 0x483   :  { %v5733_v57 = vpack.c.bf16 %v5729_v4, %v5727_v54 }
 0x485   :  { %5909 = vmatprep.mubr.bf16.mxu0 %v5733_v57 }
 0x486   :  { %5910 = vmatmul.mubr.bf16.gmra.mrb[20].mxu0 %v5732_v26 }
 0x551   :  { %v6897_v34 = vpop.f32.mrb[16].mxu0 }
 0x552   :  { %v6898_v36 = vpop.f32.mrb[17].mxu0 }
 0x553   :  { %v6899_v51 = vadd.f32 %v6898_v36, %v6897_v34  ;;  %v6900_v38 = vpop.f32.mrb[18].mxu0 }
 0x554   :  { %v6901_v5 = vpop.f32.mrb[19].mxu0 }
 0x555   :  { %v5904_v41 = vadd.f32 %v6899_v51, %v6855_v33  ;;  %v6902_v42 = vadd.f32 %v6901_v5, %v6900_v38 }
 0x557   :  { %v5907_v43 = vadd.f32 %v6902_v42, %v6855_v33  ;;  %v5918_v44 = vmax.f32 %v5904_v41, 0.0 }
 0x559   :  { %v5919_v35 = vmax.f32 %v5907_v43, 0.0  ;;  %v6903_v14 = vpop.f32.mrb[20].mxu0 }
 0x55a   :  { %v6904_v45 = vpop.f32.mrb[21].mxu0 }
 0x55b   :  { %v6905_v40 = vadd.f32 %v6904_v45, %v6903_v14  ;;  %v6906_v47 = vpop.f32.mrb[22].mxu0  ;;  %v5922_v19 = vpack.c.bf16 %v5919_v35, %v5918_v44 }
 0x55c   :  { %v6907_v48 = vpop.f32.mrb[23].mxu0 }
 0x55d   :  { %v5912_v50 = vadd.f32 %v6905_v40, %v6855_v33  ;;  %v6908_v52 = vadd.f32 %v6907_v48, %v6906_v47  ;;  %6935 = vmatprep.mubr.bf16.mxu1 %v5922_v19 }
 0x55f   :  { %v5915_v53 = vadd.f32 %v6908_v52, %v6855_v33  ;;  %v5920_v25 = vmax.f32 %v5912_v50, 0.0 }
 0x561   :  { %v5921_v55 = vmax.f32 %v5915_v53, 0.0 }
 0x563   :  { %v5923_v28 = vpack.c.bf16 %v5921_v55, %v5920_v25 }
 0x565   :  { %6936 = vmatmul.mubr.bf16.vlgmr.msra.gmra.mrb[16].mxu1 %v5923_v28 }
 0x638   :  { %v6937_v58 = vpop.f32.mrb[16].mxu1 }
 0x639   :  { %v6038_v39 = vadd.f32 %v6937_v58, %v6872_v56  ;;  %v6029_v7 = vpop.f32.mrb[17].mxu1 }
 0x63a   :  { %v6030_v10 = vadd.f32 %v6872_v56, %v6029_v7  ;;  %v6938_v6 = vpop.f32.mrb[18].mxu1 }
 0x63b   :  { %v6046_v37 = vmax.f32 %v6038_v39, 0.0  ;;  %v6041_v8 = vadd.f32 %v6938_v6, %v6872_v56  ;;  %v6032_v16 = vpop.f32.mrb[19].mxu1 }
 0x63c   :  { %v6044_v9 = vmax.f32 %v6030_v10, 0.0  ;;  %v6033_v17 = vadd.f32 %v6872_v56, %v6032_v16 }
 0x63d   :  { %v6047_v11 = vmax.f32 %v6041_v8, 0.0  ;;  %v6053_v30 = vsel %vm6050_vm0, %v6046_v37, -1e+30 }
 0x63e   :  { %v6045_v12 = vmax.f32 %v6033_v17, 0.0  ;;  %6059 = vmax.xlane.f32.xlu1 %v6053_v30  ;;  %v6051_v13 = vsel %vm6050_vm0, %v6044_v9, -1e+30 }
 0x63f   :  { %6055 = vmax.xlane.f32.xlu0 %v6051_v13  ;;  %v6054_v15 = vsel %vm6050_vm0, %v6047_v11, -1e+30 }
 0x640   :  { %v6052_v59 = vsel %vm6050_vm0, %v6045_v12, -1e+30 }
 0x642   :  { %6061 = vmax.xlane.f32.xlu1 %v6054_v15 }
 0x643   :  { %6057 = vmax.xlane.f32.xlu0 %v6052_v59 }
 0x6cb   :  { %v6060_v31 = vpop.xlane.xlu1 %6059 }
 0x6cc   :  { %v6065_v18 = vsub.f32 %v6053_v30, %v6060_v31  ;;  %v6056_v46 = vpop.xlane.xlu0 %6055 }
 0x6cd   :  { %v6063_v20 = vsub.f32 %v6051_v13, %v6056_v46 }
 0x6ce   :  { %v6071_v62 = vmul.f32 1.442695, %v6065_v18 }
 0x6cf   :  { %v6067_v60 = vmul.f32 1.442695, %v6063_v20  ;;  %v6062_v21 = vpop.xlane.xlu1 %6061 }
 0x6d0   :  { %v6058_v61 = vpop.xlane.xlu0 %6057  ;;  %v6066_v3 = vsub.f32 %v6054_v15, %v6062_v21 }
 0x6d1   :  { %8258 = vpow2.f32 %v6067_v60  ;;  %v6064_v2 = vsub.f32 %v6052_v59, %v6058_v61 }
 0x6d2   :  { %8260 = vpow2.f32 %v6071_v62  ;;  %v6073_v63 = vmul.f32 1.442695, %v6066_v3 }
 0x6d3   :  { %v6069_v22 = vmul.f32 1.442695, %v6064_v2 }
 0x6d5   :  { %8262 = vpow2.f32 %v6069_v22 }
 0x6d6   :  { %8264 = vpow2.f32 %v6073_v63 }
 0x6db   :  { %v8259_v1 = vpop.eup %8258 }
 0x6dc   :  { %6075 = vadd.xlane.f32.xlu0 %v8259_v1  ;;  %v8261_v49 = vpop.eup %8260 }
 0x6df   :  { %v8263_v54 = vpop.eup %8262 }
 0x6e0   :  { %6079 = vadd.xlane.f32.xlu0 %v8261_v49  ;;  %6077 = vadd.xlane.f32.xlu1 %v8263_v54  ;;  %v8265_v4 = vpop.eup %8264 }
 0x6e4   :  { %6081 = vadd.xlane.f32.xlu1 %v8265_v4 }
 0x769   :  { %v6076_v26 = vpop.xlane.xlu0 %6075 }
 0x76a   :  { %8266 = vrcp.f32 %v6076_v26 }
 0x76d   :  { %v6078_v57 = vpop.xlane.xlu1 %6077  ;;  %v6080_v24 = vpop.xlane.xlu0 %6079 }
 0x76e   :  { %8268 = vrcp.f32 %v6078_v57 }
 0x76f   :  { %8270 = vrcp.f32 %v6080_v24 }
 0x771   :  { %v6082_v0 = vpop.xlane.xlu1 %6081 }
 0x772   :  { %8272 = vrcp.f32 %v6082_v0 }
 0x774   :  { %v8267_v32 = vpop.eup %8266 }
 0x775   :  { %v6087_v27 = vmul.f32 %v8267_v32, %v8259_v1 }
 0x777   :  { %6091 = vst [vmem:[#allocation2] sm:$0xff] %v6087_v27 }
 0x778   :  { %v8269_v29 = vpop.eup %8268 }
 0x779   :  { %v8271_v34 = vpop.eup %8270  ;;  %v6088_v33 = vmul.f32 %v8269_v29, %v8263_v54 }
 0x77a   :  { %v6089_v36 = vmul.f32 %v8271_v34, %v8261_v49 }
 0x77b   :  { %6092 = vst [vmem:[#allocation2 + $0x8] sm:$0xff] %v6088_v33 }
 0x77c   :  { %v8273_v51 = vpop.eup %8272  ;;  %6093 = vst [vmem:[#allocation2 + $0x10] sm:$0xff] %v6089_v36 }
 0x77d   :  { %v6090_v38 = vmul.f32 %v8273_v51, %v8265_v4 }
 0x77f   :  { %6094 = vst [vmem:[#allocation2 + $0x18] sm:$0xff] %v6090_v38 }
 0x780   :  { %8293 = shalt.err (!%p8290_p4)
}
 0x781   :  { %s8294_s10 = scalar_lea.hbm %s10894_s9, 512 }
 0x782   :  { %p8295_p5 = scmp.ne.s32.totalorder %s10894_s9, %s8294_s10  ;;  %p8298_p6 = scmp.lt.u32.totalorder %s8294_s10, %s10894_s9 }
 0x784   :  { %p8300_p7 = pnand %p8298_p6, %p8295_p5 }
 0x786   :  { %8303 = shalt.err (!%p8300_p7)
}
 0x787   :  { %s8307_s14 = smov 128   ;;  %s8308_s15 = smov 8  }
 0x788   :  { %6106 = dma.vmem_to_hbm [thread:$0]  %s6101_s28, 512, %s10894_s9, [#allocation3], %s8307_s14, %s8307_s14, %s8308_s15  }
 0x789   :  { %8304 = dma.done.wait [#allocation3], 512  }
 0x78a   :  { %8305 = vsyncadd [#allocation3], 4294966784 }
 0x78b   :  { %6110 = vsyncpa [#allocation3], 1 }

</bundles_post_ra>
